<compile_context>
chip_gen: v5e
topology: v5e:2x2
jax: 0.10.0
libtpu: 0.0.40
codegen_flags: <defaults>
</compile_context>

<pallas_src>
import functools

import jax
import jax.numpy as jnp
from jax.experimental import pallas as pl
from jax.experimental.pallas import tpu as pltpu

F32 = jnp.float32
BF16 = jnp.bfloat16
LN_EPS = 1e-5
BN_EPS = 1e-5
LANE = 128


def _ceil_to(n, m):
    return ((n + m - 1) // m) * m


@functools.lru_cache(maxsize=None)
def _vmem_limit_bytes():
    # 3/4 of physical VMEM: 96 MiB on v5e/v6e, 48 MiB on v7x; conservative fallback.
    try:
        phys = int(pltpu.get_tpu_info().vmem_capacity_bytes)
    except Exception:
        phys = 64 * 1024 * 1024
    return max(32 * 1024 * 1024, min(3 * phys // 4, 96 * 1024 * 1024))


def _cparams(grid_rank):
    return pltpu.CompilerParams(
        dimension_semantics=("parallel",) * grid_rank,
        vmem_limit_bytes=_vmem_limit_bytes(),
    )


def _sigmoid(x):
    # 0.5*(tanh(x/2)+1) == sigmoid(x); tanh lands on the EUP slot (no VPU divide).
    return 0.5 * (jnp.tanh(0.5 * x) + 1.0)


def _ln(x, g, b, n_valid):
    # LayerNorm over the *real* feature count; relies on padded lanes of x being zero.
    inv_n = 1.0 / n_valid
    mean = jnp.sum(x, axis=-1, keepdims=True) * inv_n
    var = jnp.sum(x * x, axis=-1, keepdims=True) * inv_n - mean * mean
    return (x - mean) * jax.lax.rsqrt(var + LN_EPS) * g + b


def _row_block(rows, target=1024):
    return rows if rows <= target else target


def _full_spec(shape):
    return pl.BlockSpec(shape, lambda *_: (0,) * len(shape))


# ----------------------------------------------------------------- Pallas kernels
def _linear_kernel(x_ref, w_ref, b_ref, o_ref):
    acc = jnp.dot(x_ref[...].astype(BF16), w_ref[...],
                  preferred_element_type=jnp.float32) + b_ref[...]
    o_ref[...] = acc.astype(o_ref.dtype)


def _ffn_block_kernel(x_ref, g_ref, b_ref, w1_ref, b1_ref, w2_ref, b2_ref, *rest,
                      with_post_ln, d_model):
    # out = x + 0.5 * (Linear -> Swish -> Linear)(LN(x)), optionally followed by post-LN.
    x = x_ref[...].astype(jnp.float32)
    h = _ln(x, g_ref[...], b_ref[...], d_model)
    h = jnp.dot(h.astype(BF16), w1_ref[...],
                preferred_element_type=jnp.float32) + b1_ref[...]
    h = h * _sigmoid(h)                                   # Swish
    y = jnp.dot(h.astype(BF16), w2_ref[...],
                preferred_element_type=jnp.float32) + b2_ref[...]
    y = x + 0.5 * y
    if with_post_ln:
        pg_ref, pb_ref, o_ref = rest
        y = _ln(y, pg_ref[...], pb_ref[...], d_model)
    else:
        (o_ref,) = rest
    o_ref[...] = y.astype(o_ref.dtype)


def _attn_block_kernel(x_ref, g_ref, b_ref, wq_ref, wk_ref, wv_ref, wout_ref,
                       bout_ref, relw_ref, o_ref, *, heads, seq_len, d_model, scale):
    # One batch element per grid step:
    #   out = x + Wout @ softmax(q k^T * s + q E^T * s) v   (Shaw relative positions)
    H, T = heads, seq_len
    Rp = relw_ref.shape[-1]                                   # rel window width (128*k)
    x = x_ref[0].astype(jnp.float32)                          # (T, Dp)
    xn = _ln(x, g_ref[...], b_ref[...], d_model)
    xb = jnp.broadcast_to(xn.astype(BF16)[None], (H,) + xn.shape)       # (H, T, Dp)

    q = jnp.einsum('htd,hdk->htk', xb, wq_ref[...],
                   preferred_element_type=jnp.float32)
    k = jnp.einsum('htd,hdk->htk', xb, wk_ref[...],
                   preferred_element_type=jnp.float32)
    v = jnp.einsum('htd,hdk->htk', xb, wv_ref[...],
                   preferred_element_type=jnp.float32)
    qb, kb, vb = q.astype(BF16), k.astype(BF16), v.astype(BF16)

    # Content scores: heads-batched MXU matmul.
    dots = jnp.einsum('htd,hsd->hts', qb, kb,
                      preferred_element_type=jnp.float32) * scale       # (H, T, T)

    # Shaw rel-pos scores: rel[h, i, r] = q_i . E[dist = T-1-r] (window columns are
    # ordered by descending distance and zero-padded to Rp lanes by the wrapper).
    relb = jnp.broadcast_to(relw_ref[...][None], (H,) + relw_ref.shape)
    rel = jnp.einsum('htd,hdr->htr', qb, relb,
                     preferred_element_type=jnp.float32) * scale        # (H, T, Rp)

    # Skew pos[h,i,j] = rel[h, i, j - i + T - 1] with a log2(Rp) barrel shifter of
    # static lane rotations (pltpu.roll) + per-row bit selects. Since Rp >= 2T-1,
    # wrapped / padded columns never land in the read range j < T.
    amt = (jax.lax.broadcasted_iota(jnp.int32, (1, T, 1), 1) + (Rp - T + 1)) % Rp
    pos = rel
    bit = 1
    while bit < Rp:
        rolled = pltpu.roll(pos, shift=bit, axis=2)
        pos = jnp.where((amt & bit) != 0, rolled, pos)
        bit *= 2

    logits = dots + pos[:, :, :T]
    m = jnp.max(logits, axis=-1, keepdims=True)
    p = jnp.exp(logits - m)
    attn = p * pl.reciprocal(jnp.sum(p, axis=-1, keepdims=True), approx=True)
    ctx = jnp.einsum('hts,hsd->htd', attn.astype(BF16), vb,
                     preferred_element_type=jnp.float32)                # (H, T, Dh)
    # Head merge + output projection as a batched matmul + sum (no in-kernel concat).
    y = jnp.sum(jnp.einsum('htd,hdD->htD', ctx.astype(BF16), wout_ref[...],
                           preferred_element_type=jnp.float32), axis=0) + bout_ref[...]
    o_ref[0] = (x + y).astype(o_ref.dtype)


def _conv_block_kernel(x_ref, g_ref, b_ref, w1_ref, b1_ref, dww_ref, dwb_ref,
                       w2_ref, b2_ref, o_ref, hpad_ref, *, seq_len, kernel_size,
                       inner_p, d_model):
    # out = x + PW2(Swish(DW_bn(GLU(PW1(LN(x)))))); eval-BatchNorm folded into DW.
    T, K = seq_len, kernel_size
    x = x_ref[0].astype(jnp.float32)                                    # (T, Dp)
    xn = _ln(x, g_ref[...], b_ref[...], d_model)
    h12 = jnp.dot(xn.astype(BF16), w1_ref[...],
                  preferred_element_type=jnp.float32) + b1_ref[...]      # (T, 2*inner_p)
    h = h12[:, :inner_p] * _sigmoid(h12[:, inner_p:])                    # GLU (channels)

    # Depthwise "same" conv over time: zero-padded VMEM scratch + K static sublane
    # slices, multiply-add only (no per-tap iota / compare / select masks).
    pad_l = K // 2
    hpad_ref[...] = jnp.zeros_like(hpad_ref)
    hpad_ref[pl.ds(pad_l, T), :] = h
    dww = dww_ref[...]                                                   # (K, inner_p)
    acc = jnp.zeros((T, inner_p), jnp.float32)
    for k in range(K):
        acc = acc + hpad_ref[pl.ds(k, T), :] * dww[k:k + 1, :]
    z = acc + dwb_ref[...]                                               # BN-folded bias
    z = z * _sigmoid(z)                                                  # Swish
    y = jnp.dot(z.astype(BF16), w2_ref[...],
                preferred_element_type=jnp.float32) + b2_ref[...]
    o_ref[0] = (x + y).astype(o_ref.dtype)


# ----------------------------------------------------------------- wrappers / glue
def _linear(x, w, b):
    d_in = x.shape[-1]
    d_out = w.shape[1]
    x2 = x.reshape(-1, d_in)
    rows = x2.shape[0]
    bm = _row_block(rows)
    out = pl.pallas_call(
        _linear_kernel,
        out_shape=jax.ShapeDtypeStruct((rows, d_out), F32),
        grid=(pl.cdiv(rows, bm),),
        in_specs=[pl.BlockSpec((bm, d_in), lambda i: (i, 0)),
                  _full_spec(w.shape), _full_spec(b.shape)],
        out_specs=pl.BlockSpec((bm, d_out), lambda i: (i, 0)),
        compiler_params=_cparams(1),
    )(x2, w, b)
    return out.reshape(x.shape[:-1] + (d_out,))


def _ffn_block(x, blk, pfx, cfg, post_ln=False):
    B, T, Dp = x.shape
    rows = B * T
    x2 = x.reshape(rows, Dp)
    bm = _row_block(rows)
    args = [x2, blk[pfx + '_ln_g'], blk[pfx + '_ln_b'],
            blk[pfx + '_w1'], blk[pfx + '_b1'], blk[pfx + '_w2'], blk[pfx + '_b2']]
    if post_ln:
        args += [blk['post_ln_g'], blk['post_ln_b']]
    in_specs = ([pl.BlockSpec((bm, Dp), lambda i: (i, 0))]
                + [_full_spec(a.shape) for a in args[1:]])
    kernel = functools.partial(_ffn_block_kernel, with_post_ln=post_ln,
                               d_model=cfg['hidden_size'])
    out = pl.pallas_call(
        kernel,
        out_shape=jax.ShapeDtypeStruct((rows, Dp), F32),
        grid=(pl.cdiv(rows, bm),),
        in_specs=in_specs,
        out_specs=pl.BlockSpec((bm, Dp), lambda i: (i, 0)),
        compiler_params=_cparams(1),
    )(*args)
    return out.reshape(B, T, Dp)


def _attn_block(x, blk, relw, cfg):
    B, T, Dp = x.shape
    scale = cfg['dim_head'] ** -0.5
    kernel = functools.partial(_attn_block_kernel, heads=cfg['heads'], seq_len=T,
                               d_model=cfg['hidden_size'], scale=scale)
    args = [x, blk['attn_ln_g'], blk['attn_ln_b'], blk['wq'], blk['wk'], blk['wv'],
            blk['wout'], blk['attn_out_b'], relw]
    in_specs = ([pl.BlockSpec((1, T, Dp), lambda bb: (bb, 0, 0))]
                + [_full_spec(a.shape) for a in args[1:]])
    # TODO(synk): add a q-tile grid axis / kv-tiled softmax for long T and odd B on v7x.
    return pl.pallas_call(
        kernel,
        out_shape=jax.ShapeDtypeStruct((B, T, Dp), F32),
        grid=(B,),
        in_specs=in_specs,
        out_specs=pl.BlockSpec((1, T, Dp), lambda bb: (bb, 0, 0)),
        compiler_params=_cparams(1),
    )(*args)


def _conv_block(x, blk, cfg):
    B, T, Dp = x.shape
    K = cfg['conv_kernel']
    innp = _ceil_to(cfg['hidden_size'] * cfg['conv_expansion'], LANE)
    kernel = functools.partial(_conv_block_kernel, seq_len=T, kernel_size=K,
                               inner_p=innp, d_model=cfg['hidden_size'])
    args = [x, blk['conv_ln_g'], blk['conv_ln_b'], blk['conv_w1'], blk['conv_b1'],
            blk['conv_dww'], blk['conv_dwb'], blk['conv_w2'], blk['conv_b2']]
    in_specs = ([pl.BlockSpec((1, T, Dp), lambda bb: (bb, 0, 0))]
                + [_full_spec(a.shape) for a in args[1:]])
    return pl.pallas_call(
        kernel,
        out_shape=jax.ShapeDtypeStruct((B, T, Dp), F32),
        grid=(B,),
        in_specs=in_specs,
        out_specs=pl.BlockSpec((1, T, Dp), lambda bb: (bb, 0, 0)),
        scratch_shapes=[pltpu.VMEM((T + K - 1, innp), jnp.float32)],
        compiler_params=_cparams(1),
    )(*args)


# ----------------------------------------------------------------- parameter prep
def _pad_axis(a, axis, new_size):
    pad = new_size - a.shape[axis]
    if pad == 0:
        return a
    widths = [(0, 0)] * a.ndim
    widths[axis] = (0, pad)
    return jnp.pad(a, widths)


def _pad2(a, rows, cols):
    return _pad_axis(_pad_axis(a, 0, rows), 1, cols)


def _row(v, n):
    return _pad_axis(v, 0, n).reshape(1, n)


def prepare_params(params, cfg):
    """One-time weight prep: lane-pad channel dims to 128, cast matmul weights to bf16,
    fold eval-mode BatchNorm into the depthwise conv, pre-split per-head projections."""
    D = cfg['hidden_size']
    Dp = _ceil_to(D, LANE)
    H, Dh = cfg['heads'], cfg['dim_head']
    ffp = _ceil_to(D * cfg['ff_mult'], LANE)
    innp = _ceil_to(D * cfg['conv_expansion'], LANE)
    outp = _ceil_to(cfg['output_size'], LANE)

    def split_heads(w):                          # (D, H*Dh) -> (H, Dp, Dh) bf16
        w = _pad_axis(w, 0, Dp)
        return jnp.transpose(w.reshape(Dp, H, Dh), (1, 0, 2)).astype(BF16)

    prep = {
        'pre_w': _pad_axis(params['pre_w'], 1, Dp).astype(BF16),
        'pre_b': _row(params['pre_b'], Dp),
        'out_w': _pad2(params['out_w'], Dp, outp).astype(BF16),
        'out_b': _row(params['out_b'], outp),
        'blocks': [],
    }
    inner_attn = H * Dh
    for blk in params['blocks']:
        bn_scale = blk['bn_g'] * jax.lax.rsqrt(blk['bn_var'] + BN_EPS)
        pb = {
            # FF1 / FF2 half-step feed-forward
            'ff1_ln_g': _row(blk['ff1_ln_g'], Dp), 'ff1_ln_b': _row(blk['ff1_ln_b'], Dp),
            'ff1_w1': _pad2(blk['ff1_w1'], Dp, ffp).astype(BF16),
            'ff1_b1': _row(blk['ff1_b1'], ffp),
            'ff1_w2': _pad2(blk['ff1_w2'], ffp, Dp).astype(BF16),
            'ff1_b2': _row(blk['ff1_b2'], Dp),
            'ff2_ln_g': _row(blk['ff2_ln_g'], Dp), 'ff2_ln_b': _row(blk['ff2_ln_b'], Dp),
            'ff2_w1': _pad2(blk['ff2_w1'], Dp, ffp).astype(BF16),
            'ff2_b1': _row(blk['ff2_b1'], ffp),
            'ff2_w2': _pad2(blk['ff2_w2'], ffp, Dp).astype(BF16),
            'ff2_b2': _row(blk['ff2_b2'], Dp),
            'post_ln_g': _row(blk['post_ln_g'], Dp),
            'post_ln_b': _row(blk['post_ln_b'], Dp),
            # attention (per-head projection splits, Shaw embedding pre-transposed)
            'attn_ln_g': _row(blk['attn_ln_g'], Dp),
            'attn_ln_b': _row(blk['attn_ln_b'], Dp),
            'wq': split_heads(blk['q_w']),
            'wk': split_heads(blk['kv_w'][:, :inner_attn]),
            'wv': split_heads(blk['kv_w'][:, inner_attn:]),
            'wout': _pad_axis(blk['attn_out_w'].reshape(H, Dh, D), 2, Dp).astype(BF16),
            'attn_out_b': _row(blk['attn_out_b'], Dp),
            'rel_emb_t': blk['rel_pos_emb'].T.astype(BF16),              # (Dh, 2P+1)
            # conv module (pointwise-1 value|gate fused, eval-BatchNorm folded into DW)
            'conv_ln_g': _row(blk['conv_ln_g'], Dp),
            'conv_ln_b': _row(blk['conv_ln_b'], Dp),
            'conv_w1': jnp.concatenate([_pad2(blk['pw1_w_out'], Dp, innp),
                                        _pad2(blk['pw1_w_gate'], Dp, innp)],
                                       axis=1).astype(BF16),
            'conv_b1': jnp.concatenate([_pad_axis(blk['pw1_b_out'], 0, innp),
                                        _pad_axis(blk['pw1_b_gate'], 0, innp)]
                                       ).reshape(1, 2 * innp),
            'conv_dww': _pad_axis(blk['dw_w'] * bn_scale[None, :], 1, innp),
            'conv_dwb': _row(blk['dw_b'] * bn_scale + blk['bn_b']
                             - blk['bn_mean'] * bn_scale, innp),
            'conv_w2': _pad2(blk['pw2_w'], innp, Dp).astype(BF16),
            'conv_b2': _row(blk['pw2_b'], Dp),
        }
        prep['blocks'].append(pb)
    return prep


# ----------------------------------------------------------------- forward
def base_encoder_forward(prep, inputs, input_lengths, cfg):
    assert inputs.ndim == 3
    # The reference's sort / inverse-sort by input_lengths is an exact no-op on the outputs
    # (every sub-module is batch-element independent in eval mode), so it is elided.
    del input_lengths
    B, T, _ = inputs.shape
    P = cfg['max_pos_emb']
    Rp = _ceil_to(2 * T - 1, LANE)
    # Shaw embedding window columns ordered by *descending* distance T-1 .. -(T-1).
    rel_idx = jnp.clip(jnp.arange(T - 1, -T, -1), -P, P) + P

    x = _linear(inputs, prep['pre_w'], prep['pre_b'])            # (B, T, Dp)
    for blk in prep['blocks']:
        x = _ffn_block(x, blk, 'ff1', cfg)
        relw = _pad_axis(jnp.take(blk['rel_emb_t'], rel_idx, axis=1), 1, Rp)  # (Dh, Rp)
        x = _attn_block(x, blk, relw, cfg)
        x = _conv_block(x, blk, cfg)
        x = _ffn_block(x, blk, 'ff2', cfg, post_ln=True)
    logits = _linear(x, prep['out_w'], prep['out_b'])            # (B, T, outp)
    return logits[..., :cfg['output_size']]


# ----------------------------------------------------------------- parameters
def init_params(key, cfg):
    D = cfg['hidden_size']
    inner_attn = cfg['heads'] * cfg['dim_head']
    ff_hidden = D * cfg['ff_mult']
    conv_inner = D * cfg['conv_expansion']
    K = cfg['conv_kernel']
    keys = iter(jax.random.split(key, 64))

    def w(shape, scale=0.02):
        return (scale * jax.random.normal(next(keys), shape)).astype(F32)

    def zeros(*shape):
        return jnp.zeros(shape, F32)

    def ones(*shape):
        return jnp.ones(shape, F32)

    params = {
        'pre_w': w((cfg['input_size'], D)), 'pre_b': zeros(D),
        'out_w': w((D, cfg['output_size'])), 'out_b': zeros(cfg['output_size']),
        'blocks': [],
    }
    for _ in range(cfg['n_layers']):
        blk = {
            'ff1_ln_g': ones(D), 'ff1_ln_b': zeros(D),
            'ff1_w1': w((D, ff_hidden)), 'ff1_b1': zeros(ff_hidden),
            'ff1_w2': w((ff_hidden, D)), 'ff1_b2': zeros(D),
            'attn_ln_g': ones(D), 'attn_ln_b': zeros(D),
            'q_w': w((D, inner_attn)),
            'kv_w': w((D, 2 * inner_attn)),
            'attn_out_w': w((inner_attn, D)), 'attn_out_b': zeros(D),
            'rel_pos_emb': w((2 * cfg['max_pos_emb'] + 1, cfg['dim_head']), scale=1.0),
            'conv_ln_g': ones(D), 'conv_ln_b': zeros(D),
            'pw1_w_out': w((D, conv_inner)), 'pw1_b_out': zeros(conv_inner),
            'pw1_w_gate': w((D, conv_inner)), 'pw1_b_gate': zeros(conv_inner),
            'dw_w': w((K, conv_inner)), 'dw_b': zeros(conv_inner),
            'bn_g': ones(conv_inner), 'bn_b': zeros(conv_inner),
            'bn_mean': zeros(conv_inner), 'bn_var': ones(conv_inner),
            'pw2_w': w((conv_inner, D)), 'pw2_b': zeros(D),
            'ff2_ln_g': ones(D), 'ff2_ln_b': zeros(D),
            'ff2_w1': w((D, ff_hidden)), 'ff2_b1': zeros(ff_hidden),
            'ff2_w2': w((ff_hidden, D)), 'ff2_b2': zeros(D),
            'post_ln_g': ones(D), 'post_ln_b': zeros(D),
        }
        params['blocks'].append(blk)
    return params


if __name__ == "__main__":
    cfg = dict(
        input_size=16, hidden_size=32, output_size=10, n_layers=2,
        heads=2, dim_head=64, ff_mult=4, conv_expansion=2, conv_kernel=31,
        max_pos_emb=512,
    )
    key = jax.random.PRNGKey(0)
    k_in, k_p = jax.random.split(key)
    params = init_params(k_p, cfg)
    prep = prepare_params(params, cfg)            # one-time weight prep (hoisted)

    B, T = 2, 8
    inputs = jax.random.normal(k_in, (B, T, cfg['input_size']), F32)
    input_lengths = jnp.array([5, 8], dtype=jnp.int32)

    fwd = jax.jit(lambda p, x, lens: base_encoder_forward(p, x, lens, cfg))
    logits = fwd(prep, inputs, input_lengths)
    jax.block_until_ready(logits)
    assert logits.shape == (B, T, cfg['output_size'])
    assert logits.dtype == F32
    print("KERNEL_OK")
</pallas_src>

<mosaic_0001>
module attributes {stable_mosaic.version = 11 : i64} {
  func.func @_linear_kernel(%arg0: i32, %arg1: memref<16x16xf32, #tpu.memory_space<vmem>>, %arg2: memref<16x128xbf16, #tpu.memory_space<vmem>>, %arg3: memref<1x128xf32, #tpu.memory_space<vmem>>, %arg4: memref<16x128xf32, #tpu.memory_space<vmem>>) attributes {dimension_semantics = [#tpu.dimension_semantics<parallel>], iteration_bounds = array<i64: 1>, scalar_prefetch = 0 : i64, scratch_operands = 0 : i64, tpu.core_type = #tpu.core_type<tc>, window_params = [{transform_indices = @transform_0, window_bounds = array<i64: 16, 16>}, {pipeline_mode = #tpu.pipeline_mode<synchronous>, transform_indices = @transform_1, window_bounds = array<i64: 16, 128>}, {pipeline_mode = #tpu.pipeline_mode<synchronous>, transform_indices = @transform_2, window_bounds = array<i64: 1, 128>}, {transform_indices = @transform_3, window_bounds = array<i64: 16, 128>}]} {
    %c0 = arith.constant 0 : index
    %c0_0 = arith.constant 0 : index
    %0 = vector.load %arg1[%c0, %c0_0] : memref<16x16xf32, #tpu.memory_space<vmem>>, vector<16x16xf32>
    %1 = arith.truncf %0 : vector<16x16xf32> to vector<16x16xbf16>
    %c0_1 = arith.constant 0 : index
    %c0_2 = arith.constant 0 : index
    %2 = vector.load %arg2[%c0_1, %c0_2] : memref<16x128xbf16, #tpu.memory_space<vmem>>, vector<16x128xbf16>
    %cst = arith.constant dense<0.000000e+00> : vector<16x128xf32>
    %3 = tpu.matmul %1, %2, %cst {dimension_numbers = #tpu.dot_dimension_numbers<[1], [0], [0], [1], [0, 0, 1, 1], [], []>} : vector<16x16xbf16>, vector<16x128xbf16>, vector<16x128xf32> -> vector<16x128xf32>
    %c0_3 = arith.constant 0 : index
    %c0_4 = arith.constant 0 : index
    %4 = vector.load %arg3[%c0_3, %c0_4] : memref<1x128xf32, #tpu.memory_space<vmem>>, vector<1x128xf32>
    %5 = vector.broadcast %4 : vector<1x128xf32> to vector<16x128xf32>
    %6 = arith.addf %3, %5 : vector<16x128xf32>
    %c0_5 = arith.constant 0 : index
    %c0_6 = arith.constant 0 : index
    %7 = vector.load %arg4[%c0_5, %c0_6] : memref<16x128xf32, #tpu.memory_space<vmem>>, vector<16x128xf32>
    tpu.vector_store %arg4[%c0_5, %c0_6], %6 {strides = array<i32>} : memref<16x128xf32, #tpu.memory_space<vmem>>, vector<16x128xf32>,
    return
  }
  func.func @transform_0(%arg0: i32) -> (i32, i32) {
    %c0_i32 = arith.constant 0 : i32
    %c0_i32_0 = arith.constant 0 : i32
    return %arg0, %c0_i32 : i32, i32
  }
  func.func @transform_1(%arg0: i32) -> (i32, i32) {
    %c0_i32 = arith.constant 0 : i32
    %c0_i32_0 = arith.constant 0 : i32
    %c0_i32_1 = arith.constant 0 : i32
    return %c0_i32, %c0_i32_0 : i32, i32
  }
  func.func @transform_2(%arg0: i32) -> (i32, i32) {
    %c0_i32 = arith.constant 0 : i32
    %c0_i32_0 = arith.constant 0 : i32
    %c0_i32_1 = arith.constant 0 : i32
    return %c0_i32, %c0_i32_0 : i32, i32
  }
  func.func @transform_3(%arg0: i32) -> (i32, i32) {
    %c0_i32 = arith.constant 0 : i32
    %c0_i32_0 = arith.constant 0 : i32
    return %arg0, %c0_i32 : i32, i32
  }
}

module attributes {stable_mosaic.version = 11 : i64} {
  func.func @_ffn_block_kernel(%arg0: i32, %arg1: memref<16x128xf32, #tpu.memory_space<vmem>>, %arg2: memref<1x128xf32, #tpu.memory_space<vmem>>, %arg3: memref<1x128xf32, #tpu.memory_space<vmem>>, %arg4: memref<128x128xbf16, #tpu.memory_space<vmem>>, %arg5: memref<1x128xf32, #tpu.memory_space<vmem>>, %arg6: memref<128x128xbf16, #tpu.memory_space<vmem>>, %arg7: memref<1x128xf32, #tpu.memory_space<vmem>>, %arg8: memref<16x128xf32, #tpu.memory_space<vmem>>) attributes {dimension_semantics = [#tpu.dimension_semantics<parallel>], iteration_bounds = array<i64: 1>, scalar_prefetch = 0 : i64, scratch_operands = 0 : i64, tpu.core_type = #tpu.core_type<tc>, window_params = [{transform_indices = @transform_0, window_bounds = array<i64: 16, 128>}, {pipeline_mode = #tpu.pipeline_mode<synchronous>, transform_indices = @transform_1, window_bounds = array<i64: 1, 128>}, {pipeline_mode = #tpu.pipeline_mode<synchronous>, transform_indices = @transform_2, window_bounds = array<i64: 1, 128>}, {pipeline_mode = #tpu.pipeline_mode<synchronous>, transform_indices = @transform_3, window_bounds = array<i64: 128, 128>}, {pipeline_mode = #tpu.pipeline_mode<synchronous>, transform_indices = @transform_4, window_bounds = array<i64: 1, 128>}, {pipeline_mode = #tpu.pipeline_mode<synchronous>, transform_indices = @transform_5, window_bounds = array<i64: 128, 128>}, {pipeline_mode = #tpu.pipeline_mode<synchronous>, transform_indices = @transform_6, window_bounds = array<i64: 1, 128>}, {transform_indices = @transform_7, window_bounds = array<i64: 16, 128>}]} {
    %c0 = arith.constant 0 : index
    %c0_0 = arith.constant 0 : index
    %0 = vector.load %arg1[%c0, %c0_0] : memref<16x128xf32, #tpu.memory_space<vmem>>, vector<16x128xf32>
    %c0_1 = arith.constant 0 : index
    %c0_2 = arith.constant 0 : index
    %1 = vector.load %arg2[%c0_1, %c0_2] : memref<1x128xf32, #tpu.memory_space<vmem>>, vector<1x128xf32>
    %c0_3 = arith.constant 0 : index
    %c0_4 = arith.constant 0 : index
    %2 = vector.load %arg3[%c0_3, %c0_4] : memref<1x128xf32, #tpu.memory_space<vmem>>, vector<1x128xf32>
    %cst = arith.constant dense<0.000000e+00> : vector<16xf32>
    %3 = vector.multi_reduction <add>, %0, %cst [1] : vector<16x128xf32> to vector<16xf32>
    %4 = vector.shape_cast %3 : vector<16xf32> to vector<16x1xf32>
    %cst_5 = arith.constant 3.125000e-02 : f32
    %5 = vector.broadcast %cst_5 : f32 to vector<16x1xf32>
    %6 = arith.mulf %4, %5 : vector<16x1xf32>
    %7 = arith.mulf %0, %0 : vector<16x128xf32>
    %cst_6 = arith.constant dense<0.000000e+00> : vector<16xf32>
    %8 = vector.multi_reduction <add>, %7, %cst_6 [1] : vector<16x128xf32> to vector<16xf32>
    %9 = vector.shape_cast %8 : vector<16xf32> to vector<16x1xf32>
    %cst_7 = arith.constant 3.125000e-02 : f32
    %10 = vector.broadcast %cst_7 : f32 to vector<16x1xf32>
    %11 = arith.mulf %9, %10 : vector<16x1xf32>
    %12 = arith.mulf %6, %6 : vector<16x1xf32>
    %13 = arith.subf %11, %12 : vector<16x1xf32>
    %14 = vector.broadcast %6 : vector<16x1xf32> to vector<16x128xf32>
    %15 = arith.subf %0, %14 : vector<16x128xf32>
    %cst_8 = arith.constant 9.99999974E-6 : f32
    %16 = vector.broadcast %cst_8 : f32 to vector<16x1xf32>
    %17 = arith.addf %13, %16 : vector<16x1xf32>
    %18 = math.rsqrt %17 : vector<16x1xf32>
    %19 = vector.broadcast %18 : vector<16x1xf32> to vector<16x128xf32>
    %20 = arith.mulf %15, %19 : vector<16x128xf32>
    %21 = vector.broadcast %1 : vector<1x128xf32> to vector<16x128xf32>
    %22 = arith.mulf %20, %21 : vector<16x128xf32>
    %23 = vector.broadcast %2 : vector<1x128xf32> to vector<16x128xf32>
    %24 = arith.addf %22, %23 : vector<16x128xf32>
    %25 = arith.truncf %24 : vector<16x128xf32> to vector<16x128xbf16>
    %c0_9 = arith.constant 0 : index
    %c0_10 = arith.constant 0 : index
    %26 = vector.load %arg4[%c0_9, %c0_10] : memref<128x128xbf16, #tpu.memory_space<vmem>>, vector<128x128xbf16>
    %cst_11 = arith.constant dense<0.000000e+00> : vector<16x128xf32>
    %27 = tpu.matmul %25, %26, %cst_11 {dimension_numbers = #tpu.dot_dimension_numbers<[1], [0], [0], [1], [0, 0, 1, 1], [], []>} : vector<16x128xbf16>, vector<128x128xbf16>, vector<16x128xf32> -> vector<16x128xf32>
    %c0_12 = arith.constant 0 : index
    %c0_13 = arith.constant 0 : index
    %28 = vector.load %arg5[%c0_12, %c0_13] : memref<1x128xf32, #tpu.memory_space<vmem>>, vector<1x128xf32>
    %29 = vector.broadcast %28 : vector<1x128xf32> to vector<16x128xf32>
    %30 = arith.addf %27, %29 : vector<16x128xf32>
    %cst_14 = arith.constant 5.000000e-01 : f32
    %31 = vector.broadcast %cst_14 : f32 to vector<16x128xf32>
    %32 = arith.mulf %31, %30 : vector<16x128xf32>
    %33 = math.tanh %32 : vector<16x128xf32>
    %cst_15 = arith.constant 1.000000e+00 : f32
    %34 = vector.broadcast %cst_15 : f32 to vector<16x128xf32>
    %35 = arith.addf %33, %34 : vector<16x128xf32>
    %cst_16 = arith.constant 5.000000e-01 : f32
    %36 = vector.broadcast %cst_16 : f32 to vector<16x128xf32>
    %37 = arith.mulf %36, %35 : vector<16x128xf32>
    %38 = arith.mulf %30, %37 : vector<16x128xf32>
    %39 = arith.truncf %38 : vector<16x128xf32> to vector<16x128xbf16>
    %c0_17 = arith.constant 0 : index
    %c0_18 = arith.constant 0 : index
    %40 = vector.load %arg6[%c0_17, %c0_18] : memref<128x128xbf16, #tpu.memory_space<vmem>>, vector<128x128xbf16>
    %cst_19 = arith.constant dense<0.000000e+00> : vector<16x128xf32>
    %41 = tpu.matmul %39, %40, %cst_19 {dimension_numbers = #tpu.dot_dimension_numbers<[1], [0], [0], [1], [0, 0, 1, 1], [], []>} : vector<16x128xbf16>, vector<128x128xbf16>, vector<16x128xf32> -> vector<16x128xf32>
    %c0_20 = arith.constant 0 : index
    %c0_21 = arith.constant 0 : index
    %42 = vector.load %arg7[%c0_20, %c0_21] : memref<1x128xf32, #tpu.memory_space<vmem>>, vector<1x128xf32>
    %43 = vector.broadcast %42 : vector<1x128xf32> to vector<16x128xf32>
    %44 = arith.addf %41, %43 : vector<16x128xf32>
    %cst_22 = arith.constant 5.000000e-01 : f32
    %45 = vector.broadcast %cst_22 : f32 to vector<16x128xf32>
    %46 = arith.mulf %45, %44 : vector<16x128xf32>
    %47 = arith.addf %0, %46 : vector<16x128xf32>
    %c0_23 = arith.constant 0 : index
    %c0_24 = arith.constant 0 : index
    %48 = vector.load %arg8[%c0_23, %c0_24] : memref<16x128xf32, #tpu.memory_space<vmem>>, vector<16x128xf32>
    tpu.vector_store %arg8[%c0_23, %c0_24], %47 {strides = array<i32>} : memref<16x128xf32, #tpu.memory_space<vmem>>, vector<16x128xf32>,
    return
  }
  func.func @transform_0(%arg0: i32) -> (i32, i32) {
    %c0_i32 = arith.constant 0 : i32
    %c0_i32_0 = arith.constant 0 : i32
    return %arg0, %c0_i32 : i32, i32
  }
  func.func @transform_1(%arg0: i32) -> (i32, i32) {
    %c0_i32 = arith.constant 0 : i32
    %c0_i32_0 = arith.constant 0 : i32
    %c0_i32_1 = arith.constant 0 : i32
    return %c0_i32, %c0_i32_0 : i32, i32
  }
  func.func @transform_2(%arg0: i32) -> (i32, i32) {
    %c0_i32 = arith.constant 0 : i32
    %c0_i32_0 = arith.constant 0 : i32
    %c0_i32_1 = arith.constant 0 : i32
    return %c0_i32, %c0_i32_0 : i32, i32
  }
  func.func @transform_3(%arg0: i32) -> (i32, i32) {
    %c0_i32 = arith.constant 0 : i32
    %c0_i32_0 = arith.constant 0 : i32
    %c0_i32_1 = arith.constant 0 : i32
    return %c0_i32, %c0_i32_0 : i32, i32
  }
  func.func @transform_4(%arg0: i32) -> (i32, i32) {
    %c0_i32 = arith.constant 0 : i32
    %c0_i32_0 = arith.constant 0 : i32
    %c0_i32_1 = arith.constant 0 : i32
    return %c0_i32, %c0_i32_0 : i32, i32
  }
  func.func @transform_5(%arg0: i32) -> (i32, i32) {
    %c0_i32 = arith.constant 0 : i32
    %c0_i32_0 = arith.constant 0 : i32
    %c0_i32_1 = arith.constant 0 : i32
    return %c0_i32, %c0_i32_0 : i32, i32
  }
  func.func @transform_6(%arg0: i32) -> (i32, i32) {
    %c0_i32 = arith.constant 0 : i32
    %c0_i32_0 = arith.constant 0 : i32
    %c0_i32_1 = arith.constant 0 : i32
    return %c0_i32, %c0_i32_0 : i32, i32
  }
  func.func @transform_7(%arg0: i32) -> (i32, i32) {
    %c0_i32 = arith.constant 0 : i32
    %c0_i32_0 = arith.constant 0 : i32
    return %arg0, %c0_i32 : i32, i32
  }
}

module attributes {stable_mosaic.version = 11 : i64} {
  func.func @_attn_block_kernel(%arg0: i32, %arg1: memref<1x8x128xf32, #tpu.memory_space<vmem>>, %arg2: memref<1x128xf32, #tpu.memory_space<vmem>>, %arg3: memref<1x128xf32, #tpu.memory_space<vmem>>, %arg4: memref<2x128x64xbf16, #tpu.memory_space<vmem>>, %arg5: memref<2x128x64xbf16, #tpu.memory_space<vmem>>, %arg6: memref<2x128x64xbf16, #tpu.memory_space<vmem>>, %arg7: memref<2x64x128xbf16, #tpu.memory_space<vmem>>, %arg8: memref<1x128xf32, #tpu.memory_space<vmem>>, %arg9: memref<64x128xbf16, #tpu.memory_space<vmem>>, %arg10: memref<1x8x128xf32, #tpu.memory_space<vmem>>) attributes {dimension_semantics = [#tpu.dimension_semantics<parallel>], iteration_bounds = array<i64: 2>, scalar_prefetch = 0 : i64, scratch_operands = 0 : i64, tpu.core_type = #tpu.core_type<tc>, window_params = [{transform_indices = @transform_0, window_bounds = array<i64: 1, 8, 128>}, {pipeline_mode = #tpu.pipeline_mode<synchronous>, transform_indices = @transform_1, window_bounds = array<i64: 1, 128>}, {pipeline_mode = #tpu.pipeline_mode<synchronous>, transform_indices = @transform_2, window_bounds = array<i64: 1, 128>}, {pipeline_mode = #tpu.pipeline_mode<synchronous>, transform_indices = @transform_3, window_bounds = array<i64: 2, 128, 64>}, {pipeline_mode = #tpu.pipeline_mode<synchronous>, transform_indices = @transform_4, window_bounds = array<i64: 2, 128, 64>}, {pipeline_mode = #tpu.pipeline_mode<synchronous>, transform_indices = @transform_5, window_bounds = array<i64: 2, 128, 64>}, {pipeline_mode = #tpu.pipeline_mode<synchronous>, transform_indices = @transform_6, window_bounds = array<i64: 2, 64, 128>}, {pipeline_mode = #tpu.pipeline_mode<synchronous>, transform_indices = @transform_7, window_bounds = array<i64: 1, 128>}, {pipeline_mode = #tpu.pipeline_mode<synchronous>, transform_indices = @transform_8, window_bounds = array<i64: 64, 128>}, {transform_indices = @transform_9, window_bounds = array<i64: 1, 8, 128>}]} {
    %c0 = arith.constant 0 : index
    %c0_0 = arith.constant 0 : index
    %c0_1 = arith.constant 0 : index
    %0 = vector.load %arg1[%c0, %c0_0, %c0_1] : memref<1x8x128xf32, #tpu.memory_space<vmem>>, vector<1x8x128xf32>
    %1 = vector.shape_cast %0 : vector<1x8x128xf32> to vector<8x128xf32>
    %c0_2 = arith.constant 0 : index
    %c0_3 = arith.constant 0 : index
    %2 = vector.load %arg2[%c0_2, %c0_3] : memref<1x128xf32, #tpu.memory_space<vmem>>, vector<1x128xf32>
    %c0_4 = arith.constant 0 : index
    %c0_5 = arith.constant 0 : index
    %3 = vector.load %arg3[%c0_4, %c0_5] : memref<1x128xf32, #tpu.memory_space<vmem>>, vector<1x128xf32>
    %cst = arith.constant dense<0.000000e+00> : vector<8xf32>
    %4 = vector.multi_reduction <add>, %1, %cst [1] : vector<8x128xf32> to vector<8xf32>
    %5 = vector.shape_cast %4 : vector<8xf32> to vector<8x1xf32>
    %cst_6 = arith.constant 3.125000e-02 : f32
    %6 = vector.broadcast %cst_6 : f32 to vector<8x1xf32>
    %7 = arith.mulf %5, %6 : vector<8x1xf32>
    %8 = arith.mulf %1, %1 : vector<8x128xf32>
    %cst_7 = arith.constant dense<0.000000e+00> : vector<8xf32>
    %9 = vector.multi_reduction <add>, %8, %cst_7 [1] : vector<8x128xf32> to vector<8xf32>
    %10 = vector.shape_cast %9 : vector<8xf32> to vector<8x1xf32>
    %cst_8 = arith.constant 3.125000e-02 : f32
    %11 = vector.broadcast %cst_8 : f32 to vector<8x1xf32>
    %12 = arith.mulf %10, %11 : vector<8x1xf32>
    %13 = arith.mulf %7, %7 : vector<8x1xf32>
    %14 = arith.subf %12, %13 : vector<8x1xf32>
    %15 = vector.broadcast %7 : vector<8x1xf32> to vector<8x128xf32>
    %16 = arith.subf %1, %15 : vector<8x128xf32>
    %cst_9 = arith.constant 9.99999974E-6 : f32
    %17 = vector.broadcast %cst_9 : f32 to vector<8x1xf32>
    %18 = arith.addf %14, %17 : vector<8x1xf32>
    %19 = math.rsqrt %18 : vector<8x1xf32>
    %20 = vector.broadcast %19 : vector<8x1xf32> to vector<8x128xf32>
    %21 = arith.mulf %16, %20 : vector<8x128xf32>
    %22 = vector.broadcast %2 : vector<1x128xf32> to vector<8x128xf32>
    %23 = arith.mulf %21, %22 : vector<8x128xf32>
    %24 = vector.broadcast %3 : vector<1x128xf32> to vector<8x128xf32>
    %25 = arith.addf %23, %24 : vector<8x128xf32>
    %26 = arith.truncf %25 : vector<8x128xf32> to vector<8x128xbf16>
    %27 = vector.shape_cast %26 : vector<8x128xbf16> to vector<1x8x128xbf16>
    %28 = vector.shape_cast %27 : vector<1x8x128xbf16> to vector<1x8x128xbf16>
    %29 = vector.broadcast %28 : vector<1x8x128xbf16> to vector<2x8x128xbf16>
    %c0_10 = arith.constant 0 : index
    %c0_11 = arith.constant 0 : index
    %c0_12 = arith.constant 0 : index
    %30 = vector.load %arg4[%c0_10, %c0_11, %c0_12] : memref<2x128x64xbf16, #tpu.memory_space<vmem>>, vector<2x128x64xbf16>
    "tpu.trace_start"() <{level = 10 : i32, message = "htd,hdk->htk"}> : () -> ()
    %cst_13 = arith.constant dense<0.000000e+00> : vector<2x8x64xf32>
    %31 = tpu.matmul %29, %30, %cst_13 {dimension_numbers = #tpu.dot_dimension_numbers<[2], [1], [1], [2], [0, 0, 0, 1, 1, 2], [0], [0]>} : vector<2x8x128xbf16>, vector<2x128x64xbf16>, vector<2x8x64xf32> -> vector<2x8x64xf32>
    "tpu.trace_stop"() : () -> ()
    %c0_14 = arith.constant 0 : index
    %c0_15 = arith.constant 0 : index
    %c0_16 = arith.constant 0 : index
    %32 = vector.load %arg5[%c0_14, %c0_15, %c0_16] : memref<2x128x64xbf16, #tpu.memory_space<vmem>>, vector<2x128x64xbf16>
    "tpu.trace_start"() <{level = 10 : i32, message = "htd,hdk->htk"}> : () -> ()
    %cst_17 = arith.constant dense<0.000000e+00> : vector<2x8x64xf32>
    %33 = tpu.matmul %29, %32, %cst_17 {dimension_numbers = #tpu.dot_dimension_numbers<[2], [1], [1], [2], [0, 0, 0, 1, 1, 2], [0], [0]>} : vector<2x8x128xbf16>, vector<2x128x64xbf16>, vector<2x8x64xf32> -> vector<2x8x64xf32>
    "tpu.trace_stop"() : () -> ()
    %c0_18 = arith.constant 0 : index
    %c0_19 = arith.constant 0 : index
    %c0_20 = arith.constant 0 : index
    %34 = vector.load %arg6[%c0_18, %c0_19, %c0_20] : memref<2x128x64xbf16, #tpu.memory_space<vmem>>, vector<2x128x64xbf16>
    "tpu.trace_start"() <{level = 10 : i32, message = "htd,hdk->htk"}> : () -> ()
    %cst_21 = arith.constant dense<0.000000e+00> : vector<2x8x64xf32>
    %35 = tpu.matmul %29, %34, %cst_21 {dimension_numbers = #tpu.dot_dimension_numbers<[2], [1], [1], [2], [0, 0, 0, 1, 1, 2], [0], [0]>} : vector<2x8x128xbf16>, vector<2x128x64xbf16>, vector<2x8x64xf32> -> vector<2x8x64xf32>
    "tpu.trace_stop"() : () -> ()
    %36 = arith.truncf %31 : vector<2x8x64xf32> to vector<2x8x64xbf16>
    %37 = arith.truncf %33 : vector<2x8x64xf32> to vector<2x8x64xbf16>
    %38 = arith.truncf %35 : vector<2x8x64xf32> to vector<2x8x64xbf16>
    "tpu.trace_start"() <{level = 10 : i32, message = "htd,hsd->hts"}> : () -> ()
    %cst_22 = arith.constant dense<0.000000e+00> : vector<2x8x8xf32>
    %39 = tpu.matmul %36, %37, %cst_22 {dimension_numbers = #tpu.dot_dimension_numbers<[2], [2], [1], [1], [0, 0, 0, 1, 1, 1], [0], [0]>} : vector<2x8x64xbf16>, vector<2x8x64xbf16>, vector<2x8x8xf32> -> vector<2x8x8xf32>
    "tpu.trace_stop"() : () -> ()
    %cst_23 = arith.constant 1.250000e-01 : f32
    %40 = vector.broadcast %cst_23 : f32 to vector<2x8x8xf32>
    %41 = arith.mulf %39, %40 : vector<2x8x8xf32>
    %c0_24 = arith.constant 0 : index
    %c0_25 = arith.constant 0 : index
    %42 = vector.load %arg9[%c0_24, %c0_25] : memref<64x128xbf16, #tpu.memory_space<vmem>>, vector<64x128xbf16>
    %43 = vector.shape_cast %42 : vector<64x128xbf16> to vector<1x64x128xbf16>
    %44 = vector.shape_cast %43 : vector<1x64x128xbf16> to vector<1x64x128xbf16>
    %45 = vector.broadcast %44 : vector<1x64x128xbf16> to vector<2x64x128xbf16>
    "tpu.trace_start"() <{level = 10 : i32, message = "htd,hdr->htr"}> : () -> ()
    %cst_26 = arith.constant dense<0.000000e+00> : vector<2x8x128xf32>
    %46 = tpu.matmul %36, %45, %cst_26 {dimension_numbers = #tpu.dot_dimension_numbers<[2], [1], [1], [2], [0, 0, 0, 1, 1, 2], [0], [0]>} : vector<2x8x64xbf16>, vector<2x64x128xbf16>, vector<2x8x128xf32> -> vector<2x8x128xf32>
    "tpu.trace_stop"() : () -> ()
    %cst_27 = arith.constant 1.250000e-01 : f32
    %47 = vector.broadcast %cst_27 : f32 to vector<2x8x128xf32>
    %48 = arith.mulf %46, %47 : vector<2x8x128xf32>
    %49 = tpu.iota {dimensions = array<i32: 1>} : vector<1x8x1xi32>
    %c121_i32 = arith.constant 121 : i32
    %50 = vector.broadcast %c121_i32 : i32 to vector<1x8x1xi32>
    %51 = arith.addi %49, %50 : vector<1x8x1xi32>
    %c128_i32 = arith.constant 128 : i32
    %c0_i32 = arith.constant 0 : i32
    %52 = arith.cmpi eq, %c128_i32, %c0_i32 : i32
    %c1_i32 = arith.constant 1 : i32
    %53 = arith.select %52, %c1_i32, %c128_i32 : i32
    %54 = vector.broadcast %53 : i32 to vector<1x8x1xi32>
    %55 = arith.remsi %51, %54 : vector<1x8x1xi32>
    %c0_i32_28 = arith.constant 0 : i32
    %56 = vector.broadcast %c0_i32_28 : i32 to vector<1x8x1xi32>
    %57 = arith.cmpi ne, %55, %56 : vector<1x8x1xi32>
    %c0_i32_29 = arith.constant 0 : i32
    %58 = vector.broadcast %c0_i32_29 : i32 to vector<1x8x1xi32>
    %59 = arith.cmpi slt, %55, %58 : vector<1x8x1xi32>
    %c0_i32_30 = arith.constant 0 : i32
    %60 = arith.cmpi slt, %53, %c0_i32_30 : i32
    %61 = vector.broadcast %60 : i1 to vector<1x8x1xi1>
    %62 = vector.broadcast %61 : vector<1x8x1xi1> to vector<1x8x1xi1>
    %63 = arith.xori %59, %62 : vector<1x8x1xi1>
    %64 = arith.andi %63, %57 : vector<1x8x1xi1>
    %65 = vector.broadcast %53 : i32 to vector<1x8x1xi32>
    %66 = arith.addi %55, %65 : vector<1x8x1xi32>
    %67 = arith.select %64, %66, %55 : vector<1x8x1xi1>, vector<1x8x1xi32>
    %c1_i32_31 = arith.constant 1 : i32
    %68 = tpu.dynamic_rotate %48 by %c1_i32_31 dim 2 : vector<2x8x128xf32>, i32 -> vector<2x8x128xf32>
    %c1_i32_32 = arith.constant 1 : i32
    %69 = vector.broadcast %c1_i32_32 : i32 to vector<1x8x1xi32>
    %70 = arith.andi %67, %69 : vector<1x8x1xi32>
    %c0_i32_33 = arith.constant 0 : i32
    %71 = vector.broadcast %c0_i32_33 : i32 to vector<1x8x1xi32>
    %72 = arith.cmpi ne, %70, %71 : vector<1x8x1xi32>
    %73 = vector.shape_cast %72 : vector<1x8x1xi1> to vector<1x8x1xi1>
    %74 = vector.broadcast %73 : vector<1x8x1xi1> to vector<2x8x128xi1>
    %75 = arith.select %74, %68, %48 : vector<2x8x128xi1>, vector<2x8x128xf32>
    %c2_i32 = arith.constant 2 : i32
    %76 = tpu.dynamic_rotate %75 by %c2_i32 dim 2 : vector<2x8x128xf32>, i32 -> vector<2x8x128xf32>
    %c2_i32_34 = arith.constant 2 : i32
    %77 = vector.broadcast %c2_i32_34 : i32 to vector<1x8x1xi32>
    %78 = arith.andi %67, %77 : vector<1x8x1xi32>
    %c0_i32_35 = arith.constant 0 : i32
    %79 = vector.broadcast %c0_i32_35 : i32 to vector<1x8x1xi32>
    %80 = arith.cmpi ne, %78, %79 : vector<1x8x1xi32>
    %81 = vector.shape_cast %80 : vector<1x8x1xi1> to vector<1x8x1xi1>
    %82 = vector.broadcast %81 : vector<1x8x1xi1> to vector<2x8x128xi1>
    %83 = arith.select %82, %76, %75 : vector<2x8x128xi1>, vector<2x8x128xf32>
    %c4_i32 = arith.constant 4 : i32
    %84 = tpu.dynamic_rotate %83 by %c4_i32 dim 2 : vector<2x8x128xf32>, i32 -> vector<2x8x128xf32>
    %c4_i32_36 = arith.constant 4 : i32
    %85 = vector.broadcast %c4_i32_36 : i32 to vector<1x8x1xi32>
    %86 = arith.andi %67, %85 : vector<1x8x1xi32>
    %c0_i32_37 = arith.constant 0 : i32
    %87 = vector.broadcast %c0_i32_37 : i32 to vector<1x8x1xi32>
    %88 = arith.cmpi ne, %86, %87 : vector<1x8x1xi32>
    %89 = vector.shape_cast %88 : vector<1x8x1xi1> to vector<1x8x1xi1>
    %90 = vector.broadcast %89 : vector<1x8x1xi1> to vector<2x8x128xi1>
    %91 = arith.select %90, %84, %83 : vector<2x8x128xi1>, vector<2x8x128xf32>
    %c8_i32 = arith.constant 8 : i32
    %92 = tpu.dynamic_rotate %91 by %c8_i32 dim 2 : vector<2x8x128xf32>, i32 -> vector<2x8x128xf32>
    %c8_i32_38 = arith.constant 8 : i32
    %93 = vector.broadcast %c8_i32_38 : i32 to vector<1x8x1xi32>
    %94 = arith.andi %67, %93 : vector<1x8x1xi32>
    %c0_i32_39 = arith.constant 0 : i32
    %95 = vector.broadcast %c0_i32_39 : i32 to vector<1x8x1xi32>
    %96 = arith.cmpi ne, %94, %95 : vector<1x8x1xi32>
    %97 = vector.shape_cast %96 : vector<1x8x1xi1> to vector<1x8x1xi1>
    %98 = vector.broadcast %97 : vector<1x8x1xi1> to vector<2x8x128xi1>
    %99 = arith.select %98, %92, %91 : vector<2x8x128xi1>, vector<2x8x128xf32>
    %c16_i32 = arith.constant 16 : i32
    %100 = tpu.dynamic_rotate %99 by %c16_i32 dim 2 : vector<2x8x128xf32>, i32 -> vector<2x8x128xf32>
    %c16_i32_40 = arith.constant 16 : i32
    %101 = vector.broadcast %c16_i32_40 : i32 to vector<1x8x1xi32>
    %102 = arith.andi %67, %101 : vector<1x8x1xi32>
    %c0_i32_41 = arith.constant 0 : i32
    %103 = vector.broadcast %c0_i32_41 : i32 to vector<1x8x1xi32>
    %104 = arith.cmpi ne, %102, %103 : vector<1x8x1xi32>
    %105 = vector.shape_cast %104 : vector<1x8x1xi1> to vector<1x8x1xi1>
    %106 = vector.broadcast %105 : vector<1x8x1xi1> to vector<2x8x128xi1>
    %107 = arith.select %106, %100, %99 : vector<2x8x128xi1>, vector<2x8x128xf32>
    %c32_i32 = arith.constant 32 : i32
    %108 = tpu.dynamic_rotate %107 by %c32_i32 dim 2 : vector<2x8x128xf32>, i32 -> vector<2x8x128xf32>
    %c32_i32_42 = arith.constant 32 : i32
    %109 = vector.broadcast %c32_i32_42 : i32 to vector<1x8x1xi32>
    %110 = arith.andi %67, %109 : vector<1x8x1xi32>
    %c0_i32_43 = arith.constant 0 : i32
    %111 = vector.broadcast %c0_i32_43 : i32 to vector<1x8x1xi32>
    %112 = arith.cmpi ne, %110, %111 : vector<1x8x1xi32>
    %113 = vector.shape_cast %112 : vector<1x8x1xi1> to vector<1x8x1xi1>
    %114 = vector.broadcast %113 : vector<1x8x1xi1> to vector<2x8x128xi1>
    %115 = arith.select %114, %108, %107 : vector<2x8x128xi1>, vector<2x8x128xf32>
    %c64_i32 = arith.constant 64 : i32
    %116 = tpu.dynamic_rotate %115 by %c64_i32 dim 2 : vector<2x8x128xf32>, i32 -> vector<2x8x128xf32>
    %c64_i32_44 = arith.constant 64 : i32
    %117 = vector.broadcast %c64_i32_44 : i32 to vector<1x8x1xi32>
    %118 = arith.andi %67, %117 : vector<1x8x1xi32>
    %c0_i32_45 = arith.constant 0 : i32
    %119 = vector.broadcast %c0_i32_45 : i32 to vector<1x8x1xi32>
    %120 = arith.cmpi ne, %118, %119 : vector<1x8x1xi32>
    %121 = vector.shape_cast %120 : vector<1x8x1xi1> to vector<1x8x1xi1>
    %122 = vector.broadcast %121 : vector<1x8x1xi1> to vector<2x8x128xi1>
    %123 = arith.select %122, %116, %115 : vector<2x8x128xi1>, vector<2x8x128xf32>
    %124 = vector.extract_strided_slice %123 {offsets = [0, 0, 0], sizes = [2, 8, 8], strides = [1, 1, 1]} : vector<2x8x128xf32> to vector<2x8x8xf32>
    %125 = arith.addf %41, %124 : vector<2x8x8xf32>
    %cst_46 = arith.constant dense<0xFF800000> : vector<2x8xf32>
    %126 = vector.multi_reduction <maximumf>, %125, %cst_46 [2] : vector<2x8x8xf32> to vector<2x8xf32>
    %127 = vector.shape_cast %126 : vector<2x8xf32> to vector<2x8x1xf32>
    %128 = vector.broadcast %127 : vector<2x8x1xf32> to vector<2x8x8xf32>
    %129 = arith.subf %125, %128 : vector<2x8x8xf32>
    %130 = math.exp %129 : vector<2x8x8xf32>
    %cst_47 = arith.constant dense<0.000000e+00> : vector<2x8xf32>
    %131 = vector.multi_reduction <add>, %130, %cst_47 [2] : vector<2x8x8xf32> to vector<2x8xf32>
    %132 = vector.shape_cast %131 : vector<2x8xf32> to vector<2x8x1xf32>
    %133 = tpu.reciprocal %132 {approx = true} : vector<2x8x1xf32> -> vector<2x8x1xf32>
    %134 = vector.broadcast %133 : vector<2x8x1xf32> to vector<2x8x8xf32>
    %135 = arith.mulf %130, %134 : vector<2x8x8xf32>
    %136 = arith.truncf %135 : vector<2x8x8xf32> to vector<2x8x8xbf16>
    "tpu.trace_start"() <{level = 10 : i32, message = "hts,hsd->htd"}> : () -> ()
    %cst_48 = arith.constant dense<0.000000e+00> : vector<2x8x64xf32>
    %137 = tpu.matmul %136, %38, %cst_48 {dimension_numbers = #tpu.dot_dimension_numbers<[2], [1], [1], [2], [0, 0, 0, 1, 1, 2], [0], [0]>} : vector<2x8x8xbf16>, vector<2x8x64xbf16>, vector<2x8x64xf32> -> vector<2x8x64xf32>
    "tpu.trace_stop"() : () -> ()
    %138 = arith.truncf %137 : vector<2x8x64xf32> to vector<2x8x64xbf16>
    %c0_49 = arith.constant 0 : index
    %c0_50 = arith.constant 0 : index
    %c0_51 = arith.constant 0 : index
    %139 = vector.load %arg7[%c0_49, %c0_50, %c0_51] : memref<2x64x128xbf16, #tpu.memory_space<vmem>>, vector<2x64x128xbf16>
    "tpu.trace_start"() <{level = 10 : i32, message = "htd,hdD->htD"}> : () -> ()
    %cst_52 = arith.constant dense<0.000000e+00> : vector<2x8x128xf32>
    %140 = tpu.matmul %138, %139, %cst_52 {dimension_numbers = #tpu.dot_dimension_numbers<[2], [1], [1], [2], [0, 0, 0, 1, 1, 2], [0], [0]>} : vector<2x8x64xbf16>, vector<2x64x128xbf16>, vector<2x8x128xf32> -> vector<2x8x128xf32>
    "tpu.trace_stop"() : () -> ()
    %cst_53 = arith.constant dense<0.000000e+00> : vector<8x128xf32>
    %141 = vector.multi_reduction <add>, %140, %cst_53 [0] : vector<2x8x128xf32> to vector<8x128xf32>
    %c0_54 = arith.constant 0 : index
    %c0_55 = arith.constant 0 : index
    %142 = vector.load %arg8[%c0_54, %c0_55] : memref<1x128xf32, #tpu.memory_space<vmem>>, vector<1x128xf32>
    %143 = vector.broadcast %142 : vector<1x128xf32> to vector<8x128xf32>
    %144 = arith.addf %141, %143 : vector<8x128xf32>
    %145 = arith.addf %1, %144 : vector<8x128xf32>
    %c0_56 = arith.constant 0 : index
    %c0_57 = arith.constant 0 : index
    %c0_58 = arith.constant 0 : index
    %146 = vector.load %arg10[%c0_56, %c0_57, %c0_58] : memref<1x8x128xf32, #tpu.memory_space<vmem>>, vector<1x8x128xf32>
    %147 = vector.shape_cast %146 : vector<1x8x128xf32> to vector<8x128xf32>
    %148 = vector.shape_cast %145 : vector<8x128xf32> to vector<1x8x128xf32>
    tpu.vector_store %arg10[%c0_56, %c0_57, %c0_58], %148 {strides = array<i32>} : memref<1x8x128xf32, #tpu.memory_space<vmem>>, vector<1x8x128xf32>,
    return
  }
  func.func @transform_0(%arg0: i32) -> (i32, i32, i32) {
    %c0_i32 = arith.constant 0 : i32
    %c0_i32_0 = arith.constant 0 : i32
    %c0_i32_1 = arith.constant 0 : i32
    return %arg0, %c0_i32, %c0_i32_0 : i32, i32, i32
  }
  func.func @transform_1(%arg0: i32) -> (i32, i32) {
    %c0_i32 = arith.constant 0 : i32
    %c0_i32_0 = arith.constant 0 : i32
    %c0_i32_1 = arith.constant 0 : i32
    return %c0_i32, %c0_i32_0 : i32, i32
  }
  func.func @transform_2(%arg0: i32) -> (i32, i32) {
    %c0_i32 = arith.constant 0 : i32
    %c0_i32_0 = arith.constant 0 : i32
    %c0_i32_1 = arith.constant 0 : i32
    return %c0_i32, %c0_i32_0 : i32, i32
  }
  func.func @transform_3(%arg0: i32) -> (i32, i32, i32) {
    %c0_i32 = arith.constant 0 : i32
    %c0_i32_0 = arith.constant 0 : i32
    %c0_i32_1 = arith.constant 0 : i32
    %c0_i32_2 = arith.constant 0 : i32
    return %c0_i32, %c0_i32_0, %c0_i32_1 : i32, i32, i32
  }
  func.func @transform_4(%arg0: i32) -> (i32, i32, i32) {
    %c0_i32 = arith.constant 0 : i32
    %c0_i32_0 = arith.constant 0 : i32
    %c0_i32_1 = arith.constant 0 : i32
    %c0_i32_2 = arith.constant 0 : i32
    return %c0_i32, %c0_i32_0, %c0_i32_1 : i32, i32, i32
  }
  func.func @transform_5(%arg0: i32) -> (i32, i32, i32) {
    %c0_i32 = arith.constant 0 : i32
    %c0_i32_0 = arith.constant 0 : i32
    %c0_i32_1 = arith.constant 0 : i32
    %c0_i32_2 = arith.constant 0 : i32
    return %c0_i32, %c0_i32_0, %c0_i32_1 : i32, i32, i32
  }
  func.func @transform_6(%arg0: i32) -> (i32, i32, i32) {
    %c0_i32 = arith.constant 0 : i32
    %c0_i32_0 = arith.constant 0 : i32
    %c0_i32_1 = arith.constant 0 : i32
    %c0_i32_2 = arith.constant 0 : i32
    return %c0_i32, %c0_i32_0, %c0_i32_1 : i32, i32, i32
  }
  func.func @transform_7(%arg0: i32) -> (i32, i32) {
    %c0_i32 = arith.constant 0 : i32
    %c0_i32_0 = arith.constant 0 : i32
    %c0_i32_1 = arith.constant 0 : i32
    return %c0_i32, %c0_i32_0 : i32, i32
  }
  func.func @transform_8(%arg0: i32) -> (i32, i32) {
    %c0_i32 = arith.constant 0 : i32
    %c0_i32_0 = arith.constant 0 : i32
    %c0_i32_1 = arith.constant 0 : i32
    return %c0_i32, %c0_i32_0 : i32, i32
  }
  func.func @transform_9(%arg0: i32) -> (i32, i32, i32) {
    %c0_i32 = arith.constant 0 : i32
    %c0_i32_0 = arith.constant 0 : i32
    %c0_i32_1 = arith.constant 0 : i32
    return %arg0, %c0_i32, %c0_i32_0 : i32, i32, i32
  }
}

module attributes {stable_mosaic.version = 11 : i64} {
  func.func @_conv_block_kernel(%arg0: i32, %arg1: memref<1x8x128xf32, #tpu.memory_space<vmem>>, %arg2: memref<1x128xf32, #tpu.memory_space<vmem>>, %arg3: memref<1x128xf32, #tpu.memory_space<vmem>>, %arg4: memref<128x256xbf16, #tpu.memory_space<vmem>>, %arg5: memref<1x256xf32, #tpu.memory_space<vmem>>, %arg6: memref<31x128xf32, #tpu.memory_space<vmem>>, %arg7: memref<1x128xf32, #tpu.memory_space<vmem>>, %arg8: memref<128x128xbf16, #tpu.memory_space<vmem>>, %arg9: memref<1x128xf32, #tpu.memory_space<vmem>>, %arg10: memref<1x8x128xf32, #tpu.memory_space<vmem>>, %arg11: memref<38x128xf32, #tpu.memory_space<vmem>>) attributes {dimension_semantics = [#tpu.dimension_semantics<parallel>], iteration_bounds = array<i64: 2>, scalar_prefetch = 0 : i64, scratch_operands = 1 : i64, tpu.core_type = #tpu.core_type<tc>, window_params = [{transform_indices = @transform_0, window_bounds = array<i64: 1, 8, 128>}, {pipeline_mode = #tpu.pipeline_mode<synchronous>, transform_indices = @transform_1, window_bounds = array<i64: 1, 128>}, {pipeline_mode = #tpu.pipeline_mode<synchronous>, transform_indices = @transform_2, window_bounds = array<i64: 1, 128>}, {pipeline_mode = #tpu.pipeline_mode<synchronous>, transform_indices = @transform_3, window_bounds = array<i64: 128, 256>}, {pipeline_mode = #tpu.pipeline_mode<synchronous>, transform_indices = @transform_4, window_bounds = array<i64: 1, 256>}, {pipeline_mode = #tpu.pipeline_mode<synchronous>, transform_indices = @transform_5, window_bounds = array<i64: 31, 128>}, {pipeline_mode = #tpu.pipeline_mode<synchronous>, transform_indices = @transform_6, window_bounds = array<i64: 1, 128>}, {pipeline_mode = #tpu.pipeline_mode<synchronous>, transform_indices = @transform_7, window_bounds = array<i64: 128, 128>}, {pipeline_mode = #tpu.pipeline_mode<synchronous>, transform_indices = @transform_8, window_bounds = array<i64: 1, 128>}, {transform_indices = @transform_9, window_bounds = array<i64: 1, 8, 128>}]} {
    %c0 = arith.constant 0 : index
    %c0_0 = arith.constant 0 : index
    %c0_1 = arith.constant 0 : index
    %0 = vector.load %arg1[%c0, %c0_0, %c0_1] : memref<1x8x128xf32, #tpu.memory_space<vmem>>, vector<1x8x128xf32>
    %1 = vector.shape_cast %0 : vector<1x8x128xf32> to vector<8x128xf32>
    %c0_2 = arith.constant 0 : index
    %c0_3 = arith.constant 0 : index
    %2 = vector.load %arg2[%c0_2, %c0_3] : memref<1x128xf32, #tpu.memory_space<vmem>>, vector<1x128xf32>
    %c0_4 = arith.constant 0 : index
    %c0_5 = arith.constant 0 : index
    %3 = vector.load %arg3[%c0_4, %c0_5] : memref<1x128xf32, #tpu.memory_space<vmem>>, vector<1x128xf32>
    %cst = arith.constant dense<0.000000e+00> : vector<8xf32>
    %4 = vector.multi_reduction <add>, %1, %cst [1] : vector<8x128xf32> to vector<8xf32>
    %5 = vector.shape_cast %4 : vector<8xf32> to vector<8x1xf32>
    %cst_6 = arith.constant 3.125000e-02 : f32
    %6 = vector.broadcast %cst_6 : f32 to vector<8x1xf32>
    %7 = arith.mulf %5, %6 : vector<8x1xf32>
    %8 = arith.mulf %1, %1 : vector<8x128xf32>
    %cst_7 = arith.constant dense<0.000000e+00> : vector<8xf32>
    %9 = vector.multi_reduction <add>, %8, %cst_7 [1] : vector<8x128xf32> to vector<8xf32>
    %10 = vector.shape_cast %9 : vector<8xf32> to vector<8x1xf32>
    %cst_8 = arith.constant 3.125000e-02 : f32
    %11 = vector.broadcast %cst_8 : f32 to vector<8x1xf32>
    %12 = arith.mulf %10, %11 : vector<8x1xf32>
    %13 = arith.mulf %7, %7 : vector<8x1xf32>
    %14 = arith.subf %12, %13 : vector<8x1xf32>
    %15 = vector.broadcast %7 : vector<8x1xf32> to vector<8x128xf32>
    %16 = arith.subf %1, %15 : vector<8x128xf32>
    %cst_9 = arith.constant 9.99999974E-6 : f32
    %17 = vector.broadcast %cst_9 : f32 to vector<8x1xf32>
    %18 = arith.addf %14, %17 : vector<8x1xf32>
    %19 = math.rsqrt %18 : vector<8x1xf32>
    %20 = vector.broadcast %19 : vector<8x1xf32> to vector<8x128xf32>
    %21 = arith.mulf %16, %20 : vector<8x128xf32>
    %22 = vector.broadcast %2 : vector<1x128xf32> to vector<8x128xf32>
    %23 = arith.mulf %21, %22 : vector<8x128xf32>
    %24 = vector.broadcast %3 : vector<1x128xf32> to vector<8x128xf32>
    %25 = arith.addf %23, %24 : vector<8x128xf32>
    %26 = arith.truncf %25 : vector<8x128xf32> to vector<8x128xbf16>
    %c0_10 = arith.constant 0 : index
    %c0_11 = arith.constant 0 : index
    %27 = vector.load %arg4[%c0_10, %c0_11] : memref<128x256xbf16, #tpu.memory_space<vmem>>, vector<128x256xbf16>
    %cst_12 = arith.constant dense<0.000000e+00> : vector<8x256xf32>
    %28 = tpu.matmul %26, %27, %cst_12 {dimension_numbers = #tpu.dot_dimension_numbers<[1], [0], [0], [1], [0, 0, 1, 1], [], []>} : vector<8x128xbf16>, vector<128x256xbf16>, vector<8x256xf32> -> vector<8x256xf32>
    %c0_13 = arith.constant 0 : index
    %c0_14 = arith.constant 0 : index
    %29 = vector.load %arg5[%c0_13, %c0_14] : memref<1x256xf32, #tpu.memory_space<vmem>>, vector<1x256xf32>
    %30 = vector.broadcast %29 : vector<1x256xf32> to vector<8x256xf32>
    %31 = arith.addf %28, %30 : vector<8x256xf32>
    %32 = vector.extract_strided_slice %31 {offsets = [0, 0], sizes = [8, 128], strides = [1, 1]} : vector<8x256xf32> to vector<8x128xf32>
    %33 = vector.extract_strided_slice %31 {offsets = [0, 128], sizes = [8, 128], strides = [1, 1]} : vector<8x256xf32> to vector<8x128xf32>
    %cst_15 = arith.constant 5.000000e-01 : f32
    %34 = vector.broadcast %cst_15 : f32 to vector<8x128xf32>
    %35 = arith.mulf %34, %33 : vector<8x128xf32>
    %36 = math.tanh %35 : vector<8x128xf32>
    %cst_16 = arith.constant 1.000000e+00 : f32
    %37 = vector.broadcast %cst_16 : f32 to vector<8x128xf32>
    %38 = arith.addf %36, %37 : vector<8x128xf32>
    %cst_17 = arith.constant 5.000000e-01 : f32
    %39 = vector.broadcast %cst_17 : f32 to vector<8x128xf32>
    %40 = arith.mulf %39, %38 : vector<8x128xf32>
    %41 = arith.mulf %32, %40 : vector<8x128xf32>
    %cst_18 = arith.constant 0.000000e+00 : f32
    %42 = vector.broadcast %cst_18 : f32 to vector<38x128xf32>
    %c0_19 = arith.constant 0 : index
    %c0_20 = arith.constant 0 : index
    %43 = vector.load %arg11[%c0_19, %c0_20] : memref<38x128xf32, #tpu.memory_space<vmem>>, vector<38x128xf32>
    tpu.vector_store %arg11[%c0_19, %c0_20], %42 {strides = array<i32>} : memref<38x128xf32, #tpu.memory_space<vmem>>, vector<38x128xf32>,
    %c15 = arith.constant 15 : index
    %c0_21 = arith.constant 0 : index
    %44 = vector.load %arg11[%c15, %c0_21] : memref<38x128xf32, #tpu.memory_space<vmem>>, vector<8x128xf32>
    tpu.vector_store %arg11[%c15, %c0_21], %41 {strides = array<i32>} : memref<38x128xf32, #tpu.memory_space<vmem>>, vector<8x128xf32>,
    %c0_22 = arith.constant 0 : index
    %c0_23 = arith.constant 0 : index
    %45 = vector.load %arg6[%c0_22, %c0_23] : memref<31x128xf32, #tpu.memory_space<vmem>>, vector<31x128xf32>
    %cst_24 = arith.constant 0.000000e+00 : f32
    %46 = vector.broadcast %cst_24 : f32 to vector<8x128xf32>
    %c0_25 = arith.constant 0 : index
    %c0_26 = arith.constant 0 : index
    %47 = vector.load %arg11[%c0_25, %c0_26] : memref<38x128xf32, #tpu.memory_space<vmem>>, vector<8x128xf32>
    %48 = vector.extract_strided_slice %45 {offsets = [0, 0], sizes = [1, 128], strides = [1, 1]} : vector<31x128xf32> to vector<1x128xf32>
    %49 = vector.broadcast %48 : vector<1x128xf32> to vector<8x128xf32>
    %50 = arith.mulf %47, %49 : vector<8x128xf32>
    %51 = arith.addf %46, %50 : vector<8x128xf32>
    %c1 = arith.constant 1 : index
    %c0_27 = arith.constant 0 : index
    %52 = vector.load %arg11[%c1, %c0_27] : memref<38x128xf32, #tpu.memory_space<vmem>>, vector<8x128xf32>
    %53 = vector.extract_strided_slice %45 {offsets = [1, 0], sizes = [1, 128], strides = [1, 1]} : vector<31x128xf32> to vector<1x128xf32>
    %54 = vector.broadcast %53 : vector<1x128xf32> to vector<8x128xf32>
    %55 = arith.mulf %52, %54 : vector<8x128xf32>
    %56 = arith.addf %51, %55 : vector<8x128xf32>
    %c2 = arith.constant 2 : index
    %c0_28 = arith.constant 0 : index
    %57 = vector.load %arg11[%c2, %c0_28] : memref<38x128xf32, #tpu.memory_space<vmem>>, vector<8x128xf32>
    %58 = vector.extract_strided_slice %45 {offsets = [2, 0], sizes = [1, 128], strides = [1, 1]} : vector<31x128xf32> to vector<1x128xf32>
    %59 = vector.broadcast %58 : vector<1x128xf32> to vector<8x128xf32>
    %60 = arith.mulf %57, %59 : vector<8x128xf32>
    %61 = arith.addf %56, %60 : vector<8x128xf32>
    %c3 = arith.constant 3 : index
    %c0_29 = arith.constant 0 : index
    %62 = vector.load %arg11[%c3, %c0_29] : memref<38x128xf32, #tpu.memory_space<vmem>>, vector<8x128xf32>
    %63 = vector.extract_strided_slice %45 {offsets = [3, 0], sizes = [1, 128], strides = [1, 1]} : vector<31x128xf32> to vector<1x128xf32>
    %64 = vector.broadcast %63 : vector<1x128xf32> to vector<8x128xf32>
    %65 = arith.mulf %62, %64 : vector<8x128xf32>
    %66 = arith.addf %61, %65 : vector<8x128xf32>
    %c4 = arith.constant 4 : index
    %c0_30 = arith.constant 0 : index
    %67 = vector.load %arg11[%c4, %c0_30] : memref<38x128xf32, #tpu.memory_space<vmem>>, vector<8x128xf32>
    %68 = vector.extract_strided_slice %45 {offsets = [4, 0], sizes = [1, 128], strides = [1, 1]} : vector<31x128xf32> to vector<1x128xf32>
    %69 = vector.broadcast %68 : vector<1x128xf32> to vector<8x128xf32>
    %70 = arith.mulf %67, %69 : vector<8x128xf32>
    %71 = arith.addf %66, %70 : vector<8x128xf32>
    %c5 = arith.constant 5 : index
    %c0_31 = arith.constant 0 : index
    %72 = vector.load %arg11[%c5, %c0_31] : memref<38x128xf32, #tpu.memory_space<vmem>>, vector<8x128xf32>
    %73 = vector.extract_strided_slice %45 {offsets = [5, 0], sizes = [1, 128], strides = [1, 1]} : vector<31x128xf32> to vector<1x128xf32>
    %74 = vector.broadcast %73 : vector<1x128xf32> to vector<8x128xf32>
    %75 = arith.mulf %72, %74 : vector<8x128xf32>
    %76 = arith.addf %71, %75 : vector<8x128xf32>
    %c6 = arith.constant 6 : index
    %c0_32 = arith.constant 0 : index
    %77 = vector.load %arg11[%c6, %c0_32] : memref<38x128xf32, #tpu.memory_space<vmem>>, vector<8x128xf32>
    %78 = vector.extract_strided_slice %45 {offsets = [6, 0], sizes = [1, 128], strides = [1, 1]} : vector<31x128xf32> to vector<1x128xf32>
    %79 = vector.broadcast %78 : vector<1x128xf32> to vector<8x128xf32>
    %80 = arith.mulf %77, %79 : vector<8x128xf32>
    %81 = arith.addf %76, %80 : vector<8x128xf32>
    %c7 = arith.constant 7 : index
    %c0_33 = arith.constant 0 : index
    %82 = vector.load %arg11[%c7, %c0_33] : memref<38x128xf32, #tpu.memory_space<vmem>>, vector<8x128xf32>
    %83 = vector.extract_strided_slice %45 {offsets = [7, 0], sizes = [1, 128], strides = [1, 1]} : vector<31x128xf32> to vector<1x128xf32>
    %84 = vector.broadcast %83 : vector<1x128xf32> to vector<8x128xf32>
    %85 = arith.mulf %82, %84 : vector<8x128xf32>
    %86 = arith.addf %81, %85 : vector<8x128xf32>
    %c8 = arith.constant 8 : index
    %c0_34 = arith.constant 0 : index
    %87 = vector.load %arg11[%c8, %c0_34] : memref<38x128xf32, #tpu.memory_space<vmem>>, vector<8x128xf32>
    %88 = vector.extract_strided_slice %45 {offsets = [8, 0], sizes = [1, 128], strides = [1, 1]} : vector<31x128xf32> to vector<1x128xf32>
    %89 = vector.broadcast %88 : vector<1x128xf32> to vector<8x128xf32>
    %90 = arith.mulf %87, %89 : vector<8x128xf32>
    %91 = arith.addf %86, %90 : vector<8x128xf32>
    %c9 = arith.constant 9 : index
    %c0_35 = arith.constant 0 : index
    %92 = vector.load %arg11[%c9, %c0_35] : memref<38x128xf32, #tpu.memory_space<vmem>>, vector<8x128xf32>
    %93 = vector.extract_strided_slice %45 {offsets = [9, 0], sizes = [1, 128], strides = [1, 1]} : vector<31x128xf32> to vector<1x128xf32>
    %94 = vector.broadcast %93 : vector<1x128xf32> to vector<8x128xf32>
    %95 = arith.mulf %92, %94 : vector<8x128xf32>
    %96 = arith.addf %91, %95 : vector<8x128xf32>
    %c10 = arith.constant 10 : index
    %c0_36 = arith.constant 0 : index
    %97 = vector.load %arg11[%c10, %c0_36] : memref<38x128xf32, #tpu.memory_space<vmem>>, vector<8x128xf32>
    %98 = vector.extract_strided_slice %45 {offsets = [10, 0], sizes = [1, 128], strides = [1, 1]} : vector<31x128xf32> to vector<1x128xf32>
    %99 = vector.broadcast %98 : vector<1x128xf32> to vector<8x128xf32>
    %100 = arith.mulf %97, %99 : vector<8x128xf32>
    %101 = arith.addf %96, %100 : vector<8x128xf32>
    %c11 = arith.constant 11 : index
    %c0_37 = arith.constant 0 : index
    %102 = vector.load %arg11[%c11, %c0_37] : memref<38x128xf32, #tpu.memory_space<vmem>>, vector<8x128xf32>
    %103 = vector.extract_strided_slice %45 {offsets = [11, 0], sizes = [1, 128], strides = [1, 1]} : vector<31x128xf32> to vector<1x128xf32>
    %104 = vector.broadcast %103 : vector<1x128xf32> to vector<8x128xf32>
    %105 = arith.mulf %102, %104 : vector<8x128xf32>
    %106 = arith.addf %101, %105 : vector<8x128xf32>
    %c12 = arith.constant 12 : index
    %c0_38 = arith.constant 0 : index
    %107 = vector.load %arg11[%c12, %c0_38] : memref<38x128xf32, #tpu.memory_space<vmem>>, vector<8x128xf32>
    %108 = vector.extract_strided_slice %45 {offsets = [12, 0], sizes = [1, 128], strides = [1, 1]} : vector<31x128xf32> to vector<1x128xf32>
    %109 = vector.broadcast %108 : vector<1x128xf32> to vector<8x128xf32>
    %110 = arith.mulf %107, %109 : vector<8x128xf32>
    %111 = arith.addf %106, %110 : vector<8x128xf32>
    %c13 = arith.constant 13 : index
    %c0_39 = arith.constant 0 : index
    %112 = vector.load %arg11[%c13, %c0_39] : memref<38x128xf32, #tpu.memory_space<vmem>>, vector<8x128xf32>
    %113 = vector.extract_strided_slice %45 {offsets = [13, 0], sizes = [1, 128], strides = [1, 1]} : vector<31x128xf32> to vector<1x128xf32>
    %114 = vector.broadcast %113 : vector<1x128xf32> to vector<8x128xf32>
    %115 = arith.mulf %112, %114 : vector<8x128xf32>
    %116 = arith.addf %111, %115 : vector<8x128xf32>
    %c14 = arith.constant 14 : index
    %c0_40 = arith.constant 0 : index
    %117 = vector.load %arg11[%c14, %c0_40] : memref<38x128xf32, #tpu.memory_space<vmem>>, vector<8x128xf32>
    %118 = vector.extract_strided_slice %45 {offsets = [14, 0], sizes = [1, 128], strides = [1, 1]} : vector<31x128xf32> to vector<1x128xf32>
    %119 = vector.broadcast %118 : vector<1x128xf32> to vector<8x128xf32>
    %120 = arith.mulf %117, %119 : vector<8x128xf32>
    %121 = arith.addf %116, %120 : vector<8x128xf32>
    %c15_41 = arith.constant 15 : index
    %c0_42 = arith.constant 0 : index
    %122 = vector.load %arg11[%c15_41, %c0_42] : memref<38x128xf32, #tpu.memory_space<vmem>>, vector<8x128xf32>
    %123 = vector.extract_strided_slice %45 {offsets = [15, 0], sizes = [1, 128], strides = [1, 1]} : vector<31x128xf32> to vector<1x128xf32>
    %124 = vector.broadcast %123 : vector<1x128xf32> to vector<8x128xf32>
    %125 = arith.mulf %122, %124 : vector<8x128xf32>
    %126 = arith.addf %121, %125 : vector<8x128xf32>
    %c16 = arith.constant 16 : index
    %c0_43 = arith.constant 0 : index
    %127 = vector.load %arg11[%c16, %c0_43] : memref<38x128xf32, #tpu.memory_space<vmem>>, vector<8x128xf32>
    %128 = vector.extract_strided_slice %45 {offsets = [16, 0], sizes = [1, 128], strides = [1, 1]} : vector<31x128xf32> to vector<1x128xf32>
    %129 = vector.broadcast %128 : vector<1x128xf32> to vector<8x128xf32>
    %130 = arith.mulf %127, %129 : vector<8x128xf32>
    %131 = arith.addf %126, %130 : vector<8x128xf32>
    %c17 = arith.constant 17 : index
    %c0_44 = arith.constant 0 : index
    %132 = vector.load %arg11[%c17, %c0_44] : memref<38x128xf32, #tpu.memory_space<vmem>>, vector<8x128xf32>
    %133 = vector.extract_strided_slice %45 {offsets = [17, 0], sizes = [1, 128], strides = [1, 1]} : vector<31x128xf32> to vector<1x128xf32>
    %134 = vector.broadcast %133 : vector<1x128xf32> to vector<8x128xf32>
    %135 = arith.mulf %132, %134 : vector<8x128xf32>
    %136 = arith.addf %131, %135 : vector<8x128xf32>
    %c18 = arith.constant 18 : index
    %c0_45 = arith.constant 0 : index
    %137 = vector.load %arg11[%c18, %c0_45] : memref<38x128xf32, #tpu.memory_space<vmem>>, vector<8x128xf32>
    %138 = vector.extract_strided_slice %45 {offsets = [18, 0], sizes = [1, 128], strides = [1, 1]} : vector<31x128xf32> to vector<1x128xf32>
    %139 = vector.broadcast %138 : vector<1x128xf32> to vector<8x128xf32>
    %140 = arith.mulf %137, %139 : vector<8x128xf32>
    %141 = arith.addf %136, %140 : vector<8x128xf32>
    %c19 = arith.constant 19 : index
    %c0_46 = arith.constant 0 : index
    %142 = vector.load %arg11[%c19, %c0_46] : memref<38x128xf32, #tpu.memory_space<vmem>>, vector<8x128xf32>
    %143 = vector.extract_strided_slice %45 {offsets = [19, 0], sizes = [1, 128], strides = [1, 1]} : vector<31x128xf32> to vector<1x128xf32>
    %144 = vector.broadcast %143 : vector<1x128xf32> to vector<8x128xf32>
    %145 = arith.mulf %142, %144 : vector<8x128xf32>
    %146 = arith.addf %141, %145 : vector<8x128xf32>
    %c20 = arith.constant 20 : index
    %c0_47 = arith.constant 0 : index
    %147 = vector.load %arg11[%c20, %c0_47] : memref<38x128xf32, #tpu.memory_space<vmem>>, vector<8x128xf32>
    %148 = vector.extract_strided_slice %45 {offsets = [20, 0], sizes = [1, 128], strides = [1, 1]} : vector<31x128xf32> to vector<1x128xf32>
    %149 = vector.broadcast %148 : vector<1x128xf32> to vector<8x128xf32>
    %150 = arith.mulf %147, %149 : vector<8x128xf32>
    %151 = arith.addf %146, %150 : vector<8x128xf32>
    %c21 = arith.constant 21 : index
    %c0_48 = arith.constant 0 : index
    %152 = vector.load %arg11[%c21, %c0_48] : memref<38x128xf32, #tpu.memory_space<vmem>>, vector<8x128xf32>
    %153 = vector.extract_strided_slice %45 {offsets = [21, 0], sizes = [1, 128], strides = [1, 1]} : vector<31x128xf32> to vector<1x128xf32>
    %154 = vector.broadcast %153 : vector<1x128xf32> to vector<8x128xf32>
    %155 = arith.mulf %152, %154 : vector<8x128xf32>
    %156 = arith.addf %151, %155 : vector<8x128xf32>
    %c22 = arith.constant 22 : index
    %c0_49 = arith.constant 0 : index
    %157 = vector.load %arg11[%c22, %c0_49] : memref<38x128xf32, #tpu.memory_space<vmem>>, vector<8x128xf32>
    %158 = vector.extract_strided_slice %45 {offsets = [22, 0], sizes = [1, 128], strides = [1, 1]} : vector<31x128xf32> to vector<1x128xf32>
    %159 = vector.broadcast %158 : vector<1x128xf32> to vector<8x128xf32>
    %160 = arith.mulf %157, %159 : vector<8x128xf32>
    %161 = arith.addf %156, %160 : vector<8x128xf32>
    %c23 = arith.constant 23 : index
    %c0_50 = arith.constant 0 : index
    %162 = vector.load %arg11[%c23, %c0_50] : memref<38x128xf32, #tpu.memory_space<vmem>>, vector<8x128xf32>
    %163 = vector.extract_strided_slice %45 {offsets = [23, 0], sizes = [1, 128], strides = [1, 1]} : vector<31x128xf32> to vector<1x128xf32>
    %164 = vector.broadcast %163 : vector<1x128xf32> to vector<8x128xf32>
    %165 = arith.mulf %162, %164 : vector<8x128xf32>
    %166 = arith.addf %161, %165 : vector<8x128xf32>
    %c24 = arith.constant 24 : index
    %c0_51 = arith.constant 0 : index
    %167 = vector.load %arg11[%c24, %c0_51] : memref<38x128xf32, #tpu.memory_space<vmem>>, vector<8x128xf32>
    %168 = vector.extract_strided_slice %45 {offsets = [24, 0], sizes = [1, 128], strides = [1, 1]} : vector<31x128xf32> to vector<1x128xf32>
    %169 = vector.broadcast %168 : vector<1x128xf32> to vector<8x128xf32>
    %170 = arith.mulf %167, %169 : vector<8x128xf32>
    %171 = arith.addf %166, %170 : vector<8x128xf32>
    %c25 = arith.constant 25 : index
    %c0_52 = arith.constant 0 : index
    %172 = vector.load %arg11[%c25, %c0_52] : memref<38x128xf32, #tpu.memory_space<vmem>>, vector<8x128xf32>
    %173 = vector.extract_strided_slice %45 {offsets = [25, 0], sizes = [1, 128], strides = [1, 1]} : vector<31x128xf32> to vector<1x128xf32>
    %174 = vector.broadcast %173 : vector<1x128xf32> to vector<8x128xf32>
    %175 = arith.mulf %172, %174 : vector<8x128xf32>
    %176 = arith.addf %171, %175 : vector<8x128xf32>
    %c26 = arith.constant 26 : index
    %c0_53 = arith.constant 0 : index
    %177 = vector.load %arg11[%c26, %c0_53] : memref<38x128xf32, #tpu.memory_space<vmem>>, vector<8x128xf32>
    %178 = vector.extract_strided_slice %45 {offsets = [26, 0], sizes = [1, 128], strides = [1, 1]} : vector<31x128xf32> to vector<1x128xf32>
    %179 = vector.broadcast %178 : vector<1x128xf32> to vector<8x128xf32>
    %180 = arith.mulf %177, %179 : vector<8x128xf32>
    %181 = arith.addf %176, %180 : vector<8x128xf32>
    %c27 = arith.constant 27 : index
    %c0_54 = arith.constant 0 : index
    %182 = vector.load %arg11[%c27, %c0_54] : memref<38x128xf32, #tpu.memory_space<vmem>>, vector<8x128xf32>
    %183 = vector.extract_strided_slice %45 {offsets = [27, 0], sizes = [1, 128], strides = [1, 1]} : vector<31x128xf32> to vector<1x128xf32>
    %184 = vector.broadcast %183 : vector<1x128xf32> to vector<8x128xf32>
    %185 = arith.mulf %182, %184 : vector<8x128xf32>
    %186 = arith.addf %181, %185 : vector<8x128xf32>
    %c28 = arith.constant 28 : index
    %c0_55 = arith.constant 0 : index
    %187 = vector.load %arg11[%c28, %c0_55] : memref<38x128xf32, #tpu.memory_space<vmem>>, vector<8x128xf32>
    %188 = vector.extract_strided_slice %45 {offsets = [28, 0], sizes = [1, 128], strides = [1, 1]} : vector<31x128xf32> to vector<1x128xf32>
    %189 = vector.broadcast %188 : vector<1x128xf32> to vector<8x128xf32>
    %190 = arith.mulf %187, %189 : vector<8x128xf32>
    %191 = arith.addf %186, %190 : vector<8x128xf32>
    %c29 = arith.constant 29 : index
    %c0_56 = arith.constant 0 : index
    %192 = vector.load %arg11[%c29, %c0_56] : memref<38x128xf32, #tpu.memory_space<vmem>>, vector<8x128xf32>
    %193 = vector.extract_strided_slice %45 {offsets = [29, 0], sizes = [1, 128], strides = [1, 1]} : vector<31x128xf32> to vector<1x128xf32>
    %194 = vector.broadcast %193 : vector<1x128xf32> to vector<8x128xf32>
    %195 = arith.mulf %192, %194 : vector<8x128xf32>
    %196 = arith.addf %191, %195 : vector<8x128xf32>
    %c30 = arith.constant 30 : index
    %c0_57 = arith.constant 0 : index
    %197 = vector.load %arg11[%c30, %c0_57] : memref<38x128xf32, #tpu.memory_space<vmem>>, vector<8x128xf32>
    %198 = vector.extract_strided_slice %45 {offsets = [30, 0], sizes = [1, 128], strides = [1, 1]} : vector<31x128xf32> to vector<1x128xf32>
    %199 = vector.broadcast %198 : vector<1x128xf32> to vector<8x128xf32>
    %200 = arith.mulf %197, %199 : vector<8x128xf32>
    %201 = arith.addf %196, %200 : vector<8x128xf32>
    %c0_58 = arith.constant 0 : index
    %c0_59 = arith.constant 0 : index
    %202 = vector.load %arg7[%c0_58, %c0_59] : memref<1x128xf32, #tpu.memory_space<vmem>>, vector<1x128xf32>
    %203 = vector.broadcast %202 : vector<1x128xf32> to vector<8x128xf32>
    %204 = arith.addf %201, %203 : vector<8x128xf32>
    %cst_60 = arith.constant 5.000000e-01 : f32
    %205 = vector.broadcast %cst_60 : f32 to vector<8x128xf32>
    %206 = arith.mulf %205, %204 : vector<8x128xf32>
    %207 = math.tanh %206 : vector<8x128xf32>
    %cst_61 = arith.constant 1.000000e+00 : f32
    %208 = vector.broadcast %cst_61 : f32 to vector<8x128xf32>
    %209 = arith.addf %207, %208 : vector<8x128xf32>
    %cst_62 = arith.constant 5.000000e-01 : f32
    %210 = vector.broadcast %cst_62 : f32 to vector<8x128xf32>
    %211 = arith.mulf %210, %209 : vector<8x128xf32>
    %212 = arith.mulf %204, %211 : vector<8x128xf32>
    %213 = arith.truncf %212 : vector<8x128xf32> to vector<8x128xbf16>
    %c0_63 = arith.constant 0 : index
    %c0_64 = arith.constant 0 : index
    %214 = vector.load %arg8[%c0_63, %c0_64] : memref<128x128xbf16, #tpu.memory_space<vmem>>, vector<128x128xbf16>
    %cst_65 = arith.constant dense<0.000000e+00> : vector<8x128xf32>
    %215 = tpu.matmul %213, %214, %cst_65 {dimension_numbers = #tpu.dot_dimension_numbers<[1], [0], [0], [1], [0, 0, 1, 1], [], []>} : vector<8x128xbf16>, vector<128x128xbf16>, vector<8x128xf32> -> vector<8x128xf32>
    %c0_66 = arith.constant 0 : index
    %c0_67 = arith.constant 0 : index
    %216 = vector.load %arg9[%c0_66, %c0_67] : memref<1x128xf32, #tpu.memory_space<vmem>>, vector<1x128xf32>
    %217 = vector.broadcast %216 : vector<1x128xf32> to vector<8x128xf32>
    %218 = arith.addf %215, %217 : vector<8x128xf32>
    %219 = arith.addf %1, %218 : vector<8x128xf32>
    %c0_68 = arith.constant 0 : index
    %c0_69 = arith.constant 0 : index
    %c0_70 = arith.constant 0 : index
    %220 = vector.load %arg10[%c0_68, %c0_69, %c0_70] : memref<1x8x128xf32, #tpu.memory_space<vmem>>, vector<1x8x128xf32>
    %221 = vector.shape_cast %220 : vector<1x8x128xf32> to vector<8x128xf32>
    %222 = vector.shape_cast %219 : vector<8x128xf32> to vector<1x8x128xf32>
    tpu.vector_store %arg10[%c0_68, %c0_69, %c0_70], %222 {strides = array<i32>} : memref<1x8x128xf32, #tpu.memory_space<vmem>>, vector<1x8x128xf32>,
    return
  }
  func.func @transform_0(%arg0: i32) -> (i32, i32, i32) {
    %c0_i32 = arith.constant 0 : i32
    %c0_i32_0 = arith.constant 0 : i32
    %c0_i32_1 = arith.constant 0 : i32
    return %arg0, %c0_i32, %c0_i32_0 : i32, i32, i32
  }
  func.func @transform_1(%arg0: i32) -> (i32, i32) {
    %c0_i32 = arith.constant 0 : i32
    %c0_i32_0 = arith.constant 0 : i32
    %c0_i32_1 = arith.constant 0 : i32
    return %c0_i32, %c0_i32_0 : i32, i32
  }
  func.func @transform_2(%arg0: i32) -> (i32, i32) {
    %c0_i32 = arith.constant 0 : i32
    %c0_i32_0 = arith.constant 0 : i32
    %c0_i32_1 = arith.constant 0 : i32
    return %c0_i32, %c0_i32_0 : i32, i32
  }
  func.func @transform_3(%arg0: i32) -> (i32, i32) {
    %c0_i32 = arith.constant 0 : i32
    %c0_i32_0 = arith.constant 0 : i32
    %c0_i32_1 = arith.constant 0 : i32
    return %c0_i32, %c0_i32_0 : i32, i32
  }
  func.func @transform_4(%arg0: i32) -> (i32, i32) {
    %c0_i32 = arith.constant 0 : i32
    %c0_i32_0 = arith.constant 0 : i32
    %c0_i32_1 = arith.constant 0 : i32
    return %c0_i32, %c0_i32_0 : i32, i32
  }
  func.func @transform_5(%arg0: i32) -> (i32, i32) {
    %c0_i32 = arith.constant 0 : i32
    %c0_i32_0 = arith.constant 0 : i32
    %c0_i32_1 = arith.constant 0 : i32
    return %c0_i32, %c0_i32_0 : i32, i32
  }
  func.func @transform_6(%arg0: i32) -> (i32, i32) {
    %c0_i32 = arith.constant 0 : i32
    %c0_i32_0 = arith.constant 0 : i32
    %c0_i32_1 = arith.constant 0 : i32
    return %c0_i32, %c0_i32_0 : i32, i32
  }
  func.func @transform_7(%arg0: i32) -> (i32, i32) {
    %c0_i32 = arith.constant 0 : i32
    %c0_i32_0 = arith.constant 0 : i32
    %c0_i32_1 = arith.constant 0 : i32
    return %c0_i32, %c0_i32_0 : i32, i32
  }
  func.func @transform_8(%arg0: i32) -> (i32, i32) {
    %c0_i32 = arith.constant 0 : i32
    %c0_i32_0 = arith.constant 0 : i32
    %c0_i32_1 = arith.constant 0 : i32
    return %c0_i32, %c0_i32_0 : i32, i32
  }
  func.func @transform_9(%arg0: i32) -> (i32, i32, i32) {
    %c0_i32 = arith.constant 0 : i32
    %c0_i32_0 = arith.constant 0 : i32
    %c0_i32_1 = arith.constant 0 : i32
    return %arg0, %c0_i32, %c0_i32_0 : i32, i32, i32
  }
}

module attributes {stable_mosaic.version = 11 : i64} {
  func.func @_ffn_block_kernel(%arg0: i32, %arg1: memref<16x128xf32, #tpu.memory_space<vmem>>, %arg2: memref<1x128xf32, #tpu.memory_space<vmem>>, %arg3: memref<1x128xf32, #tpu.memory_space<vmem>>, %arg4: memref<128x128xbf16, #tpu.memory_space<vmem>>, %arg5: memref<1x128xf32, #tpu.memory_space<vmem>>, %arg6: memref<128x128xbf16, #tpu.memory_space<vmem>>, %arg7: memref<1x128xf32, #tpu.memory_space<vmem>>, %arg8: memref<1x128xf32, #tpu.memory_space<vmem>>, %arg9: memref<1x128xf32, #tpu.memory_space<vmem>>, %arg10: memref<16x128xf32, #tpu.memory_space<vmem>>) attributes {dimension_semantics = [#tpu.dimension_semantics<parallel>], iteration_bounds = array<i64: 1>, scalar_prefetch = 0 : i64, scratch_operands = 0 : i64, tpu.core_type = #tpu.core_type<tc>, window_params = [{transform_indices = @transform_0, window_bounds = array<i64: 16, 128>}, {pipeline_mode = #tpu.pipeline_mode<synchronous>, transform_indices = @transform_1, window_bounds = array<i64: 1, 128>}, {pipeline_mode = #tpu.pipeline_mode<synchronous>, transform_indices = @transform_2, window_bounds = array<i64: 1, 128>}, {pipeline_mode = #tpu.pipeline_mode<synchronous>, transform_indices = @transform_3, window_bounds = array<i64: 128, 128>}, {pipeline_mode = #tpu.pipeline_mode<synchronous>, transform_indices = @transform_4, window_bounds = array<i64: 1, 128>}, {pipeline_mode = #tpu.pipeline_mode<synchronous>, transform_indices = @transform_5, window_bounds = array<i64: 128, 128>}, {pipeline_mode = #tpu.pipeline_mode<synchronous>, transform_indices = @transform_6, window_bounds = array<i64: 1, 128>}, {pipeline_mode = #tpu.pipeline_mode<synchronous>, transform_indices = @transform_7, window_bounds = array<i64: 1, 128>}, {pipeline_mode = #tpu.pipeline_mode<synchronous>, transform_indices = @transform_8, window_bounds = array<i64: 1, 128>}, {transform_indices = @transform_9, window_bounds = array<i64: 16, 128>}]} {
    %c0 = arith.constant 0 : index
    %c0_0 = arith.constant 0 : index
    %0 = vector.load %arg1[%c0, %c0_0] : memref<16x128xf32, #tpu.memory_space<vmem>>, vector<16x128xf32>
    %c0_1 = arith.constant 0 : index
    %c0_2 = arith.constant 0 : index
    %1 = vector.load %arg2[%c0_1, %c0_2] : memref<1x128xf32, #tpu.memory_space<vmem>>, vector<1x128xf32>
    %c0_3 = arith.constant 0 : index
    %c0_4 = arith.constant 0 : index
    %2 = vector.load %arg3[%c0_3, %c0_4] : memref<1x128xf32, #tpu.memory_space<vmem>>, vector<1x128xf32>
    %cst = arith.constant dense<0.000000e+00> : vector<16xf32>
    %3 = vector.multi_reduction <add>, %0, %cst [1] : vector<16x128xf32> to vector<16xf32>
    %4 = vector.shape_cast %3 : vector<16xf32> to vector<16x1xf32>
    %cst_5 = arith.constant 3.125000e-02 : f32
    %5 = vector.broadcast %cst_5 : f32 to vector<16x1xf32>
    %6 = arith.mulf %4, %5 : vector<16x1xf32>
    %7 = arith.mulf %0, %0 : vector<16x128xf32>
    %cst_6 = arith.constant dense<0.000000e+00> : vector<16xf32>
    %8 = vector.multi_reduction <add>, %7, %cst_6 [1] : vector<16x128xf32> to vector<16xf32>
    %9 = vector.shape_cast %8 : vector<16xf32> to vector<16x1xf32>
    %cst_7 = arith.constant 3.125000e-02 : f32
    %10 = vector.broadcast %cst_7 : f32 to vector<16x1xf32>
    %11 = arith.mulf %9, %10 : vector<16x1xf32>
    %12 = arith.mulf %6, %6 : vector<16x1xf32>
    %13 = arith.subf %11, %12 : vector<16x1xf32>
    %14 = vector.broadcast %6 : vector<16x1xf32> to vector<16x128xf32>
    %15 = arith.subf %0, %14 : vector<16x128xf32>
    %cst_8 = arith.constant 9.99999974E-6 : f32
    %16 = vector.broadcast %cst_8 : f32 to vector<16x1xf32>
    %17 = arith.addf %13, %16 : vector<16x1xf32>
    %18 = math.rsqrt %17 : vector<16x1xf32>
    %19 = vector.broadcast %18 : vector<16x1xf32> to vector<16x128xf32>
    %20 = arith.mulf %15, %19 : vector<16x128xf32>
    %21 = vector.broadcast %1 : vector<1x128xf32> to vector<16x128xf32>
    %22 = arith.mulf %20, %21 : vector<16x128xf32>
    %23 = vector.broadcast %2 : vector<1x128xf32> to vector<16x128xf32>
    %24 = arith.addf %22, %23 : vector<16x128xf32>
    %25 = arith.truncf %24 : vector<16x128xf32> to vector<16x128xbf16>
    %c0_9 = arith.constant 0 : index
    %c0_10 = arith.constant 0 : index
    %26 = vector.load %arg4[%c0_9, %c0_10] : memref<128x128xbf16, #tpu.memory_space<vmem>>, vector<128x128xbf16>
    %cst_11 = arith.constant dense<0.000000e+00> : vector<16x128xf32>
    %27 = tpu.matmul %25, %26, %cst_11 {dimension_numbers = #tpu.dot_dimension_numbers<[1], [0], [0], [1], [0, 0, 1, 1], [], []>} : vector<16x128xbf16>, vector<128x128xbf16>, vector<16x128xf32> -> vector<16x128xf32>
    %c0_12 = arith.constant 0 : index
    %c0_13 = arith.constant 0 : index
    %28 = vector.load %arg5[%c0_12, %c0_13] : memref<1x128xf32, #tpu.memory_space<vmem>>, vector<1x128xf32>
    %29 = vector.broadcast %28 : vector<1x128xf32> to vector<16x128xf32>
    %30 = arith.addf %27, %29 : vector<16x128xf32>
    %cst_14 = arith.constant 5.000000e-01 : f32
    %31 = vector.broadcast %cst_14 : f32 to vector<16x128xf32>
    %32 = arith.mulf %31, %30 : vector<16x128xf32>
    %33 = math.tanh %32 : vector<16x128xf32>
    %cst_15 = arith.constant 1.000000e+00 : f32
    %34 = vector.broadcast %cst_15 : f32 to vector<16x128xf32>
    %35 = arith.addf %33, %34 : vector<16x128xf32>
    %cst_16 = arith.constant 5.000000e-01 : f32
    %36 = vector.broadcast %cst_16 : f32 to vector<16x128xf32>
    %37 = arith.mulf %36, %35 : vector<16x128xf32>
    %38 = arith.mulf %30, %37 : vector<16x128xf32>
    %39 = arith.truncf %38 : vector<16x128xf32> to vector<16x128xbf16>
    %c0_17 = arith.constant 0 : index
    %c0_18 = arith.constant 0 : index
    %40 = vector.load %arg6[%c0_17, %c0_18] : memref<128x128xbf16, #tpu.memory_space<vmem>>, vector<128x128xbf16>
    %cst_19 = arith.constant dense<0.000000e+00> : vector<16x128xf32>
    %41 = tpu.matmul %39, %40, %cst_19 {dimension_numbers = #tpu.dot_dimension_numbers<[1], [0], [0], [1], [0, 0, 1, 1], [], []>} : vector<16x128xbf16>, vector<128x128xbf16>, vector<16x128xf32> -> vector<16x128xf32>
    %c0_20 = arith.constant 0 : index
    %c0_21 = arith.constant 0 : index
    %42 = vector.load %arg7[%c0_20, %c0_21] : memref<1x128xf32, #tpu.memory_space<vmem>>, vector<1x128xf32>
    %43 = vector.broadcast %42 : vector<1x128xf32> to vector<16x128xf32>
    %44 = arith.addf %41, %43 : vector<16x128xf32>
    %cst_22 = arith.constant 5.000000e-01 : f32
    %45 = vector.broadcast %cst_22 : f32 to vector<16x128xf32>
    %46 = arith.mulf %45, %44 : vector<16x128xf32>
    %47 = arith.addf %0, %46 : vector<16x128xf32>
    %c0_23 = arith.constant 0 : index
    %c0_24 = arith.constant 0 : index
    %48 = vector.load %arg8[%c0_23, %c0_24] : memref<1x128xf32, #tpu.memory_space<vmem>>, vector<1x128xf32>
    %c0_25 = arith.constant 0 : index
    %c0_26 = arith.constant 0 : index
    %49 = vector.load %arg9[%c0_25, %c0_26] : memref<1x128xf32, #tpu.memory_space<vmem>>, vector<1x128xf32>
    %cst_27 = arith.constant dense<0.000000e+00> : vector<16xf32>
    %50 = vector.multi_reduction <add>, %47, %cst_27 [1] : vector<16x128xf32> to vector<16xf32>
    %51 = vector.shape_cast %50 : vector<16xf32> to vector<16x1xf32>
    %cst_28 = arith.constant 3.125000e-02 : f32
    %52 = vector.broadcast %cst_28 : f32 to vector<16x1xf32>
    %53 = arith.mulf %51, %52 : vector<16x1xf32>
    %54 = arith.mulf %47, %47 : vector<16x128xf32>
    %cst_29 = arith.constant dense<0.000000e+00> : vector<16xf32>
    %55 = vector.multi_reduction <add>, %54, %cst_29 [1] : vector<16x128xf32> to vector<16xf32>
    %56 = vector.shape_cast %55 : vector<16xf32> to vector<16x1xf32>
    %cst_30 = arith.constant 3.125000e-02 : f32
    %57 = vector.broadcast %cst_30 : f32 to vector<16x1xf32>
    %58 = arith.mulf %56, %57 : vector<16x1xf32>
    %59 = arith.mulf %53, %53 : vector<16x1xf32>
    %60 = arith.subf %58, %59 : vector<16x1xf32>
    %61 = vector.broadcast %53 : vector<16x1xf32> to vector<16x128xf32>
    %62 = arith.subf %47, %61 : vector<16x128xf32>
    %cst_31 = arith.constant 9.99999974E-6 : f32
    %63 = vector.broadcast %cst_31 : f32 to vector<16x1xf32>
    %64 = arith.addf %60, %63 : vector<16x1xf32>
    %65 = math.rsqrt %64 : vector<16x1xf32>
    %66 = vector.broadcast %65 : vector<16x1xf32> to vector<16x128xf32>
    %67 = arith.mulf %62, %66 : vector<16x128xf32>
    %68 = vector.broadcast %48 : vector<1x128xf32> to vector<16x128xf32>
    %69 = arith.mulf %67, %68 : vector<16x128xf32>
    %70 = vector.broadcast %49 : vector<1x128xf32> to vector<16x128xf32>
    %71 = arith.addf %69, %70 : vector<16x128xf32>
    %c0_32 = arith.constant 0 : index
    %c0_33 = arith.constant 0 : index
    %72 = vector.load %arg10[%c0_32, %c0_33] : memref<16x128xf32, #tpu.memory_space<vmem>>, vector<16x128xf32>
    tpu.vector_store %arg10[%c0_32, %c0_33], %71 {strides = array<i32>} : memref<16x128xf32, #tpu.memory_space<vmem>>, vector<16x128xf32>,
    return
  }
  func.func @transform_0(%arg0: i32) -> (i32, i32) {
    %c0_i32 = arith.constant 0 : i32
    %c0_i32_0 = arith.constant 0 : i32
    return %arg0, %c0_i32 : i32, i32
  }
  func.func @transform_1(%arg0: i32) -> (i32, i32) {
    %c0_i32 = arith.constant 0 : i32
    %c0_i32_0 = arith.constant 0 : i32
    %c0_i32_1 = arith.constant 0 : i32
    return %c0_i32, %c0_i32_0 : i32, i32
  }
  func.func @transform_2(%arg0: i32) -> (i32, i32) {
    %c0_i32 = arith.constant 0 : i32
    %c0_i32_0 = arith.constant 0 : i32
    %c0_i32_1 = arith.constant 0 : i32
    return %c0_i32, %c0_i32_0 : i32, i32
  }
  func.func @transform_3(%arg0: i32) -> (i32, i32) {
    %c0_i32 = arith.constant 0 : i32
    %c0_i32_0 = arith.constant 0 : i32
    %c0_i32_1 = arith.constant 0 : i32
    return %c0_i32, %c0_i32_0 : i32, i32
  }
  func.func @transform_4(%arg0: i32) -> (i32, i32) {
    %c0_i32 = arith.constant 0 : i32
    %c0_i32_0 = arith.constant 0 : i32
    %c0_i32_1 = arith.constant 0 : i32
    return %c0_i32, %c0_i32_0 : i32, i32
  }
  func.func @transform_5(%arg0: i32) -> (i32, i32) {
    %c0_i32 = arith.constant 0 : i32
    %c0_i32_0 = arith.constant 0 : i32
    %c0_i32_1 = arith.constant 0 : i32
    return %c0_i32, %c0_i32_0 : i32, i32
  }
  func.func @transform_6(%arg0: i32) -> (i32, i32) {
    %c0_i32 = arith.constant 0 : i32
    %c0_i32_0 = arith.constant 0 : i32
    %c0_i32_1 = arith.constant 0 : i32
    return %c0_i32, %c0_i32_0 : i32, i32
  }
  func.func @transform_7(%arg0: i32) -> (i32, i32) {
    %c0_i32 = arith.constant 0 : i32
    %c0_i32_0 = arith.constant 0 : i32
    %c0_i32_1 = arith.constant 0 : i32
    return %c0_i32, %c0_i32_0 : i32, i32
  }
  func.func @transform_8(%arg0: i32) -> (i32, i32) {
    %c0_i32 = arith.constant 0 : i32
    %c0_i32_0 = arith.constant 0 : i32
    %c0_i32_1 = arith.constant 0 : i32
    return %c0_i32, %c0_i32_0 : i32, i32
  }
  func.func @transform_9(%arg0: i32) -> (i32, i32) {
    %c0_i32 = arith.constant 0 : i32
    %c0_i32_0 = arith.constant 0 : i32
    return %arg0, %c0_i32 : i32, i32
  }
}

module attributes {stable_mosaic.version = 11 : i64} {
  func.func @_ffn_block_kernel(%arg0: i32, %arg1: memref<16x128xf32, #tpu.memory_space<vmem>>, %arg2: memref<1x128xf32, #tpu.memory_space<vmem>>, %arg3: memref<1x128xf32, #tpu.memory_space<vmem>>, %arg4: memref<128x128xbf16, #tpu.memory_space<vmem>>, %arg5: memref<1x128xf32, #tpu.memory_space<vmem>>, %arg6: memref<128x128xbf16, #tpu.memory_space<vmem>>, %arg7: memref<1x128xf32, #tpu.memory_space<vmem>>, %arg8: memref<16x128xf32, #tpu.memory_space<vmem>>) attributes {dimension_semantics = [#tpu.dimension_semantics<parallel>], iteration_bounds = array<i64: 1>, scalar_prefetch = 0 : i64, scratch_operands = 0 : i64, tpu.core_type = #tpu.core_type<tc>, window_params = [{transform_indices = @transform_0, window_bounds = array<i64: 16, 128>}, {pipeline_mode = #tpu.pipeline_mode<synchronous>, transform_indices = @transform_1, window_bounds = array<i64: 1, 128>}, {pipeline_mode = #tpu.pipeline_mode<synchronous>, transform_indices = @transform_2, window_bounds = array<i64: 1, 128>}, {pipeline_mode = #tpu.pipeline_mode<synchronous>, transform_indices = @transform_3, window_bounds = array<i64: 128, 128>}, {pipeline_mode = #tpu.pipeline_mode<synchronous>, transform_indices = @transform_4, window_bounds = array<i64: 1, 128>}, {pipeline_mode = #tpu.pipeline_mode<synchronous>, transform_indices = @transform_5, window_bounds = array<i64: 128, 128>}, {pipeline_mode = #tpu.pipeline_mode<synchronous>, transform_indices = @transform_6, window_bounds = array<i64: 1, 128>}, {transform_indices = @transform_7, window_bounds = array<i64: 16, 128>}]} {
    %c0 = arith.constant 0 : index
    %c0_0 = arith.constant 0 : index
    %0 = vector.load %arg1[%c0, %c0_0] : memref<16x128xf32, #tpu.memory_space<vmem>>, vector<16x128xf32>
    %c0_1 = arith.constant 0 : index
    %c0_2 = arith.constant 0 : index
    %1 = vector.load %arg2[%c0_1, %c0_2] : memref<1x128xf32, #tpu.memory_space<vmem>>, vector<1x128xf32>
    %c0_3 = arith.constant 0 : index
    %c0_4 = arith.constant 0 : index
    %2 = vector.load %arg3[%c0_3, %c0_4] : memref<1x128xf32, #tpu.memory_space<vmem>>, vector<1x128xf32>
    %cst = arith.constant dense<0.000000e+00> : vector<16xf32>
    %3 = vector.multi_reduction <add>, %0, %cst [1] : vector<16x128xf32> to vector<16xf32>
    %4 = vector.shape_cast %3 : vector<16xf32> to vector<16x1xf32>
    %cst_5 = arith.constant 3.125000e-02 : f32
    %5 = vector.broadcast %cst_5 : f32 to vector<16x1xf32>
    %6 = arith.mulf %4, %5 : vector<16x1xf32>
    %7 = arith.mulf %0, %0 : vector<16x128xf32>
    %cst_6 = arith.constant dense<0.000000e+00> : vector<16xf32>
    %8 = vector.multi_reduction <add>, %7, %cst_6 [1] : vector<16x128xf32> to vector<16xf32>
    %9 = vector.shape_cast %8 : vector<16xf32> to vector<16x1xf32>
    %cst_7 = arith.constant 3.125000e-02 : f32
    %10 = vector.broadcast %cst_7 : f32 to vector<16x1xf32>
    %11 = arith.mulf %9, %10 : vector<16x1xf32>
    %12 = arith.mulf %6, %6 : vector<16x1xf32>
    %13 = arith.subf %11, %12 : vector<16x1xf32>
    %14 = vector.broadcast %6 : vector<16x1xf32> to vector<16x128xf32>
    %15 = arith.subf %0, %14 : vector<16x128xf32>
    %cst_8 = arith.constant 9.99999974E-6 : f32
    %16 = vector.broadcast %cst_8 : f32 to vector<16x1xf32>
    %17 = arith.addf %13, %16 : vector<16x1xf32>
    %18 = math.rsqrt %17 : vector<16x1xf32>
    %19 = vector.broadcast %18 : vector<16x1xf32> to vector<16x128xf32>
    %20 = arith.mulf %15, %19 : vector<16x128xf32>
    %21 = vector.broadcast %1 : vector<1x128xf32> to vector<16x128xf32>
    %22 = arith.mulf %20, %21 : vector<16x128xf32>
    %23 = vector.broadcast %2 : vector<1x128xf32> to vector<16x128xf32>
    %24 = arith.addf %22, %23 : vector<16x128xf32>
    %25 = arith.truncf %24 : vector<16x128xf32> to vector<16x128xbf16>
    %c0_9 = arith.constant 0 : index
    %c0_10 = arith.constant 0 : index
    %26 = vector.load %arg4[%c0_9, %c0_10] : memref<128x128xbf16, #tpu.memory_space<vmem>>, vector<128x128xbf16>
    %cst_11 = arith.constant dense<0.000000e+00> : vector<16x128xf32>
    %27 = tpu.matmul %25, %26, %cst_11 {dimension_numbers = #tpu.dot_dimension_numbers<[1], [0], [0], [1], [0, 0, 1, 1], [], []>} : vector<16x128xbf16>, vector<128x128xbf16>, vector<16x128xf32> -> vector<16x128xf32>
    %c0_12 = arith.constant 0 : index
    %c0_13 = arith.constant 0 : index
    %28 = vector.load %arg5[%c0_12, %c0_13] : memref<1x128xf32, #tpu.memory_space<vmem>>, vector<1x128xf32>
    %29 = vector.broadcast %28 : vector<1x128xf32> to vector<16x128xf32>
    %30 = arith.addf %27, %29 : vector<16x128xf32>
    %cst_14 = arith.constant 5.000000e-01 : f32
    %31 = vector.broadcast %cst_14 : f32 to vector<16x128xf32>
    %32 = arith.mulf %31, %30 : vector<16x128xf32>
    %33 = math.tanh %32 : vector<16x128xf32>
    %cst_15 = arith.constant 1.000000e+00 : f32
    %34 = vector.broadcast %cst_15 : f32 to vector<16x128xf32>
    %35 = arith.addf %33, %34 : vector<16x128xf32>
    %cst_16 = arith.constant 5.000000e-01 : f32
    %36 = vector.broadcast %cst_16 : f32 to vector<16x128xf32>
    %37 = arith.mulf %36, %35 : vector<16x128xf32>
    %38 = arith.mulf %30, %37 : vector<16x128xf32>
    %39 = arith.truncf %38 : vector<16x128xf32> to vector<16x128xbf16>
    %c0_17 = arith.constant 0 : index
    %c0_18 = arith.constant 0 : index
    %40 = vector.load %arg6[%c0_17, %c0_18] : memref<128x128xbf16, #tpu.memory_space<vmem>>, vector<128x128xbf16>
    %cst_19 = arith.constant dense<0.000000e+00> : vector<16x128xf32>
    %41 = tpu.matmul %39, %40, %cst_19 {dimension_numbers = #tpu.dot_dimension_numbers<[1], [0], [0], [1], [0, 0, 1, 1], [], []>} : vector<16x128xbf16>, vector<128x128xbf16>, vector<16x128xf32> -> vector<16x128xf32>
    %c0_20 = arith.constant 0 : index
    %c0_21 = arith.constant 0 : index
    %42 = vector.load %arg7[%c0_20, %c0_21] : memref<1x128xf32, #tpu.memory_space<vmem>>, vector<1x128xf32>
    %43 = vector.broadcast %42 : vector<1x128xf32> to vector<16x128xf32>
    %44 = arith.addf %41, %43 : vector<16x128xf32>
    %cst_22 = arith.constant 5.000000e-01 : f32
    %45 = vector.broadcast %cst_22 : f32 to vector<16x128xf32>
    %46 = arith.mulf %45, %44 : vector<16x128xf32>
    %47 = arith.addf %0, %46 : vector<16x128xf32>
    %c0_23 = arith.constant 0 : index
    %c0_24 = arith.constant 0 : index
    %48 = vector.load %arg8[%c0_23, %c0_24] : memref<16x128xf32, #tpu.memory_space<vmem>>, vector<16x128xf32>
    tpu.vector_store %arg8[%c0_23, %c0_24], %47 {strides = array<i32>} : memref<16x128xf32, #tpu.memory_space<vmem>>, vector<16x128xf32>,
    return
  }
  func.func @transform_0(%arg0: i32) -> (i32, i32) {
    %c0_i32 = arith.constant 0 : i32
    %c0_i32_0 = arith.constant 0 : i32
    return %arg0, %c0_i32 : i32, i32
  }
  func.func @transform_1(%arg0: i32) -> (i32, i32) {
    %c0_i32 = arith.constant 0 : i32
    %c0_i32_0 = arith.constant 0 : i32
    %c0_i32_1 = arith.constant 0 : i32
    return %c0_i32, %c0_i32_0 : i32, i32
  }
  func.func @transform_2(%arg0: i32) -> (i32, i32) {
    %c0_i32 = arith.constant 0 : i32
    %c0_i32_0 = arith.constant 0 : i32
    %c0_i32_1 = arith.constant 0 : i32
    return %c0_i32, %c0_i32_0 : i32, i32
  }
  func.func @transform_3(%arg0: i32) -> (i32, i32) {
    %c0_i32 = arith.constant 0 : i32
    %c0_i32_0 = arith.constant 0 : i32
    %c0_i32_1 = arith.constant 0 : i32
    return %c0_i32, %c0_i32_0 : i32, i32
  }
  func.func @transform_4(%arg0: i32) -> (i32, i32) {
    %c0_i32 = arith.constant 0 : i32
    %c0_i32_0 = arith.constant 0 : i32
    %c0_i32_1 = arith.constant 0 : i32
    return %c0_i32, %c0_i32_0 : i32, i32
  }
  func.func @transform_5(%arg0: i32) -> (i32, i32) {
    %c0_i32 = arith.constant 0 : i32
    %c0_i32_0 = arith.constant 0 : i32
    %c0_i32_1 = arith.constant 0 : i32
    return %c0_i32, %c0_i32_0 : i32, i32
  }
  func.func @transform_6(%arg0: i32) -> (i32, i32) {
    %c0_i32 = arith.constant 0 : i32
    %c0_i32_0 = arith.constant 0 : i32
    %c0_i32_1 = arith.constant 0 : i32
    return %c0_i32, %c0_i32_0 : i32, i32
  }
  func.func @transform_7(%arg0: i32) -> (i32, i32) {
    %c0_i32 = arith.constant 0 : i32
    %c0_i32_0 = arith.constant 0 : i32
    return %arg0, %c0_i32 : i32, i32
  }
}

module attributes {stable_mosaic.version = 11 : i64} {
  func.func @_attn_block_kernel(%arg0: i32, %arg1: memref<1x8x128xf32, #tpu.memory_space<vmem>>, %arg2: memref<1x128xf32, #tpu.memory_space<vmem>>, %arg3: memref<1x128xf32, #tpu.memory_space<vmem>>, %arg4: memref<2x128x64xbf16, #tpu.memory_space<vmem>>, %arg5: memref<2x128x64xbf16, #tpu.memory_space<vmem>>, %arg6: memref<2x128x64xbf16, #tpu.memory_space<vmem>>, %arg7: memref<2x64x128xbf16, #tpu.memory_space<vmem>>, %arg8: memref<1x128xf32, #tpu.memory_space<vmem>>, %arg9: memref<64x128xbf16, #tpu.memory_space<vmem>>, %arg10: memref<1x8x128xf32, #tpu.memory_space<vmem>>) attributes {dimension_semantics = [#tpu.dimension_semantics<parallel>], iteration_bounds = array<i64: 2>, scalar_prefetch = 0 : i64, scratch_operands = 0 : i64, tpu.core_type = #tpu.core_type<tc>, window_params = [{transform_indices = @transform_0, window_bounds = array<i64: 1, 8, 128>}, {pipeline_mode = #tpu.pipeline_mode<synchronous>, transform_indices = @transform_1, window_bounds = array<i64: 1, 128>}, {pipeline_mode = #tpu.pipeline_mode<synchronous>, transform_indices = @transform_2, window_bounds = array<i64: 1, 128>}, {pipeline_mode = #tpu.pipeline_mode<synchronous>, transform_indices = @transform_3, window_bounds = array<i64: 2, 128, 64>}, {pipeline_mode = #tpu.pipeline_mode<synchronous>, transform_indices = @transform_4, window_bounds = array<i64: 2, 128, 64>}, {pipeline_mode = #tpu.pipeline_mode<synchronous>, transform_indices = @transform_5, window_bounds = array<i64: 2, 128, 64>}, {pipeline_mode = #tpu.pipeline_mode<synchronous>, transform_indices = @transform_6, window_bounds = array<i64: 2, 64, 128>}, {pipeline_mode = #tpu.pipeline_mode<synchronous>, transform_indices = @transform_7, window_bounds = array<i64: 1, 128>}, {pipeline_mode = #tpu.pipeline_mode<synchronous>, transform_indices = @transform_8, window_bounds = array<i64: 64, 128>}, {transform_indices = @transform_9, window_bounds = array<i64: 1, 8, 128>}]} {
    %c0 = arith.constant 0 : index
    %c0_0 = arith.constant 0 : index
    %c0_1 = arith.constant 0 : index
    %0 = vector.load %arg1[%c0, %c0_0, %c0_1] : memref<1x8x128xf32, #tpu.memory_space<vmem>>, vector<1x8x128xf32>
    %1 = vector.shape_cast %0 : vector<1x8x128xf32> to vector<8x128xf32>
    %c0_2 = arith.constant 0 : index
    %c0_3 = arith.constant 0 : index
    %2 = vector.load %arg2[%c0_2, %c0_3] : memref<1x128xf32, #tpu.memory_space<vmem>>, vector<1x128xf32>
    %c0_4 = arith.constant 0 : index
    %c0_5 = arith.constant 0 : index
    %3 = vector.load %arg3[%c0_4, %c0_5] : memref<1x128xf32, #tpu.memory_space<vmem>>, vector<1x128xf32>
    %cst = arith.constant dense<0.000000e+00> : vector<8xf32>
    %4 = vector.multi_reduction <add>, %1, %cst [1] : vector<8x128xf32> to vector<8xf32>
    %5 = vector.shape_cast %4 : vector<8xf32> to vector<8x1xf32>
    %cst_6 = arith.constant 3.125000e-02 : f32
    %6 = vector.broadcast %cst_6 : f32 to vector<8x1xf32>
    %7 = arith.mulf %5, %6 : vector<8x1xf32>
    %8 = arith.mulf %1, %1 : vector<8x128xf32>
    %cst_7 = arith.constant dense<0.000000e+00> : vector<8xf32>
    %9 = vector.multi_reduction <add>, %8, %cst_7 [1] : vector<8x128xf32> to vector<8xf32>
    %10 = vector.shape_cast %9 : vector<8xf32> to vector<8x1xf32>
    %cst_8 = arith.constant 3.125000e-02 : f32
    %11 = vector.broadcast %cst_8 : f32 to vector<8x1xf32>
    %12 = arith.mulf %10, %11 : vector<8x1xf32>
    %13 = arith.mulf %7, %7 : vector<8x1xf32>
    %14 = arith.subf %12, %13 : vector<8x1xf32>
    %15 = vector.broadcast %7 : vector<8x1xf32> to vector<8x128xf32>
    %16 = arith.subf %1, %15 : vector<8x128xf32>
    %cst_9 = arith.constant 9.99999974E-6 : f32
    %17 = vector.broadcast %cst_9 : f32 to vector<8x1xf32>
    %18 = arith.addf %14, %17 : vector<8x1xf32>
    %19 = math.rsqrt %18 : vector<8x1xf32>
    %20 = vector.broadcast %19 : vector<8x1xf32> to vector<8x128xf32>
    %21 = arith.mulf %16, %20 : vector<8x128xf32>
    %22 = vector.broadcast %2 : vector<1x128xf32> to vector<8x128xf32>
    %23 = arith.mulf %21, %22 : vector<8x128xf32>
    %24 = vector.broadcast %3 : vector<1x128xf32> to vector<8x128xf32>
    %25 = arith.addf %23, %24 : vector<8x128xf32>
    %26 = arith.truncf %25 : vector<8x128xf32> to vector<8x128xbf16>
    %27 = vector.shape_cast %26 : vector<8x128xbf16> to vector<1x8x128xbf16>
    %28 = vector.shape_cast %27 : vector<1x8x128xbf16> to vector<1x8x128xbf16>
    %29 = vector.broadcast %28 : vector<1x8x128xbf16> to vector<2x8x128xbf16>
    %c0_10 = arith.constant 0 : index
    %c0_11 = arith.constant 0 : index
    %c0_12 = arith.constant 0 : index
    %30 = vector.load %arg4[%c0_10, %c0_11, %c0_12] : memref<2x128x64xbf16, #tpu.memory_space<vmem>>, vector<2x128x64xbf16>
    "tpu.trace_start"() <{level = 10 : i32, message = "htd,hdk->htk"}> : () -> ()
    %cst_13 = arith.constant dense<0.000000e+00> : vector<2x8x64xf32>
    %31 = tpu.matmul %29, %30, %cst_13 {dimension_numbers = #tpu.dot_dimension_numbers<[2], [1], [1], [2], [0, 0, 0, 1, 1, 2], [0], [0]>} : vector<2x8x128xbf16>, vector<2x128x64xbf16>, vector<2x8x64xf32> -> vector<2x8x64xf32>
    "tpu.trace_stop"() : () -> ()
    %c0_14 = arith.constant 0 : index
    %c0_15 = arith.constant 0 : index
    %c0_16 = arith.constant 0 : index
    %32 = vector.load %arg5[%c0_14, %c0_15, %c0_16] : memref<2x128x64xbf16, #tpu.memory_space<vmem>>, vector<2x128x64xbf16>
    "tpu.trace_start"() <{level = 10 : i32, message = "htd,hdk->htk"}> : () -> ()
    %cst_17 = arith.constant dense<0.000000e+00> : vector<2x8x64xf32>
    %33 = tpu.matmul %29, %32, %cst_17 {dimension_numbers = #tpu.dot_dimension_numbers<[2], [1], [1], [2], [0, 0, 0, 1, 1, 2], [0], [0]>} : vector<2x8x128xbf16>, vector<2x128x64xbf16>, vector<2x8x64xf32> -> vector<2x8x64xf32>
    "tpu.trace_stop"() : () -> ()
    %c0_18 = arith.constant 0 : index
    %c0_19 = arith.constant 0 : index
    %c0_20 = arith.constant 0 : index
    %34 = vector.load %arg6[%c0_18, %c0_19, %c0_20] : memref<2x128x64xbf16, #tpu.memory_space<vmem>>, vector<2x128x64xbf16>
    "tpu.trace_start"() <{level = 10 : i32, message = "htd,hdk->htk"}> : () -> ()
    %cst_21 = arith.constant dense<0.000000e+00> : vector<2x8x64xf32>
    %35 = tpu.matmul %29, %34, %cst_21 {dimension_numbers = #tpu.dot_dimension_numbers<[2], [1], [1], [2], [0, 0, 0, 1, 1, 2], [0], [0]>} : vector<2x8x128xbf16>, vector<2x128x64xbf16>, vector<2x8x64xf32> -> vector<2x8x64xf32>
    "tpu.trace_stop"() : () -> ()
    %36 = arith.truncf %31 : vector<2x8x64xf32> to vector<2x8x64xbf16>
    %37 = arith.truncf %33 : vector<2x8x64xf32> to vector<2x8x64xbf16>
    %38 = arith.truncf %35 : vector<2x8x64xf32> to vector<2x8x64xbf16>
    "tpu.trace_start"() <{level = 10 : i32, message = "htd,hsd->hts"}> : () -> ()
    %cst_22 = arith.constant dense<0.000000e+00> : vector<2x8x8xf32>
    %39 = tpu.matmul %36, %37, %cst_22 {dimension_numbers = #tpu.dot_dimension_numbers<[2], [2], [1], [1], [0, 0, 0, 1, 1, 1], [0], [0]>} : vector<2x8x64xbf16>, vector<2x8x64xbf16>, vector<2x8x8xf32> -> vector<2x8x8xf32>
    "tpu.trace_stop"() : () -> ()
    %cst_23 = arith.constant 1.250000e-01 : f32
    %40 = vector.broadcast %cst_23 : f32 to vector<2x8x8xf32>
    %41 = arith.mulf %39, %40 : vector<2x8x8xf32>
    %c0_24 = arith.constant 0 : index
    %c0_25 = arith.constant 0 : index
    %42 = vector.load %arg9[%c0_24, %c0_25] : memref<64x128xbf16, #tpu.memory_space<vmem>>, vector<64x128xbf16>
    %43 = vector.shape_cast %42 : vector<64x128xbf16> to vector<1x64x128xbf16>
    %44 = vector.shape_cast %43 : vector<1x64x128xbf16> to vector<1x64x128xbf16>
    %45 = vector.broadcast %44 : vector<1x64x128xbf16> to vector<2x64x128xbf16>
    "tpu.trace_start"() <{level = 10 : i32, message = "htd,hdr->htr"}> : () -> ()
    %cst_26 = arith.constant dense<0.000000e+00> : vector<2x8x128xf32>
    %46 = tpu.matmul %36, %45, %cst_26 {dimension_numbers = #tpu.dot_dimension_numbers<[2], [1], [1], [2], [0, 0, 0, 1, 1, 2], [0], [0]>} : vector<2x8x64xbf16>, vector<2x64x128xbf16>, vector<2x8x128xf32> -> vector<2x8x128xf32>
    "tpu.trace_stop"() : () -> ()
    %cst_27 = arith.constant 1.250000e-01 : f32
    %47 = vector.broadcast %cst_27 : f32 to vector<2x8x128xf32>
    %48 = arith.mulf %46, %47 : vector<2x8x128xf32>
    %49 = tpu.iota {dimensions = array<i32: 1>} : vector<1x8x1xi32>
    %c121_i32 = arith.constant 121 : i32
    %50 = vector.broadcast %c121_i32 : i32 to vector<1x8x1xi32>
    %51 = arith.addi %49, %50 : vector<1x8x1xi32>
    %c128_i32 = arith.constant 128 : i32
    %c0_i32 = arith.constant 0 : i32
    %52 = arith.cmpi eq, %c128_i32, %c0_i32 : i32
    %c1_i32 = arith.constant 1 : i32
    %53 = arith.select %52, %c1_i32, %c128_i32 : i32
    %54 = vector.broadcast %53 : i32 to vector<1x8x1xi32>
    %55 = arith.remsi %51, %54 : vector<1x8x1xi32>
    %c0_i32_28 = arith.constant 0 : i32
    %56 = vector.broadcast %c0_i32_28 : i32 to vector<1x8x1xi32>
    %57 = arith.cmpi ne, %55, %56 : vector<1x8x1xi32>
    %c0_i32_29 = arith.constant 0 : i32
    %58 = vector.broadcast %c0_i32_29 : i32 to vector<1x8x1xi32>
    %59 = arith.cmpi slt, %55, %58 : vector<1x8x1xi32>
    %c0_i32_30 = arith.constant 0 : i32
    %60 = arith.cmpi slt, %53, %c0_i32_30 : i32
    %61 = vector.broadcast %60 : i1 to vector<1x8x1xi1>
    %62 = vector.broadcast %61 : vector<1x8x1xi1> to vector<1x8x1xi1>
    %63 = arith.xori %59, %62 : vector<1x8x1xi1>
    %64 = arith.andi %63, %57 : vector<1x8x1xi1>
    %65 = vector.broadcast %53 : i32 to vector<1x8x1xi32>
    %66 = arith.addi %55, %65 : vector<1x8x1xi32>
    %67 = arith.select %64, %66, %55 : vector<1x8x1xi1>, vector<1x8x1xi32>
    %c1_i32_31 = arith.constant 1 : i32
    %68 = tpu.dynamic_rotate %48 by %c1_i32_31 dim 2 : vector<2x8x128xf32>, i32 -> vector<2x8x128xf32>
    %c1_i32_32 = arith.constant 1 : i32
    %69 = vector.broadcast %c1_i32_32 : i32 to vector<1x8x1xi32>
    %70 = arith.andi %67, %69 : vector<1x8x1xi32>
    %c0_i32_33 = arith.constant 0 : i32
    %71 = vector.broadcast %c0_i32_33 : i32 to vector<1x8x1xi32>
    %72 = arith.cmpi ne, %70, %71 : vector<1x8x1xi32>
    %73 = vector.shape_cast %72 : vector<1x8x1xi1> to vector<1x8x1xi1>
    %74 = vector.broadcast %73 : vector<1x8x1xi1> to vector<2x8x128xi1>
    %75 = arith.select %74, %68, %48 : vector<2x8x128xi1>, vector<2x8x128xf32>
    %c2_i32 = arith.constant 2 : i32
    %76 = tpu.dynamic_rotate %75 by %c2_i32 dim 2 : vector<2x8x128xf32>, i32 -> vector<2x8x128xf32>
    %c2_i32_34 = arith.constant 2 : i32
    %77 = vector.broadcast %c2_i32_34 : i32 to vector<1x8x1xi32>
    %78 = arith.andi %67, %77 : vector<1x8x1xi32>
    %c0_i32_35 = arith.constant 0 : i32
    %79 = vector.broadcast %c0_i32_35 : i32 to vector<1x8x1xi32>
    %80 = arith.cmpi ne, %78, %79 : vector<1x8x1xi32>
    %81 = vector.shape_cast %80 : vector<1x8x1xi1> to vector<1x8x1xi1>
    %82 = vector.broadcast %81 : vector<1x8x1xi1> to vector<2x8x128xi1>
    %83 = arith.select %82, %76, %75 : vector<2x8x128xi1>, vector<2x8x128xf32>
    %c4_i32 = arith.constant 4 : i32
    %84 = tpu.dynamic_rotate %83 by %c4_i32 dim 2 : vector<2x8x128xf32>, i32 -> vector<2x8x128xf32>
    %c4_i32_36 = arith.constant 4 : i32
    %85 = vector.broadcast %c4_i32_36 : i32 to vector<1x8x1xi32>
    %86 = arith.andi %67, %85 : vector<1x8x1xi32>
    %c0_i32_37 = arith.constant 0 : i32
    %87 = vector.broadcast %c0_i32_37 : i32 to vector<1x8x1xi32>
    %88 = arith.cmpi ne, %86, %87 : vector<1x8x1xi32>
    %89 = vector.shape_cast %88 : vector<1x8x1xi1> to vector<1x8x1xi1>
    %90 = vector.broadcast %89 : vector<1x8x1xi1> to vector<2x8x128xi1>
    %91 = arith.select %90, %84, %83 : vector<2x8x128xi1>, vector<2x8x128xf32>
    %c8_i32 = arith.constant 8 : i32
    %92 = tpu.dynamic_rotate %91 by %c8_i32 dim 2 : vector<2x8x128xf32>, i32 -> vector<2x8x128xf32>
    %c8_i32_38 = arith.constant 8 : i32
    %93 = vector.broadcast %c8_i32_38 : i32 to vector<1x8x1xi32>
    %94 = arith.andi %67, %93 : vector<1x8x1xi32>
    %c0_i32_39 = arith.constant 0 : i32
    %95 = vector.broadcast %c0_i32_39 : i32 to vector<1x8x1xi32>
    %96 = arith.cmpi ne, %94, %95 : vector<1x8x1xi32>
    %97 = vector.shape_cast %96 : vector<1x8x1xi1> to vector<1x8x1xi1>
    %98 = vector.broadcast %97 : vector<1x8x1xi1> to vector<2x8x128xi1>
    %99 = arith.select %98, %92, %91 : vector<2x8x128xi1>, vector<2x8x128xf32>
    %c16_i32 = arith.constant 16 : i32
    %100 = tpu.dynamic_rotate %99 by %c16_i32 dim 2 : vector<2x8x128xf32>, i32 -> vector<2x8x128xf32>
    %c16_i32_40 = arith.constant 16 : i32
    %101 = vector.broadcast %c16_i32_40 : i32 to vector<1x8x1xi32>
    %102 = arith.andi %67, %101 : vector<1x8x1xi32>
    %c0_i32_41 = arith.constant 0 : i32
    %103 = vector.broadcast %c0_i32_41 : i32 to vector<1x8x1xi32>
    %104 = arith.cmpi ne, %102, %103 : vector<1x8x1xi32>
    %105 = vector.shape_cast %104 : vector<1x8x1xi1> to vector<1x8x1xi1>
    %106 = vector.broadcast %105 : vector<1x8x1xi1> to vector<2x8x128xi1>
    %107 = arith.select %106, %100, %99 : vector<2x8x128xi1>, vector<2x8x128xf32>
    %c32_i32 = arith.constant 32 : i32
    %108 = tpu.dynamic_rotate %107 by %c32_i32 dim 2 : vector<2x8x128xf32>, i32 -> vector<2x8x128xf32>
    %c32_i32_42 = arith.constant 32 : i32
    %109 = vector.broadcast %c32_i32_42 : i32 to vector<1x8x1xi32>
    %110 = arith.andi %67, %109 : vector<1x8x1xi32>
    %c0_i32_43 = arith.constant 0 : i32
    %111 = vector.broadcast %c0_i32_43 : i32 to vector<1x8x1xi32>
    %112 = arith.cmpi ne, %110, %111 : vector<1x8x1xi32>
    %113 = vector.shape_cast %112 : vector<1x8x1xi1> to vector<1x8x1xi1>
    %114 = vector.broadcast %113 : vector<1x8x1xi1> to vector<2x8x128xi1>
    %115 = arith.select %114, %108, %107 : vector<2x8x128xi1>, vector<2x8x128xf32>
    %c64_i32 = arith.constant 64 : i32
    %116 = tpu.dynamic_rotate %115 by %c64_i32 dim 2 : vector<2x8x128xf32>, i32 -> vector<2x8x128xf32>
    %c64_i32_44 = arith.constant 64 : i32
    %117 = vector.broadcast %c64_i32_44 : i32 to vector<1x8x1xi32>
    %118 = arith.andi %67, %117 : vector<1x8x1xi32>
    %c0_i32_45 = arith.constant 0 : i32
    %119 = vector.broadcast %c0_i32_45 : i32 to vector<1x8x1xi32>
    %120 = arith.cmpi ne, %118, %119 : vector<1x8x1xi32>
    %121 = vector.shape_cast %120 : vector<1x8x1xi1> to vector<1x8x1xi1>
    %122 = vector.broadcast %121 : vector<1x8x1xi1> to vector<2x8x128xi1>
    %123 = arith.select %122, %116, %115 : vector<2x8x128xi1>, vector<2x8x128xf32>
    %124 = vector.extract_strided_slice %123 {offsets = [0, 0, 0], sizes = [2, 8, 8], strides = [1, 1, 1]} : vector<2x8x128xf32> to vector<2x8x8xf32>
    %125 = arith.addf %41, %124 : vector<2x8x8xf32>
    %cst_46 = arith.constant dense<0xFF800000> : vector<2x8xf32>
    %126 = vector.multi_reduction <maximumf>, %125, %cst_46 [2] : vector<2x8x8xf32> to vector<2x8xf32>
    %127 = vector.shape_cast %126 : vector<2x8xf32> to vector<2x8x1xf32>
    %128 = vector.broadcast %127 : vector<2x8x1xf32> to vector<2x8x8xf32>
    %129 = arith.subf %125, %128 : vector<2x8x8xf32>
    %130 = math.exp %129 : vector<2x8x8xf32>
    %cst_47 = arith.constant dense<0.000000e+00> : vector<2x8xf32>
    %131 = vector.multi_reduction <add>, %130, %cst_47 [2] : vector<2x8x8xf32> to vector<2x8xf32>
    %132 = vector.shape_cast %131 : vector<2x8xf32> to vector<2x8x1xf32>
    %133 = tpu.reciprocal %132 {approx = true} : vector<2x8x1xf32> -> vector<2x8x1xf32>
    %134 = vector.broadcast %133 : vector<2x8x1xf32> to vector<2x8x8xf32>
    %135 = arith.mulf %130, %134 : vector<2x8x8xf32>
    %136 = arith.truncf %135 : vector<2x8x8xf32> to vector<2x8x8xbf16>
    "tpu.trace_start"() <{level = 10 : i32, message = "hts,hsd->htd"}> : () -> ()
    %cst_48 = arith.constant dense<0.000000e+00> : vector<2x8x64xf32>
    %137 = tpu.matmul %136, %38, %cst_48 {dimension_numbers = #tpu.dot_dimension_numbers<[2], [1], [1], [2], [0, 0, 0, 1, 1, 2], [0], [0]>} : vector<2x8x8xbf16>, vector<2x8x64xbf16>, vector<2x8x64xf32> -> vector<2x8x64xf32>
    "tpu.trace_stop"() : () -> ()
    %138 = arith.truncf %137 : vector<2x8x64xf32> to vector<2x8x64xbf16>
    %c0_49 = arith.constant 0 : index
    %c0_50 = arith.constant 0 : index
    %c0_51 = arith.constant 0 : index
    %139 = vector.load %arg7[%c0_49, %c0_50, %c0_51] : memref<2x64x128xbf16, #tpu.memory_space<vmem>>, vector<2x64x128xbf16>
    "tpu.trace_start"() <{level = 10 : i32, message = "htd,hdD->htD"}> : () -> ()
    %cst_52 = arith.constant dense<0.000000e+00> : vector<2x8x128xf32>
    %140 = tpu.matmul %138, %139, %cst_52 {dimension_numbers = #tpu.dot_dimension_numbers<[2], [1], [1], [2], [0, 0, 0, 1, 1, 2], [0], [0]>} : vector<2x8x64xbf16>, vector<2x64x128xbf16>, vector<2x8x128xf32> -> vector<2x8x128xf32>
    "tpu.trace_stop"() : () -> ()
    %cst_53 = arith.constant dense<0.000000e+00> : vector<8x128xf32>
    %141 = vector.multi_reduction <add>, %140, %cst_53 [0] : vector<2x8x128xf32> to vector<8x128xf32>
    %c0_54 = arith.constant 0 : index
    %c0_55 = arith.constant 0 : index
    %142 = vector.load %arg8[%c0_54, %c0_55] : memref<1x128xf32, #tpu.memory_space<vmem>>, vector<1x128xf32>
    %143 = vector.broadcast %142 : vector<1x128xf32> to vector<8x128xf32>
    %144 = arith.addf %141, %143 : vector<8x128xf32>
    %145 = arith.addf %1, %144 : vector<8x128xf32>
    %c0_56 = arith.constant 0 : index
    %c0_57 = arith.constant 0 : index
    %c0_58 = arith.constant 0 : index
    %146 = vector.load %arg10[%c0_56, %c0_57, %c0_58] : memref<1x8x128xf32, #tpu.memory_space<vmem>>, vector<1x8x128xf32>
    %147 = vector.shape_cast %146 : vector<1x8x128xf32> to vector<8x128xf32>
    %148 = vector.shape_cast %145 : vector<8x128xf32> to vector<1x8x128xf32>
    tpu.vector_store %arg10[%c0_56, %c0_57, %c0_58], %148 {strides = array<i32>} : memref<1x8x128xf32, #tpu.memory_space<vmem>>, vector<1x8x128xf32>,
    return
  }
  func.func @transform_0(%arg0: i32) -> (i32, i32, i32) {
    %c0_i32 = arith.constant 0 : i32
    %c0_i32_0 = arith.constant 0 : i32
    %c0_i32_1 = arith.constant 0 : i32
    return %arg0, %c0_i32, %c0_i32_0 : i32, i32, i32
  }
  func.func @transform_1(%arg0: i32) -> (i32, i32) {
    %c0_i32 = arith.constant 0 : i32
    %c0_i32_0 = arith.constant 0 : i32
    %c0_i32_1 = arith.constant 0 : i32
    return %c0_i32, %c0_i32_0 : i32, i32
  }
  func.func @transform_2(%arg0: i32) -> (i32, i32) {
    %c0_i32 = arith.constant 0 : i32
    %c0_i32_0 = arith.constant 0 : i32
    %c0_i32_1 = arith.constant 0 : i32
    return %c0_i32, %c0_i32_0 : i32, i32
  }
  func.func @transform_3(%arg0: i32) -> (i32, i32, i32) {
    %c0_i32 = arith.constant 0 : i32
    %c0_i32_0 = arith.constant 0 : i32
    %c0_i32_1 = arith.constant 0 : i32
    %c0_i32_2 = arith.constant 0 : i32
    return %c0_i32, %c0_i32_0, %c0_i32_1 : i32, i32, i32
  }
  func.func @transform_4(%arg0: i32) -> (i32, i32, i32) {
    %c0_i32 = arith.constant 0 : i32
    %c0_i32_0 = arith.constant 0 : i32
    %c0_i32_1 = arith.constant 0 : i32
    %c0_i32_2 = arith.constant 0 : i32
    return %c0_i32, %c0_i32_0, %c0_i32_1 : i32, i32, i32
  }
  func.func @transform_5(%arg0: i32) -> (i32, i32, i32) {
    %c0_i32 = arith.constant 0 : i32
    %c0_i32_0 = arith.constant 0 : i32
    %c0_i32_1 = arith.constant 0 : i32
    %c0_i32_2 = arith.constant 0 : i32
    return %c0_i32, %c0_i32_0, %c0_i32_1 : i32, i32, i32
  }
  func.func @transform_6(%arg0: i32) -> (i32, i32, i32) {
    %c0_i32 = arith.constant 0 : i32
    %c0_i32_0 = arith.constant 0 : i32
    %c0_i32_1 = arith.constant 0 : i32
    %c0_i32_2 = arith.constant 0 : i32
    return %c0_i32, %c0_i32_0, %c0_i32_1 : i32, i32, i32
  }
  func.func @transform_7(%arg0: i32) -> (i32, i32) {
    %c0_i32 = arith.constant 0 : i32
    %c0_i32_0 = arith.constant 0 : i32
    %c0_i32_1 = arith.constant 0 : i32
    return %c0_i32, %c0_i32_0 : i32, i32
  }
  func.func @transform_8(%arg0: i32) -> (i32, i32) {
    %c0_i32 = arith.constant 0 : i32
    %c0_i32_0 = arith.constant 0 : i32
    %c0_i32_1 = arith.constant 0 : i32
    return %c0_i32, %c0_i32_0 : i32, i32
  }
  func.func @transform_9(%arg0: i32) -> (i32, i32, i32) {
    %c0_i32 = arith.constant 0 : i32
    %c0_i32_0 = arith.constant 0 : i32
    %c0_i32_1 = arith.constant 0 : i32
    return %arg0, %c0_i32, %c0_i32_0 : i32, i32, i32
  }
}

module attributes {stable_mosaic.version = 11 : i64} {
  func.func @_conv_block_kernel(%arg0: i32, %arg1: memref<1x8x128xf32, #tpu.memory_space<vmem>>, %arg2: memref<1x128xf32, #tpu.memory_space<vmem>>, %arg3: memref<1x128xf32, #tpu.memory_space<vmem>>, %arg4: memref<128x256xbf16, #tpu.memory_space<vmem>>, %arg5: memref<1x256xf32, #tpu.memory_space<vmem>>, %arg6: memref<31x128xf32, #tpu.memory_space<vmem>>, %arg7: memref<1x128xf32, #tpu.memory_space<vmem>>, %arg8: memref<128x128xbf16, #tpu.memory_space<vmem>>, %arg9: memref<1x128xf32, #tpu.memory_space<vmem>>, %arg10: memref<1x8x128xf32, #tpu.memory_space<vmem>>, %arg11: memref<38x128xf32, #tpu.memory_space<vmem>>) attributes {dimension_semantics = [#tpu.dimension_semantics<parallel>], iteration_bounds = array<i64: 2>, scalar_prefetch = 0 : i64, scratch_operands = 1 : i64, tpu.core_type = #tpu.core_type<tc>, window_params = [{transform_indices = @transform_0, window_bounds = array<i64: 1, 8, 128>}, {pipeline_mode = #tpu.pipeline_mode<synchronous>, transform_indices = @transform_1, window_bounds = array<i64: 1, 128>}, {pipeline_mode = #tpu.pipeline_mode<synchronous>, transform_indices = @transform_2, window_bounds = array<i64: 1, 128>}, {pipeline_mode = #tpu.pipeline_mode<synchronous>, transform_indices = @transform_3, window_bounds = array<i64: 128, 256>}, {pipeline_mode = #tpu.pipeline_mode<synchronous>, transform_indices = @transform_4, window_bounds = array<i64: 1, 256>}, {pipeline_mode = #tpu.pipeline_mode<synchronous>, transform_indices = @transform_5, window_bounds = array<i64: 31, 128>}, {pipeline_mode = #tpu.pipeline_mode<synchronous>, transform_indices = @transform_6, window_bounds = array<i64: 1, 128>}, {pipeline_mode = #tpu.pipeline_mode<synchronous>, transform_indices = @transform_7, window_bounds = array<i64: 128, 128>}, {pipeline_mode = #tpu.pipeline_mode<synchronous>, transform_indices = @transform_8, window_bounds = array<i64: 1, 128>}, {transform_indices = @transform_9, window_bounds = array<i64: 1, 8, 128>}]} {
    %c0 = arith.constant 0 : index
    %c0_0 = arith.constant 0 : index
    %c0_1 = arith.constant 0 : index
    %0 = vector.load %arg1[%c0, %c0_0, %c0_1] : memref<1x8x128xf32, #tpu.memory_space<vmem>>, vector<1x8x128xf32>
    %1 = vector.shape_cast %0 : vector<1x8x128xf32> to vector<8x128xf32>
    %c0_2 = arith.constant 0 : index
    %c0_3 = arith.constant 0 : index
    %2 = vector.load %arg2[%c0_2, %c0_3] : memref<1x128xf32, #tpu.memory_space<vmem>>, vector<1x128xf32>
    %c0_4 = arith.constant 0 : index
    %c0_5 = arith.constant 0 : index
    %3 = vector.load %arg3[%c0_4, %c0_5] : memref<1x128xf32, #tpu.memory_space<vmem>>, vector<1x128xf32>
    %cst = arith.constant dense<0.000000e+00> : vector<8xf32>
    %4 = vector.multi_reduction <add>, %1, %cst [1] : vector<8x128xf32> to vector<8xf32>
    %5 = vector.shape_cast %4 : vector<8xf32> to vector<8x1xf32>
    %cst_6 = arith.constant 3.125000e-02 : f32
    %6 = vector.broadcast %cst_6 : f32 to vector<8x1xf32>
    %7 = arith.mulf %5, %6 : vector<8x1xf32>
    %8 = arith.mulf %1, %1 : vector<8x128xf32>
    %cst_7 = arith.constant dense<0.000000e+00> : vector<8xf32>
    %9 = vector.multi_reduction <add>, %8, %cst_7 [1] : vector<8x128xf32> to vector<8xf32>
    %10 = vector.shape_cast %9 : vector<8xf32> to vector<8x1xf32>
    %cst_8 = arith.constant 3.125000e-02 : f32
    %11 = vector.broadcast %cst_8 : f32 to vector<8x1xf32>
    %12 = arith.mulf %10, %11 : vector<8x1xf32>
    %13 = arith.mulf %7, %7 : vector<8x1xf32>
    %14 = arith.subf %12, %13 : vector<8x1xf32>
    %15 = vector.broadcast %7 : vector<8x1xf32> to vector<8x128xf32>
    %16 = arith.subf %1, %15 : vector<8x128xf32>
    %cst_9 = arith.constant 9.99999974E-6 : f32
    %17 = vector.broadcast %cst_9 : f32 to vector<8x1xf32>
    %18 = arith.addf %14, %17 : vector<8x1xf32>
    %19 = math.rsqrt %18 : vector<8x1xf32>
    %20 = vector.broadcast %19 : vector<8x1xf32> to vector<8x128xf32>
    %21 = arith.mulf %16, %20 : vector<8x128xf32>
    %22 = vector.broadcast %2 : vector<1x128xf32> to vector<8x128xf32>
    %23 = arith.mulf %21, %22 : vector<8x128xf32>
    %24 = vector.broadcast %3 : vector<1x128xf32> to vector<8x128xf32>
    %25 = arith.addf %23, %24 : vector<8x128xf32>
    %26 = arith.truncf %25 : vector<8x128xf32> to vector<8x128xbf16>
    %c0_10 = arith.constant 0 : index
    %c0_11 = arith.constant 0 : index
    %27 = vector.load %arg4[%c0_10, %c0_11] : memref<128x256xbf16, #tpu.memory_space<vmem>>, vector<128x256xbf16>
    %cst_12 = arith.constant dense<0.000000e+00> : vector<8x256xf32>
    %28 = tpu.matmul %26, %27, %cst_12 {dimension_numbers = #tpu.dot_dimension_numbers<[1], [0], [0], [1], [0, 0, 1, 1], [], []>} : vector<8x128xbf16>, vector<128x256xbf16>, vector<8x256xf32> -> vector<8x256xf32>
    %c0_13 = arith.constant 0 : index
    %c0_14 = arith.constant 0 : index
    %29 = vector.load %arg5[%c0_13, %c0_14] : memref<1x256xf32, #tpu.memory_space<vmem>>, vector<1x256xf32>
    %30 = vector.broadcast %29 : vector<1x256xf32> to vector<8x256xf32>
    %31 = arith.addf %28, %30 : vector<8x256xf32>
    %32 = vector.extract_strided_slice %31 {offsets = [0, 0], sizes = [8, 128], strides = [1, 1]} : vector<8x256xf32> to vector<8x128xf32>
    %33 = vector.extract_strided_slice %31 {offsets = [0, 128], sizes = [8, 128], strides = [1, 1]} : vector<8x256xf32> to vector<8x128xf32>
    %cst_15 = arith.constant 5.000000e-01 : f32
    %34 = vector.broadcast %cst_15 : f32 to vector<8x128xf32>
    %35 = arith.mulf %34, %33 : vector<8x128xf32>
    %36 = math.tanh %35 : vector<8x128xf32>
    %cst_16 = arith.constant 1.000000e+00 : f32
    %37 = vector.broadcast %cst_16 : f32 to vector<8x128xf32>
    %38 = arith.addf %36, %37 : vector<8x128xf32>
    %cst_17 = arith.constant 5.000000e-01 : f32
    %39 = vector.broadcast %cst_17 : f32 to vector<8x128xf32>
    %40 = arith.mulf %39, %38 : vector<8x128xf32>
    %41 = arith.mulf %32, %40 : vector<8x128xf32>
    %cst_18 = arith.constant 0.000000e+00 : f32
    %42 = vector.broadcast %cst_18 : f32 to vector<38x128xf32>
    %c0_19 = arith.constant 0 : index
    %c0_20 = arith.constant 0 : index
    %43 = vector.load %arg11[%c0_19, %c0_20] : memref<38x128xf32, #tpu.memory_space<vmem>>, vector<38x128xf32>
    tpu.vector_store %arg11[%c0_19, %c0_20], %42 {strides = array<i32>} : memref<38x128xf32, #tpu.memory_space<vmem>>, vector<38x128xf32>,
    %c15 = arith.constant 15 : index
    %c0_21 = arith.constant 0 : index
    %44 = vector.load %arg11[%c15, %c0_21] : memref<38x128xf32, #tpu.memory_space<vmem>>, vector<8x128xf32>
    tpu.vector_store %arg11[%c15, %c0_21], %41 {strides = array<i32>} : memref<38x128xf32, #tpu.memory_space<vmem>>, vector<8x128xf32>,
    %c0_22 = arith.constant 0 : index
    %c0_23 = arith.constant 0 : index
    %45 = vector.load %arg6[%c0_22, %c0_23] : memref<31x128xf32, #tpu.memory_space<vmem>>, vector<31x128xf32>
    %cst_24 = arith.constant 0.000000e+00 : f32
    %46 = vector.broadcast %cst_24 : f32 to vector<8x128xf32>
    %c0_25 = arith.constant 0 : index
    %c0_26 = arith.constant 0 : index
    %47 = vector.load %arg11[%c0_25, %c0_26] : memref<38x128xf32, #tpu.memory_space<vmem>>, vector<8x128xf32>
    %48 = vector.extract_strided_slice %45 {offsets = [0, 0], sizes = [1, 128], strides = [1, 1]} : vector<31x128xf32> to vector<1x128xf32>
    %49 = vector.broadcast %48 : vector<1x128xf32> to vector<8x128xf32>
    %50 = arith.mulf %47, %49 : vector<8x128xf32>
    %51 = arith.addf %46, %50 : vector<8x128xf32>
    %c1 = arith.constant 1 : index
    %c0_27 = arith.constant 0 : index
    %52 = vector.load %arg11[%c1, %c0_27] : memref<38x128xf32, #tpu.memory_space<vmem>>, vector<8x128xf32>
    %53 = vector.extract_strided_slice %45 {offsets = [1, 0], sizes = [1, 128], strides = [1, 1]} : vector<31x128xf32> to vector<1x128xf32>
    %54 = vector.broadcast %53 : vector<1x128xf32> to vector<8x128xf32>
    %55 = arith.mulf %52, %54 : vector<8x128xf32>
    %56 = arith.addf %51, %55 : vector<8x128xf32>
    %c2 = arith.constant 2 : index
    %c0_28 = arith.constant 0 : index
    %57 = vector.load %arg11[%c2, %c0_28] : memref<38x128xf32, #tpu.memory_space<vmem>>, vector<8x128xf32>
    %58 = vector.extract_strided_slice %45 {offsets = [2, 0], sizes = [1, 128], strides = [1, 1]} : vector<31x128xf32> to vector<1x128xf32>
    %59 = vector.broadcast %58 : vector<1x128xf32> to vector<8x128xf32>
    %60 = arith.mulf %57, %59 : vector<8x128xf32>
    %61 = arith.addf %56, %60 : vector<8x128xf32>
    %c3 = arith.constant 3 : index
    %c0_29 = arith.constant 0 : index
    %62 = vector.load %arg11[%c3, %c0_29] : memref<38x128xf32, #tpu.memory_space<vmem>>, vector<8x128xf32>
    %63 = vector.extract_strided_slice %45 {offsets = [3, 0], sizes = [1, 128], strides = [1, 1]} : vector<31x128xf32> to vector<1x128xf32>
    %64 = vector.broadcast %63 : vector<1x128xf32> to vector<8x128xf32>
    %65 = arith.mulf %62, %64 : vector<8x128xf32>
    %66 = arith.addf %61, %65 : vector<8x128xf32>
    %c4 = arith.constant 4 : index
    %c0_30 = arith.constant 0 : index
    %67 = vector.load %arg11[%c4, %c0_30] : memref<38x128xf32, #tpu.memory_space<vmem>>, vector<8x128xf32>
    %68 = vector.extract_strided_slice %45 {offsets = [4, 0], sizes = [1, 128], strides = [1, 1]} : vector<31x128xf32> to vector<1x128xf32>
    %69 = vector.broadcast %68 : vector<1x128xf32> to vector<8x128xf32>
    %70 = arith.mulf %67, %69 : vector<8x128xf32>
    %71 = arith.addf %66, %70 : vector<8x128xf32>
    %c5 = arith.constant 5 : index
    %c0_31 = arith.constant 0 : index
    %72 = vector.load %arg11[%c5, %c0_31] : memref<38x128xf32, #tpu.memory_space<vmem>>, vector<8x128xf32>
    %73 = vector.extract_strided_slice %45 {offsets = [5, 0], sizes = [1, 128], strides = [1, 1]} : vector<31x128xf32> to vector<1x128xf32>
    %74 = vector.broadcast %73 : vector<1x128xf32> to vector<8x128xf32>
    %75 = arith.mulf %72, %74 : vector<8x128xf32>
    %76 = arith.addf %71, %75 : vector<8x128xf32>
    %c6 = arith.constant 6 : index
    %c0_32 = arith.constant 0 : index
    %77 = vector.load %arg11[%c6, %c0_32] : memref<38x128xf32, #tpu.memory_space<vmem>>, vector<8x128xf32>
    %78 = vector.extract_strided_slice %45 {offsets = [6, 0], sizes = [1, 128], strides = [1, 1]} : vector<31x128xf32> to vector<1x128xf32>
    %79 = vector.broadcast %78 : vector<1x128xf32> to vector<8x128xf32>
    %80 = arith.mulf %77, %79 : vector<8x128xf32>
    %81 = arith.addf %76, %80 : vector<8x128xf32>
    %c7 = arith.constant 7 : index
    %c0_33 = arith.constant 0 : index
    %82 = vector.load %arg11[%c7, %c0_33] : memref<38x128xf32, #tpu.memory_space<vmem>>, vector<8x128xf32>
    %83 = vector.extract_strided_slice %45 {offsets = [7, 0], sizes = [1, 128], strides = [1, 1]} : vector<31x128xf32> to vector<1x128xf32>
    %84 = vector.broadcast %83 : vector<1x128xf32> to vector<8x128xf32>
    %85 = arith.mulf %82, %84 : vector<8x128xf32>
    %86 = arith.addf %81, %85 : vector<8x128xf32>
    %c8 = arith.constant 8 : index
    %c0_34 = arith.constant 0 : index
    %87 = vector.load %arg11[%c8, %c0_34] : memref<38x128xf32, #tpu.memory_space<vmem>>, vector<8x128xf32>
    %88 = vector.extract_strided_slice %45 {offsets = [8, 0], sizes = [1, 128], strides = [1, 1]} : vector<31x128xf32> to vector<1x128xf32>
    %89 = vector.broadcast %88 : vector<1x128xf32> to vector<8x128xf32>
    %90 = arith.mulf %87, %89 : vector<8x128xf32>
    %91 = arith.addf %86, %90 : vector<8x128xf32>
    %c9 = arith.constant 9 : index
    %c0_35 = arith.constant 0 : index
    %92 = vector.load %arg11[%c9, %c0_35] : memref<38x128xf32, #tpu.memory_space<vmem>>, vector<8x128xf32>
    %93 = vector.extract_strided_slice %45 {offsets = [9, 0], sizes = [1, 128], strides = [1, 1]} : vector<31x128xf32> to vector<1x128xf32>
    %94 = vector.broadcast %93 : vector<1x128xf32> to vector<8x128xf32>
    %95 = arith.mulf %92, %94 : vector<8x128xf32>
    %96 = arith.addf %91, %95 : vector<8x128xf32>
    %c10 = arith.constant 10 : index
    %c0_36 = arith.constant 0 : index
    %97 = vector.load %arg11[%c10, %c0_36] : memref<38x128xf32, #tpu.memory_space<vmem>>, vector<8x128xf32>
    %98 = vector.extract_strided_slice %45 {offsets = [10, 0], sizes = [1, 128], strides = [1, 1]} : vector<31x128xf32> to vector<1x128xf32>
    %99 = vector.broadcast %98 : vector<1x128xf32> to vector<8x128xf32>
    %100 = arith.mulf %97, %99 : vector<8x128xf32>
    %101 = arith.addf %96, %100 : vector<8x128xf32>
    %c11 = arith.constant 11 : index
    %c0_37 = arith.constant 0 : index
    %102 = vector.load %arg11[%c11, %c0_37] : memref<38x128xf32, #tpu.memory_space<vmem>>, vector<8x128xf32>
    %103 = vector.extract_strided_slice %45 {offsets = [11, 0], sizes = [1, 128], strides = [1, 1]} : vector<31x128xf32> to vector<1x128xf32>
    %104 = vector.broadcast %103 : vector<1x128xf32> to vector<8x128xf32>
    %105 = arith.mulf %102, %104 : vector<8x128xf32>
    %106 = arith.addf %101, %105 : vector<8x128xf32>
    %c12 = arith.constant 12 : index
    %c0_38 = arith.constant 0 : index
    %107 = vector.load %arg11[%c12, %c0_38] : memref<38x128xf32, #tpu.memory_space<vmem>>, vector<8x128xf32>
    %108 = vector.extract_strided_slice %45 {offsets = [12, 0], sizes = [1, 128], strides = [1, 1]} : vector<31x128xf32> to vector<1x128xf32>
    %109 = vector.broadcast %108 : vector<1x128xf32> to vector<8x128xf32>
    %110 = arith.mulf %107, %109 : vector<8x128xf32>
    %111 = arith.addf %106, %110 : vector<8x128xf32>
    %c13 = arith.constant 13 : index
    %c0_39 = arith.constant 0 : index
    %112 = vector.load %arg11[%c13, %c0_39] : memref<38x128xf32, #tpu.memory_space<vmem>>, vector<8x128xf32>
    %113 = vector.extract_strided_slice %45 {offsets = [13, 0], sizes = [1, 128], strides = [1, 1]} : vector<31x128xf32> to vector<1x128xf32>
    %114 = vector.broadcast %113 : vector<1x128xf32> to vector<8x128xf32>
    %115 = arith.mulf %112, %114 : vector<8x128xf32>
    %116 = arith.addf %111, %115 : vector<8x128xf32>
    %c14 = arith.constant 14 : index
    %c0_40 = arith.constant 0 : index
    %117 = vector.load %arg11[%c14, %c0_40] : memref<38x128xf32, #tpu.memory_space<vmem>>, vector<8x128xf32>
    %118 = vector.extract_strided_slice %45 {offsets = [14, 0], sizes = [1, 128], strides = [1, 1]} : vector<31x128xf32> to vector<1x128xf32>
    %119 = vector.broadcast %118 : vector<1x128xf32> to vector<8x128xf32>
    %120 = arith.mulf %117, %119 : vector<8x128xf32>
    %121 = arith.addf %116, %120 : vector<8x128xf32>
    %c15_41 = arith.constant 15 : index
    %c0_42 = arith.constant 0 : index
    %122 = vector.load %arg11[%c15_41, %c0_42] : memref<38x128xf32, #tpu.memory_space<vmem>>, vector<8x128xf32>
    %123 = vector.extract_strided_slice %45 {offsets = [15, 0], sizes = [1, 128], strides = [1, 1]} : vector<31x128xf32> to vector<1x128xf32>
    %124 = vector.broadcast %123 : vector<1x128xf32> to vector<8x128xf32>
    %125 = arith.mulf %122, %124 : vector<8x128xf32>
    %126 = arith.addf %121, %125 : vector<8x128xf32>
    %c16 = arith.constant 16 : index
    %c0_43 = arith.constant 0 : index
    %127 = vector.load %arg11[%c16, %c0_43] : memref<38x128xf32, #tpu.memory_space<vmem>>, vector<8x128xf32>
    %128 = vector.extract_strided_slice %45 {offsets = [16, 0], sizes = [1, 128], strides = [1, 1]} : vector<31x128xf32> to vector<1x128xf32>
    %129 = vector.broadcast %128 : vector<1x128xf32> to vector<8x128xf32>
    %130 = arith.mulf %127, %129 : vector<8x128xf32>
    %131 = arith.addf %126, %130 : vector<8x128xf32>
    %c17 = arith.constant 17 : index
    %c0_44 = arith.constant 0 : index
    %132 = vector.load %arg11[%c17, %c0_44] : memref<38x128xf32, #tpu.memory_space<vmem>>, vector<8x128xf32>
    %133 = vector.extract_strided_slice %45 {offsets = [17, 0], sizes = [1, 128], strides = [1, 1]} : vector<31x128xf32> to vector<1x128xf32>
    %134 = vector.broadcast %133 : vector<1x128xf32> to vector<8x128xf32>
    %135 = arith.mulf %132, %134 : vector<8x128xf32>
    %136 = arith.addf %131, %135 : vector<8x128xf32>
    %c18 = arith.constant 18 : index
    %c0_45 = arith.constant 0 : index
    %137 = vector.load %arg11[%c18, %c0_45] : memref<38x128xf32, #tpu.memory_space<vmem>>, vector<8x128xf32>
    %138 = vector.extract_strided_slice %45 {offsets = [18, 0], sizes = [1, 128], strides = [1, 1]} : vector<31x128xf32> to vector<1x128xf32>
    %139 = vector.broadcast %138 : vector<1x128xf32> to vector<8x128xf32>
    %140 = arith.mulf %137, %139 : vector<8x128xf32>
    %141 = arith.addf %136, %140 : vector<8x128xf32>
    %c19 = arith.constant 19 : index
    %c0_46 = arith.constant 0 : index
    %142 = vector.load %arg11[%c19, %c0_46] : memref<38x128xf32, #tpu.memory_space<vmem>>, vector<8x128xf32>
    %143 = vector.extract_strided_slice %45 {offsets = [19, 0], sizes = [1, 128], strides = [1, 1]} : vector<31x128xf32> to vector<1x128xf32>
    %144 = vector.broadcast %143 : vector<1x128xf32> to vector<8x128xf32>
    %145 = arith.mulf %142, %144 : vector<8x128xf32>
    %146 = arith.addf %141, %145 : vector<8x128xf32>
    %c20 = arith.constant 20 : index
    %c0_47 = arith.constant 0 : index
    %147 = vector.load %arg11[%c20, %c0_47] : memref<38x128xf32, #tpu.memory_space<vmem>>, vector<8x128xf32>
    %148 = vector.extract_strided_slice %45 {offsets = [20, 0], sizes = [1, 128], strides = [1, 1]} : vector<31x128xf32> to vector<1x128xf32>
    %149 = vector.broadcast %148 : vector<1x128xf32> to vector<8x128xf32>
    %150 = arith.mulf %147, %149 : vector<8x128xf32>
    %151 = arith.addf %146, %150 : vector<8x128xf32>
    %c21 = arith.constant 21 : index
    %c0_48 = arith.constant 0 : index
    %152 = vector.load %arg11[%c21, %c0_48] : memref<38x128xf32, #tpu.memory_space<vmem>>, vector<8x128xf32>
    %153 = vector.extract_strided_slice %45 {offsets = [21, 0], sizes = [1, 128], strides = [1, 1]} : vector<31x128xf32> to vector<1x128xf32>
    %154 = vector.broadcast %153 : vector<1x128xf32> to vector<8x128xf32>
    %155 = arith.mulf %152, %154 : vector<8x128xf32>
    %156 = arith.addf %151, %155 : vector<8x128xf32>
    %c22 = arith.constant 22 : index
    %c0_49 = arith.constant 0 : index
    %157 = vector.load %arg11[%c22, %c0_49] : memref<38x128xf32, #tpu.memory_space<vmem>>, vector<8x128xf32>
    %158 = vector.extract_strided_slice %45 {offsets = [22, 0], sizes = [1, 128], strides = [1, 1]} : vector<31x128xf32> to vector<1x128xf32>
    %159 = vector.broadcast %158 : vector<1x128xf32> to vector<8x128xf32>
    %160 = arith.mulf %157, %159 : vector<8x128xf32>
    %161 = arith.addf %156, %160 : vector<8x128xf32>
    %c23 = arith.constant 23 : index
    %c0_50 = arith.constant 0 : index
    %162 = vector.load %arg11[%c23, %c0_50] : memref<38x128xf32, #tpu.memory_space<vmem>>, vector<8x128xf32>
    %163 = vector.extract_strided_slice %45 {offsets = [23, 0], sizes = [1, 128], strides = [1, 1]} : vector<31x128xf32> to vector<1x128xf32>
    %164 = vector.broadcast %163 : vector<1x128xf32> to vector<8x128xf32>
    %165 = arith.mulf %162, %164 : vector<8x128xf32>
    %166 = arith.addf %161, %165 : vector<8x128xf32>
    %c24 = arith.constant 24 : index
    %c0_51 = arith.constant 0 : index
    %167 = vector.load %arg11[%c24, %c0_51] : memref<38x128xf32, #tpu.memory_space<vmem>>, vector<8x128xf32>
    %168 = vector.extract_strided_slice %45 {offsets = [24, 0], sizes = [1, 128], strides = [1, 1]} : vector<31x128xf32> to vector<1x128xf32>
    %169 = vector.broadcast %168 : vector<1x128xf32> to vector<8x128xf32>
    %170 = arith.mulf %167, %169 : vector<8x128xf32>
    %171 = arith.addf %166, %170 : vector<8x128xf32>
    %c25 = arith.constant 25 : index
    %c0_52 = arith.constant 0 : index
    %172 = vector.load %arg11[%c25, %c0_52] : memref<38x128xf32, #tpu.memory_space<vmem>>, vector<8x128xf32>
    %173 = vector.extract_strided_slice %45 {offsets = [25, 0], sizes = [1, 128], strides = [1, 1]} : vector<31x128xf32> to vector<1x128xf32>
    %174 = vector.broadcast %173 : vector<1x128xf32> to vector<8x128xf32>
    %175 = arith.mulf %172, %174 : vector<8x128xf32>
    %176 = arith.addf %171, %175 : vector<8x128xf32>
    %c26 = arith.constant 26 : index
    %c0_53 = arith.constant 0 : index
    %177 = vector.load %arg11[%c26, %c0_53] : memref<38x128xf32, #tpu.memory_space<vmem>>, vector<8x128xf32>
    %178 = vector.extract_strided_slice %45 {offsets = [26, 0], sizes = [1, 128], strides = [1, 1]} : vector<31x128xf32> to vector<1x128xf32>
    %179 = vector.broadcast %178 : vector<1x128xf32> to vector<8x128xf32>
    %180 = arith.mulf %177, %179 : vector<8x128xf32>
    %181 = arith.addf %176, %180 : vector<8x128xf32>
    %c27 = arith.constant 27 : index
    %c0_54 = arith.constant 0 : index
    %182 = vector.load %arg11[%c27, %c0_54] : memref<38x128xf32, #tpu.memory_space<vmem>>, vector<8x128xf32>
    %183 = vector.extract_strided_slice %45 {offsets = [27, 0], sizes = [1, 128], strides = [1, 1]} : vector<31x128xf32> to vector<1x128xf32>
    %184 = vector.broadcast %183 : vector<1x128xf32> to vector<8x128xf32>
    %185 = arith.mulf %182, %184 : vector<8x128xf32>
    %186 = arith.addf %181, %185 : vector<8x128xf32>
    %c28 = arith.constant 28 : index
    %c0_55 = arith.constant 0 : index
    %187 = vector.load %arg11[%c28, %c0_55] : memref<38x128xf32, #tpu.memory_space<vmem>>, vector<8x128xf32>
    %188 = vector.extract_strided_slice %45 {offsets = [28, 0], sizes = [1, 128], strides = [1, 1]} : vector<31x128xf32> to vector<1x128xf32>
    %189 = vector.broadcast %188 : vector<1x128xf32> to vector<8x128xf32>
    %190 = arith.mulf %187, %189 : vector<8x128xf32>
    %191 = arith.addf %186, %190 : vector<8x128xf32>
    %c29 = arith.constant 29 : index
    %c0_56 = arith.constant 0 : index
    %192 = vector.load %arg11[%c29, %c0_56] : memref<38x128xf32, #tpu.memory_space<vmem>>, vector<8x128xf32>
    %193 = vector.extract_strided_slice %45 {offsets = [29, 0], sizes = [1, 128], strides = [1, 1]} : vector<31x128xf32> to vector<1x128xf32>
    %194 = vector.broadcast %193 : vector<1x128xf32> to vector<8x128xf32>
    %195 = arith.mulf %192, %194 : vector<8x128xf32>
    %196 = arith.addf %191, %195 : vector<8x128xf32>
    %c30 = arith.constant 30 : index
    %c0_57 = arith.constant 0 : index
    %197 = vector.load %arg11[%c30, %c0_57] : memref<38x128xf32, #tpu.memory_space<vmem>>, vector<8x128xf32>
    %198 = vector.extract_strided_slice %45 {offsets = [30, 0], sizes = [1, 128], strides = [1, 1]} : vector<31x128xf32> to vector<1x128xf32>
    %199 = vector.broadcast %198 : vector<1x128xf32> to vector<8x128xf32>
    %200 = arith.mulf %197, %199 : vector<8x128xf32>
    %201 = arith.addf %196, %200 : vector<8x128xf32>
    %c0_58 = arith.constant 0 : index
    %c0_59 = arith.constant 0 : index
    %202 = vector.load %arg7[%c0_58, %c0_59] : memref<1x128xf32, #tpu.memory_space<vmem>>, vector<1x128xf32>
    %203 = vector.broadcast %202 : vector<1x128xf32> to vector<8x128xf32>
    %204 = arith.addf %201, %203 : vector<8x128xf32>
    %cst_60 = arith.constant 5.000000e-01 : f32
    %205 = vector.broadcast %cst_60 : f32 to vector<8x128xf32>
    %206 = arith.mulf %205, %204 : vector<8x128xf32>
    %207 = math.tanh %206 : vector<8x128xf32>
    %cst_61 = arith.constant 1.000000e+00 : f32
    %208 = vector.broadcast %cst_61 : f32 to vector<8x128xf32>
    %209 = arith.addf %207, %208 : vector<8x128xf32>
    %cst_62 = arith.constant 5.000000e-01 : f32
    %210 = vector.broadcast %cst_62 : f32 to vector<8x128xf32>
    %211 = arith.mulf %210, %209 : vector<8x128xf32>
    %212 = arith.mulf %204, %211 : vector<8x128xf32>
    %213 = arith.truncf %212 : vector<8x128xf32> to vector<8x128xbf16>
    %c0_63 = arith.constant 0 : index
    %c0_64 = arith.constant 0 : index
    %214 = vector.load %arg8[%c0_63, %c0_64] : memref<128x128xbf16, #tpu.memory_space<vmem>>, vector<128x128xbf16>
    %cst_65 = arith.constant dense<0.000000e+00> : vector<8x128xf32>
    %215 = tpu.matmul %213, %214, %cst_65 {dimension_numbers = #tpu.dot_dimension_numbers<[1], [0], [0], [1], [0, 0, 1, 1], [], []>} : vector<8x128xbf16>, vector<128x128xbf16>, vector<8x128xf32> -> vector<8x128xf32>
    %c0_66 = arith.constant 0 : index
    %c0_67 = arith.constant 0 : index
    %216 = vector.load %arg9[%c0_66, %c0_67] : memref<1x128xf32, #tpu.memory_space<vmem>>, vector<1x128xf32>
    %217 = vector.broadcast %216 : vector<1x128xf32> to vector<8x128xf32>
    %218 = arith.addf %215, %217 : vector<8x128xf32>
    %219 = arith.addf %1, %218 : vector<8x128xf32>
    %c0_68 = arith.constant 0 : index
    %c0_69 = arith.constant 0 : index
    %c0_70 = arith.constant 0 : index
    %220 = vector.load %arg10[%c0_68, %c0_69, %c0_70] : memref<1x8x128xf32, #tpu.memory_space<vmem>>, vector<1x8x128xf32>
    %221 = vector.shape_cast %220 : vector<1x8x128xf32> to vector<8x128xf32>
    %222 = vector.shape_cast %219 : vector<8x128xf32> to vector<1x8x128xf32>
    tpu.vector_store %arg10[%c0_68, %c0_69, %c0_70], %222 {strides = array<i32>} : memref<1x8x128xf32, #tpu.memory_space<vmem>>, vector<1x8x128xf32>,
    return
  }
  func.func @transform_0(%arg0: i32) -> (i32, i32, i32) {
    %c0_i32 = arith.constant 0 : i32
    %c0_i32_0 = arith.constant 0 : i32
    %c0_i32_1 = arith.constant 0 : i32
    return %arg0, %c0_i32, %c0_i32_0 : i32, i32, i32
  }
  func.func @transform_1(%arg0: i32) -> (i32, i32) {
    %c0_i32 = arith.constant 0 : i32
    %c0_i32_0 = arith.constant 0 : i32
    %c0_i32_1 = arith.constant 0 : i32
    return %c0_i32, %c0_i32_0 : i32, i32
  }
  func.func @transform_2(%arg0: i32) -> (i32, i32) {
    %c0_i32 = arith.constant 0 : i32
    %c0_i32_0 = arith.constant 0 : i32
    %c0_i32_1 = arith.constant 0 : i32
    return %c0_i32, %c0_i32_0 : i32, i32
  }
  func.func @transform_3(%arg0: i32) -> (i32, i32) {
    %c0_i32 = arith.constant 0 : i32
    %c0_i32_0 = arith.constant 0 : i32
    %c0_i32_1 = arith.constant 0 : i32
    return %c0_i32, %c0_i32_0 : i32, i32
  }
  func.func @transform_4(%arg0: i32) -> (i32, i32) {
    %c0_i32 = arith.constant 0 : i32
    %c0_i32_0 = arith.constant 0 : i32
    %c0_i32_1 = arith.constant 0 : i32
    return %c0_i32, %c0_i32_0 : i32, i32
  }
  func.func @transform_5(%arg0: i32) -> (i32, i32) {
    %c0_i32 = arith.constant 0 : i32
    %c0_i32_0 = arith.constant 0 : i32
    %c0_i32_1 = arith.constant 0 : i32
    return %c0_i32, %c0_i32_0 : i32, i32
  }
  func.func @transform_6(%arg0: i32) -> (i32, i32) {
    %c0_i32 = arith.constant 0 : i32
    %c0_i32_0 = arith.constant 0 : i32
    %c0_i32_1 = arith.constant 0 : i32
    return %c0_i32, %c0_i32_0 : i32, i32
  }
  func.func @transform_7(%arg0: i32) -> (i32, i32) {
    %c0_i32 = arith.constant 0 : i32
    %c0_i32_0 = arith.constant 0 : i32
    %c0_i32_1 = arith.constant 0 : i32
    return %c0_i32, %c0_i32_0 : i32, i32
  }
  func.func @transform_8(%arg0: i32) -> (i32, i32) {
    %c0_i32 = arith.constant 0 : i32
    %c0_i32_0 = arith.constant 0 : i32
    %c0_i32_1 = arith.constant 0 : i32
    return %c0_i32, %c0_i32_0 : i32, i32
  }
  func.func @transform_9(%arg0: i32) -> (i32, i32, i32) {
    %c0_i32 = arith.constant 0 : i32
    %c0_i32_0 = arith.constant 0 : i32
    %c0_i32_1 = arith.constant 0 : i32
    return %arg0, %c0_i32, %c0_i32_0 : i32, i32, i32
  }
}

module attributes {stable_mosaic.version = 11 : i64} {
  func.func @_ffn_block_kernel(%arg0: i32, %arg1: memref<16x128xf32, #tpu.memory_space<vmem>>, %arg2: memref<1x128xf32, #tpu.memory_space<vmem>>, %arg3: memref<1x128xf32, #tpu.memory_space<vmem>>, %arg4: memref<128x128xbf16, #tpu.memory_space<vmem>>, %arg5: memref<1x128xf32, #tpu.memory_space<vmem>>, %arg6: memref<128x128xbf16, #tpu.memory_space<vmem>>, %arg7: memref<1x128xf32, #tpu.memory_space<vmem>>, %arg8: memref<1x128xf32, #tpu.memory_space<vmem>>, %arg9: memref<1x128xf32, #tpu.memory_space<vmem>>, %arg10: memref<16x128xf32, #tpu.memory_space<vmem>>) attributes {dimension_semantics = [#tpu.dimension_semantics<parallel>], iteration_bounds = array<i64: 1>, scalar_prefetch = 0 : i64, scratch_operands = 0 : i64, tpu.core_type = #tpu.core_type<tc>, window_params = [{transform_indices = @transform_0, window_bounds = array<i64: 16, 128>}, {pipeline_mode = #tpu.pipeline_mode<synchronous>, transform_indices = @transform_1, window_bounds = array<i64: 1, 128>}, {pipeline_mode = #tpu.pipeline_mode<synchronous>, transform_indices = @transform_2, window_bounds = array<i64: 1, 128>}, {pipeline_mode = #tpu.pipeline_mode<synchronous>, transform_indices = @transform_3, window_bounds = array<i64: 128, 128>}, {pipeline_mode = #tpu.pipeline_mode<synchronous>, transform_indices = @transform_4, window_bounds = array<i64: 1, 128>}, {pipeline_mode = #tpu.pipeline_mode<synchronous>, transform_indices = @transform_5, window_bounds = array<i64: 128, 128>}, {pipeline_mode = #tpu.pipeline_mode<synchronous>, transform_indices = @transform_6, window_bounds = array<i64: 1, 128>}, {pipeline_mode = #tpu.pipeline_mode<synchronous>, transform_indices = @transform_7, window_bounds = array<i64: 1, 128>}, {pipeline_mode = #tpu.pipeline_mode<synchronous>, transform_indices = @transform_8, window_bounds = array<i64: 1, 128>}, {transform_indices = @transform_9, window_bounds = array<i64: 16, 128>}]} {
    %c0 = arith.constant 0 : index
    %c0_0 = arith.constant 0 : index
    %0 = vector.load %arg1[%c0, %c0_0] : memref<16x128xf32, #tpu.memory_space<vmem>>, vector<16x128xf32>
    %c0_1 = arith.constant 0 : index
    %c0_2 = arith.constant 0 : index
    %1 = vector.load %arg2[%c0_1, %c0_2] : memref<1x128xf32, #tpu.memory_space<vmem>>, vector<1x128xf32>
    %c0_3 = arith.constant 0 : index
    %c0_4 = arith.constant 0 : index
    %2 = vector.load %arg3[%c0_3, %c0_4] : memref<1x128xf32, #tpu.memory_space<vmem>>, vector<1x128xf32>
    %cst = arith.constant dense<0.000000e+00> : vector<16xf32>
    %3 = vector.multi_reduction <add>, %0, %cst [1] : vector<16x128xf32> to vector<16xf32>
    %4 = vector.shape_cast %3 : vector<16xf32> to vector<16x1xf32>
    %cst_5 = arith.constant 3.125000e-02 : f32
    %5 = vector.broadcast %cst_5 : f32 to vector<16x1xf32>
    %6 = arith.mulf %4, %5 : vector<16x1xf32>
    %7 = arith.mulf %0, %0 : vector<16x128xf32>
    %cst_6 = arith.constant dense<0.000000e+00> : vector<16xf32>
    %8 = vector.multi_reduction <add>, %7, %cst_6 [1] : vector<16x128xf32> to vector<16xf32>
    %9 = vector.shape_cast %8 : vector<16xf32> to vector<16x1xf32>
    %cst_7 = arith.constant 3.125000e-02 : f32
    %10 = vector.broadcast %cst_7 : f32 to vector<16x1xf32>
    %11 = arith.mulf %9, %10 : vector<16x1xf32>
    %12 = arith.mulf %6, %6 : vector<16x1xf32>
    %13 = arith.subf %11, %12 : vector<16x1xf32>
    %14 = vector.broadcast %6 : vector<16x1xf32> to vector<16x128xf32>
    %15 = arith.subf %0, %14 : vector<16x128xf32>
    %cst_8 = arith.constant 9.99999974E-6 : f32
    %16 = vector.broadcast %cst_8 : f32 to vector<16x1xf32>
    %17 = arith.addf %13, %16 : vector<16x1xf32>
    %18 = math.rsqrt %17 : vector<16x1xf32>
    %19 = vector.broadcast %18 : vector<16x1xf32> to vector<16x128xf32>
    %20 = arith.mulf %15, %19 : vector<16x128xf32>
    %21 = vector.broadcast %1 : vector<1x128xf32> to vector<16x128xf32>
    %22 = arith.mulf %20, %21 : vector<16x128xf32>
    %23 = vector.broadcast %2 : vector<1x128xf32> to vector<16x128xf32>
    %24 = arith.addf %22, %23 : vector<16x128xf32>
    %25 = arith.truncf %24 : vector<16x128xf32> to vector<16x128xbf16>
    %c0_9 = arith.constant 0 : index
    %c0_10 = arith.constant 0 : index
    %26 = vector.load %arg4[%c0_9, %c0_10] : memref<128x128xbf16, #tpu.memory_space<vmem>>, vector<128x128xbf16>
    %cst_11 = arith.constant dense<0.000000e+00> : vector<16x128xf32>
    %27 = tpu.matmul %25, %26, %cst_11 {dimension_numbers = #tpu.dot_dimension_numbers<[1], [0], [0], [1], [0, 0, 1, 1], [], []>} : vector<16x128xbf16>, vector<128x128xbf16>, vector<16x128xf32> -> vector<16x128xf32>
    %c0_12 = arith.constant 0 : index
    %c0_13 = arith.constant 0 : index
    %28 = vector.load %arg5[%c0_12, %c0_13] : memref<1x128xf32, #tpu.memory_space<vmem>>, vector<1x128xf32>
    %29 = vector.broadcast %28 : vector<1x128xf32> to vector<16x128xf32>
    %30 = arith.addf %27, %29 : vector<16x128xf32>
    %cst_14 = arith.constant 5.000000e-01 : f32
    %31 = vector.broadcast %cst_14 : f32 to vector<16x128xf32>
    %32 = arith.mulf %31, %30 : vector<16x128xf32>
    %33 = math.tanh %32 : vector<16x128xf32>
    %cst_15 = arith.constant 1.000000e+00 : f32
    %34 = vector.broadcast %cst_15 : f32 to vector<16x128xf32>
    %35 = arith.addf %33, %34 : vector<16x128xf32>
    %cst_16 = arith.constant 5.000000e-01 : f32
    %36 = vector.broadcast %cst_16 : f32 to vector<16x128xf32>
    %37 = arith.mulf %36, %35 : vector<16x128xf32>
    %38 = arith.mulf %30, %37 : vector<16x128xf32>
    %39 = arith.truncf %38 : vector<16x128xf32> to vector<16x128xbf16>
    %c0_17 = arith.constant 0 : index
    %c0_18 = arith.constant 0 : index
    %40 = vector.load %arg6[%c0_17, %c0_18] : memref<128x128xbf16, #tpu.memory_space<vmem>>, vector<128x128xbf16>
    %cst_19 = arith.constant dense<0.000000e+00> : vector<16x128xf32>
    %41 = tpu.matmul %39, %40, %cst_19 {dimension_numbers = #tpu.dot_dimension_numbers<[1], [0], [0], [1], [0, 0, 1, 1], [], []>} : vector<16x128xbf16>, vector<128x128xbf16>, vector<16x128xf32> -> vector<16x128xf32>
    %c0_20 = arith.constant 0 : index
    %c0_21 = arith.constant 0 : index
    %42 = vector.load %arg7[%c0_20, %c0_21] : memref<1x128xf32, #tpu.memory_space<vmem>>, vector<1x128xf32>
    %43 = vector.broadcast %42 : vector<1x128xf32> to vector<16x128xf32>
    %44 = arith.addf %41, %43 : vector<16x128xf32>
    %cst_22 = arith.constant 5.000000e-01 : f32
    %45 = vector.broadcast %cst_22 : f32 to vector<16x128xf32>
    %46 = arith.mulf %45, %44 : vector<16x128xf32>
    %47 = arith.addf %0, %46 : vector<16x128xf32>
    %c0_23 = arith.constant 0 : index
    %c0_24 = arith.constant 0 : index
    %48 = vector.load %arg8[%c0_23, %c0_24] : memref<1x128xf32, #tpu.memory_space<vmem>>, vector<1x128xf32>
    %c0_25 = arith.constant 0 : index
    %c0_26 = arith.constant 0 : index
    %49 = vector.load %arg9[%c0_25, %c0_26] : memref<1x128xf32, #tpu.memory_space<vmem>>, vector<1x128xf32>
    %cst_27 = arith.constant dense<0.000000e+00> : vector<16xf32>
    %50 = vector.multi_reduction <add>, %47, %cst_27 [1] : vector<16x128xf32> to vector<16xf32>
    %51 = vector.shape_cast %50 : vector<16xf32> to vector<16x1xf32>
    %cst_28 = arith.constant 3.125000e-02 : f32
    %52 = vector.broadcast %cst_28 : f32 to vector<16x1xf32>
    %53 = arith.mulf %51, %52 : vector<16x1xf32>
    %54 = arith.mulf %47, %47 : vector<16x128xf32>
    %cst_29 = arith.constant dense<0.000000e+00> : vector<16xf32>
    %55 = vector.multi_reduction <add>, %54, %cst_29 [1] : vector<16x128xf32> to vector<16xf32>
    %56 = vector.shape_cast %55 : vector<16xf32> to vector<16x1xf32>
    %cst_30 = arith.constant 3.125000e-02 : f32
    %57 = vector.broadcast %cst_30 : f32 to vector<16x1xf32>
    %58 = arith.mulf %56, %57 : vector<16x1xf32>
    %59 = arith.mulf %53, %53 : vector<16x1xf32>
    %60 = arith.subf %58, %59 : vector<16x1xf32>
    %61 = vector.broadcast %53 : vector<16x1xf32> to vector<16x128xf32>
    %62 = arith.subf %47, %61 : vector<16x128xf32>
    %cst_31 = arith.constant 9.99999974E-6 : f32
    %63 = vector.broadcast %cst_31 : f32 to vector<16x1xf32>
    %64 = arith.addf %60, %63 : vector<16x1xf32>
    %65 = math.rsqrt %64 : vector<16x1xf32>
    %66 = vector.broadcast %65 : vector<16x1xf32> to vector<16x128xf32>
    %67 = arith.mulf %62, %66 : vector<16x128xf32>
    %68 = vector.broadcast %48 : vector<1x128xf32> to vector<16x128xf32>
    %69 = arith.mulf %67, %68 : vector<16x128xf32>
    %70 = vector.broadcast %49 : vector<1x128xf32> to vector<16x128xf32>
    %71 = arith.addf %69, %70 : vector<16x128xf32>
    %c0_32 = arith.constant 0 : index
    %c0_33 = arith.constant 0 : index
    %72 = vector.load %arg10[%c0_32, %c0_33] : memref<16x128xf32, #tpu.memory_space<vmem>>, vector<16x128xf32>
    tpu.vector_store %arg10[%c0_32, %c0_33], %71 {strides = array<i32>} : memref<16x128xf32, #tpu.memory_space<vmem>>, vector<16x128xf32>,
    return
  }
  func.func @transform_0(%arg0: i32) -> (i32, i32) {
    %c0_i32 = arith.constant 0 : i32
    %c0_i32_0 = arith.constant 0 : i32
    return %arg0, %c0_i32 : i32, i32
  }
  func.func @transform_1(%arg0: i32) -> (i32, i32) {
    %c0_i32 = arith.constant 0 : i32
    %c0_i32_0 = arith.constant 0 : i32
    %c0_i32_1 = arith.constant 0 : i32
    return %c0_i32, %c0_i32_0 : i32, i32
  }
  func.func @transform_2(%arg0: i32) -> (i32, i32) {
    %c0_i32 = arith.constant 0 : i32
    %c0_i32_0 = arith.constant 0 : i32
    %c0_i32_1 = arith.constant 0 : i32
    return %c0_i32, %c0_i32_0 : i32, i32
  }
  func.func @transform_3(%arg0: i32) -> (i32, i32) {
    %c0_i32 = arith.constant 0 : i32
    %c0_i32_0 = arith.constant 0 : i32
    %c0_i32_1 = arith.constant 0 : i32
    return %c0_i32, %c0_i32_0 : i32, i32
  }
  func.func @transform_4(%arg0: i32) -> (i32, i32) {
    %c0_i32 = arith.constant 0 : i32
    %c0_i32_0 = arith.constant 0 : i32
    %c0_i32_1 = arith.constant 0 : i32
    return %c0_i32, %c0_i32_0 : i32, i32
  }
  func.func @transform_5(%arg0: i32) -> (i32, i32) {
    %c0_i32 = arith.constant 0 : i32
    %c0_i32_0 = arith.constant 0 : i32
    %c0_i32_1 = arith.constant 0 : i32
    return %c0_i32, %c0_i32_0 : i32, i32
  }
  func.func @transform_6(%arg0: i32) -> (i32, i32) {
    %c0_i32 = arith.constant 0 : i32
    %c0_i32_0 = arith.constant 0 : i32
    %c0_i32_1 = arith.constant 0 : i32
    return %c0_i32, %c0_i32_0 : i32, i32
  }
  func.func @transform_7(%arg0: i32) -> (i32, i32) {
    %c0_i32 = arith.constant 0 : i32
    %c0_i32_0 = arith.constant 0 : i32
    %c0_i32_1 = arith.constant 0 : i32
    return %c0_i32, %c0_i32_0 : i32, i32
  }
  func.func @transform_8(%arg0: i32) -> (i32, i32) {
    %c0_i32 = arith.constant 0 : i32
    %c0_i32_0 = arith.constant 0 : i32
    %c0_i32_1 = arith.constant 0 : i32
    return %c0_i32, %c0_i32_0 : i32, i32
  }
  func.func @transform_9(%arg0: i32) -> (i32, i32) {
    %c0_i32 = arith.constant 0 : i32
    %c0_i32_0 = arith.constant 0 : i32
    return %arg0, %c0_i32 : i32, i32
  }
}

module attributes {stable_mosaic.version = 11 : i64} {
  func.func @_linear_kernel(%arg0: i32, %arg1: memref<16x128xf32, #tpu.memory_space<vmem>>, %arg2: memref<128x128xbf16, #tpu.memory_space<vmem>>, %arg3: memref<1x128xf32, #tpu.memory_space<vmem>>, %arg4: memref<16x128xf32, #tpu.memory_space<vmem>>) attributes {dimension_semantics = [#tpu.dimension_semantics<parallel>], iteration_bounds = array<i64: 1>, scalar_prefetch = 0 : i64, scratch_operands = 0 : i64, tpu.core_type = #tpu.core_type<tc>, window_params = [{transform_indices = @transform_0, window_bounds = array<i64: 16, 128>}, {pipeline_mode = #tpu.pipeline_mode<synchronous>, transform_indices = @transform_1, window_bounds = array<i64: 128, 128>}, {pipeline_mode = #tpu.pipeline_mode<synchronous>, transform_indices = @transform_2, window_bounds = array<i64: 1, 128>}, {transform_indices = @transform_3, window_bounds = array<i64: 16, 128>}]} {
    %c0 = arith.constant 0 : index
    %c0_0 = arith.constant 0 : index
    %0 = vector.load %arg1[%c0, %c0_0] : memref<16x128xf32, #tpu.memory_space<vmem>>, vector<16x128xf32>
    %1 = arith.truncf %0 : vector<16x128xf32> to vector<16x128xbf16>
    %c0_1 = arith.constant 0 : index
    %c0_2 = arith.constant 0 : index
    %2 = vector.load %arg2[%c0_1, %c0_2] : memref<128x128xbf16, #tpu.memory_space<vmem>>, vector<128x128xbf16>
    %cst = arith.constant dense<0.000000e+00> : vector<16x128xf32>
    %3 = tpu.matmul %1, %2, %cst {dimension_numbers = #tpu.dot_dimension_numbers<[1], [0], [0], [1], [0, 0, 1, 1], [], []>} : vector<16x128xbf16>, vector<128x128xbf16>, vector<16x128xf32> -> vector<16x128xf32>
    %c0_3 = arith.constant 0 : index
    %c0_4 = arith.constant 0 : index
    %4 = vector.load %arg3[%c0_3, %c0_4] : memref<1x128xf32, #tpu.memory_space<vmem>>, vector<1x128xf32>
    %5 = vector.broadcast %4 : vector<1x128xf32> to vector<16x128xf32>
    %6 = arith.addf %3, %5 : vector<16x128xf32>
    %c0_5 = arith.constant 0 : index
    %c0_6 = arith.constant 0 : index
    %7 = vector.load %arg4[%c0_5, %c0_6] : memref<16x128xf32, #tpu.memory_space<vmem>>, vector<16x128xf32>
    tpu.vector_store %arg4[%c0_5, %c0_6], %6 {strides = array<i32>} : memref<16x128xf32, #tpu.memory_space<vmem>>, vector<16x128xf32>,
    return
  }
  func.func @transform_0(%arg0: i32) -> (i32, i32) {
    %c0_i32 = arith.constant 0 : i32
    %c0_i32_0 = arith.constant 0 : i32
    return %arg0, %c0_i32 : i32, i32
  }
  func.func @transform_1(%arg0: i32) -> (i32, i32) {
    %c0_i32 = arith.constant 0 : i32
    %c0_i32_0 = arith.constant 0 : i32
    %c0_i32_1 = arith.constant 0 : i32
    return %c0_i32, %c0_i32_0 : i32, i32
  }
  func.func @transform_2(%arg0: i32) -> (i32, i32) {
    %c0_i32 = arith.constant 0 : i32
    %c0_i32_0 = arith.constant 0 : i32
    %c0_i32_1 = arith.constant 0 : i32
    return %c0_i32, %c0_i32_0 : i32, i32
  }
  func.func @transform_3(%arg0: i32) -> (i32, i32) {
    %c0_i32 = arith.constant 0 : i32
    %c0_i32_0 = arith.constant 0 : i32
    return %arg0, %c0_i32 : i32, i32
  }
}

</mosaic_0001>

<bundles_post_ra>
// kernel: _lambda_.10
= control target key start
LH: loop header
LB: loop body
LE: loop exit
PB: predicated region body
PF: predicated region fallthrough
CT: control target
= control target key end

     0   :  { %vm30_vm0 = vcmask 130048   ;;  %s99_s1 = inlined_call_operand.vmem [shape: bf16[16,128], index: 1, kind: input, shape index: {}]   ;;  %s100_s0 = inlined_call_operand.vmem [shape: f32[16,16], index: 0, kind: input, shape index: {}]   ;;  %s101_s2 = inlined_call_operand.vmem [shape: f32[1,128], index: 2, kind: input, shape index: {}]   ;;  %s102_s3 = inlined_call_operand.vmem [shape: f32[16,128], index: 3, kind: output, shape index: {}]  }
   0x1   :  { %v59_v0 = vld [vmem:[%s99_s1] sm:$0xff]  ;;  %v16_v2 = vld [vmem:[%s100_s0 + $0x8] sm:$0xff] }
   0x2   :  { %v15_v1 = vld [vmem:[%s100_s0] sm:$0xff]  ;;  %41 = vmatpush.bf16.msra.mxu0 %v59_v0 }
   0x3   :  { %v17_v3 = vpack.c.bf16 %v16_v2, %v15_v1  ;;  %v60_v4 = vld [vmem:[%s101_s2] ss:$0 sm:$0xff] }
   0x5   :  { %58 = vmatmul.msk.bf16.vlgmr.msra.gmra.mxu0 %vm30_vm0, %v17_v3 }
  0x82   :  { %v43_v5 = vpop.f32.mrf.mxu0 }
  0x83   :  { %v44_v6 = vadd.f32 %v60_v4, %v43_v5 }
  0x85   :  { %48 = vst [vmem:[%s102_s3] sm:$0xff] %v44_v6 }
  0x8a   :  { %v45_v7 = vpop.f32.mrf.mxu0 }
  0x8b   :  { %v46_v8 = vadd.f32 %v60_v4, %v45_v7 }
  0x8d   :  { %49 = vst [vmem:[%s102_s3 + $0x8] sm:$0xff] %v46_v8 }

// kernel: _lambda_.11
= control target key start
LH: loop header
LB: loop body
LE: loop exit
PB: predicated region body
PF: predicated region fallthrough
CT: control target
= control target key end

     0   :  { %s488_s0 = inlined_call_operand.vmem [shape: f32[16,128], index: 0, kind: input, shape index: {}]   ;;  %s489_s1 = inlined_call_operand.vmem [shape: f32[1,128], index: 1, kind: input, shape index: {}]   ;;  %s490_s2 = inlined_call_operand.vmem [shape: f32[1,128], index: 2, kind: input, shape index: {}]   ;;  %s491_s4 = inlined_call_operand.vmem [shape: f32[1,128], index: 4, kind: input, shape index: {}]   ;;  %s492_s3 = inlined_call_operand.vmem [shape: bf16[128,128], index: 3, kind: input, shape index: {}]   ;;  %s493_s5 = inlined_call_operand.vmem [shape: bf16[128,128], index: 5, kind: input, shape index: {}]   ;;  %s494_s6 = inlined_call_operand.vmem [shape: f32[1,128], index: 6, kind: input, shape index: {}]   ;;  %s495_s7 = inlined_call_operand.vmem [shape: f32[16,128], index: 7, kind: output, shape index: {}]  }
   0x1   :  { %v405_v0 = vld [vmem:[%s488_s0] sm:$0xff]  ;;  %v413_v2 = vld [vmem:[%s488_s0 + $0x8] sm:$0xff]  ;;  %v341_v4 = vld [vmem:[%s492_s3 + $0x38] sm:$0xff] }
   0x2   :  { %30 = vadd.xlane.f32.xlu0 %v405_v0  ;;  %v36_v1 = vmul.f32 %v405_v0, %v405_v0  ;;  %v37_v3 = vmul.f32 %v413_v2, %v413_v2  ;;  %153 = vmatpush.bf16.msra.mxu0 %v341_v4  ;;  %v340_v5 = vld [vmem:[%s492_s3 + $0x30] sm:$0xff]  ;;  %v339_v6 = vld [vmem:[%s492_s3 + $0x28] sm:$0xff]  ;;  %v338_v7 = vld [vmem:[%s492_s3 + $0x20] sm:$0xff] }
   0x3   :  { %v337_v8 = vld [vmem:[%s492_s3 + $0x18] sm:$0xff]  ;;  %v336_v9 = vld [vmem:[%s492_s3 + $0x10] sm:$0xff]  ;;  %v335_v11 = vld [vmem:[%s492_s3 + $0x8] sm:$0xff] }
   0x4   :  { %38 = vadd.xlane.f32.xlu1 %v36_v1  ;;  %v334_v16 = vld [vmem:[%s492_s3] sm:$0xff]  ;;  %v349_v24 = vld [vmem:[%s493_s5 + $0x38] sm:$0xff]  ;;  %v348_v52 = vld [vmem:[%s493_s5 + $0x30] sm:$0xff] }
   0x5   :  { %246 = vmatpush.bf16.msra.mxu1 %v349_v24  ;;  %v350_v41 = vld [vmem:[%s489_s1] ss:$0 sm:$0xff]  ;;  %v347_v53 = vld [vmem:[%s493_s5 + $0x28] sm:$0xff]  ;;  %v345_v55 = vld [vmem:[%s493_s5 + $0x18] sm:$0xff] }
   0x6   :  { %154 = vmatpush.bf16.msra.mxu0 %v340_v5  ;;  %v351_v47 = vld [vmem:[%s490_s2] ss:$0 sm:$0xff]  ;;  %v344_v56 = vld [vmem:[%s493_s5 + $0x10] sm:$0xff]  ;;  %v343_v57 = vld [vmem:[%s493_s5 + $0x8] sm:$0xff] }
   0x7   :  { %v346_v54 = vld [vmem:[%s493_s5 + $0x20] sm:$0xff] }
   0x8   :  { %v342_v58 = vld [vmem:[%s493_s5] sm:$0xff] }
   0x9   :  { %247 = vmatpush.bf16.msra.mxu1 %v348_v52  ;;  %v352_v59 = vld [vmem:[%s491_s4] ss:$0 sm:$0xff] }
   0xa   :  { %32 = vadd.xlane.f32.xlu0 %v413_v2  ;;  %155 = vmatpush.bf16.msra.mxu0 %v339_v6 }
   0xc   :  { %40 = vadd.xlane.f32.xlu1 %v37_v3 }
   0xd   :  { %248 = vmatpush.bf16.msra.mxu1 %v347_v53 }
   0xe   :  { %156 = vmatpush.bf16.msra.mxu0 %v338_v7 }
  0x11   :  { %249 = vmatpush.bf16.msra.mxu1 %v346_v54 }
  0x12   :  { %157 = vmatpush.bf16.msra.mxu0 %v337_v8 }
  0x15   :  { %250 = vmatpush.bf16.msra.mxu1 %v345_v55 }
  0x16   :  { %158 = vmatpush.bf16.msra.mxu0 %v336_v9 }
  0x19   :  { %251 = vmatpush.bf16.msra.mxu1 %v344_v56 }
  0x1a   :  { %159 = vmatpush.bf16.msra.mxu0 %v335_v11 }
  0x1d   :  { %252 = vmatpush.bf16.msra.mxu1 %v343_v57 }
  0x1e   :  { %160 = vmatpush.bf16.msra.mxu0 %v334_v16 }
  0x21   :  { %253 = vmatpush.bf16.msra.mxu1 %v342_v58 }
  0x75   :  { %v31_v10 = vpop.xlane.xlu0 %30 }
  0x76   :  { %v34_v12 = vmul.f32 0.03125, %v31_v10 }
  0x77   :  { %v39_v13 = vpop.xlane.xlu1 %38 }
  0x78   :  { %v44_v14 = vmul.f32 %v34_v12, %v34_v12  ;;  %v42_v15 = vmul.f32 0.03125, %v39_v13  ;;  %v48_v38 = vsub.f32 %v405_v0, %v34_v12  ;;  %v353_v13 = vld [vmem:[%s494_s6] ss:$0 sm:$0xff] }
  0x7a   :  { %v46_v17 = vsub.f32 %v42_v15, %v44_v14 }
  0x7c   :  { %v50_v18 = vadd.f32 1e-05, %v46_v17 }
  0x7d   :  { %v33_v19 = vpop.xlane.xlu0 %32 }
  0x7e   :  { %354 = vrsqrt.f32 %v50_v18  ;;  %v35_v20 = vmul.f32 0.03125, %v33_v19  ;;  %vm58_vm1 = vweird.f32 %v50_v18 }
  0x7f   :  { %v41_v21 = vpop.xlane.xlu1 %40 }
  0x80   :  { %v45_v22 = vmul.f32 %v35_v20, %v35_v20  ;;  %v43_v23 = vmul.f32 0.03125, %v41_v21  ;;  %v49_v43 = vsub.f32 %v413_v2, %v35_v20 }
  0x82   :  { %v47_v25 = vsub.f32 %v43_v23, %v45_v22 }
  0x84   :  { %v355_v26 = vpop.eup %354  ;;  %v51_v27 = vadd.f32 1e-05, %v47_v25 }
  0x85   :  { %v53_v28 = vmul.f32 %v355_v26, %v50_v18  ;;  %vm59_vm0 = vweird.f32 %v355_v26 }
  0x86   :  { %356 = vrsqrt.f32 %v51_v27  ;;  %vm60_vm2 = vmor %vm58_vm1, %vm59_vm0  ;;  %vm68_vm4 = vweird.f32 %v51_v27 }
  0x87   :  { %v54_v29 = vmul.f32 %v355_v26, %v53_v28 }
  0x89   :  { %v55_v30 = vmul.f32 0.5, %v54_v29 }
  0x8b   :  { %v56_v31 = vsub.f32 1.5, %v55_v30 }
  0x8c   :  { %v357_v32 = vpop.eup %356 }
  0x8d   :  { %v57_v33 = vmul.f32 %v355_v26, %v56_v31  ;;  %v63_v34 = vmul.f32 %v357_v32, %v51_v27  ;;  %vm69_vm3 = vweird.f32 %v357_v32 }
  0x8e   :  { %vm70_vm5 = vmor %vm68_vm4, %vm69_vm3 }
  0x8f   :  { %v64_v35 = vmul.f32 %v357_v32, %v63_v34  ;;  %v61_v37 = vsel %vm60_vm2, %v355_v26, %v57_v33 }
  0x90   :  { %v72_v40 = vmul.f32 %v61_v37, %v48_v38 }
  0x91   :  { %v65_v36 = vmul.f32 0.5, %v64_v35 }
  0x92   :  { %v77_v46 = vmul.f32 %v350_v41, %v72_v40 }
  0x93   :  { %v66_v39 = vsub.f32 1.5, %v65_v36 }
  0x94   :  { %v82_v49 = vadd.f32 %v351_v47, %v77_v46 }
  0x95   :  { %v67_v42 = vmul.f32 %v357_v32, %v66_v39 }
  0x97   :  { %v71_v44 = vsel %vm70_vm5, %v357_v32, %v67_v42 }
  0x98   :  { %v73_v45 = vmul.f32 %v71_v44, %v49_v43 }
  0x9a   :  { %v78_v48 = vmul.f32 %v350_v41, %v73_v45 }
  0x9c   :  { %v83_v50 = vadd.f32 %v351_v47, %v78_v48 }
  0x9e   :  { %v84_v51 = vpack.c.bf16 %v83_v50, %v82_v49 }
  0xa0   :  { %161 = vmatmul.bf16.vlgmr.msra.gmra.mxu0 %v84_v51 }
 0x11d   :  { %v162_v60 = vpop.f32.mrf.mxu0 }
 0x11e   :  { %v163_v61 = vadd.f32 %v352_v59, %v162_v60 }
 0x120   :  { %v167_v62 = vmul.f32 0.5, %v163_v61 }
 0x122   :  { %358 = vtanh.f32 %v167_v62 }
 0x125   :  { %v164_v63 = vpop.f32.mrf.mxu0 }
 0x126   :  { %v165_v1 = vadd.f32 %v352_v59, %v164_v63 }
 0x128   :  { %v168_v3 = vmul.f32 0.5, %v165_v1  ;;  %v359_v4 = vpop.eup %358 }
 0x129   :  { %v171_v5 = vadd.f32 1.0, %v359_v4 }
 0x12a   :  { %360 = vtanh.f32 %v168_v3 }
 0x12b   :  { %v173_v7 = vmul.f32 0.5, %v171_v5 }
 0x12d   :  { %v175_v10 = vmul.f32 %v173_v7, %v163_v61 }
 0x130   :  { %v361_v6 = vpop.eup %360 }
 0x131   :  { %v172_v8 = vadd.f32 1.0, %v361_v6 }
 0x133   :  { %v174_v9 = vmul.f32 0.5, %v172_v8 }
 0x135   :  { %v176_v11 = vmul.f32 %v174_v9, %v165_v1 }
 0x137   :  { %v177_v12 = vpack.c.bf16 %v176_v11, %v175_v10 }
 0x139   :  { %254 = vmatmul.bf16.vlgmr.msra.gmra.mxu1 %v177_v12 }
 0x1b6   :  { %v255_v14 = vpop.f32.mrf.mxu1 }
 0x1b7   :  { %v256_v15 = vadd.f32 %v353_v13, %v255_v14 }
 0x1b9   :  { %v260_v16 = vmul.f32 0.5, %v256_v15 }
 0x1bb   :  { %v262_v17 = vadd.f32 %v260_v16, %v405_v0 }
 0x1bd   :  { %264 = vst [vmem:[%s495_s7] sm:$0xff] %v262_v17 }
 0x1be   :  { %v257_v18 = vpop.f32.mrf.mxu1 }
 0x1bf   :  { %v258_v19 = vadd.f32 %v353_v13, %v257_v18 }
 0x1c1   :  { %v261_v20 = vmul.f32 0.5, %v258_v19 }
 0x1c3   :  { %v263_v21 = vadd.f32 %v261_v20, %v413_v2 }
 0x1c5   :  { %265 = vst [vmem:[%s495_s7 + $0x8] sm:$0xff] %v263_v21 }

// kernel: _lambda_.13
= control target key start
LH: loop header
LB: loop body
LE: loop exit
PB: predicated region body
PF: predicated region fallthrough
CT: control target
= control target key end

     0   :  { %s983_s30 = smov 0   ;;  %s1161_s0 = inlined_call_operand.vmem [shape: f32[2,8,128], index: 0, kind: input, shape index: {}]   ;;  %s1162_s1 = inlined_call_operand.vmem [shape: f32[1,128], index: 1, kind: input, shape index: {}]   ;;  %s1163_s2 = inlined_call_operand.vmem [shape: f32[1,128], index: 2, kind: input, shape index: {}]   ;;  %s1164_s3 = inlined_call_operand.vmem [shape: bf16[128,256], index: 3, kind: input, shape index: {}]   ;;  %s1165_s4 = inlined_call_operand.vmem [shape: f32[1,256], index: 4, kind: input, shape index: {}]   ;;  %s1166_s5 = inlined_call_operand.vmem [shape: f32[31,128], index: 5, kind: input, shape index: {}]   ;;  %s1167_s6 = inlined_call_operand.vmem [shape: f32[1,128], index: 6, kind: input, shape index: {}]   ;;  %s1168_s7 = inlined_call_operand.vmem [shape: bf16[128,128], index: 7, kind: input, shape index: {}]   ;;  %s1169_s8 = inlined_call_operand.vmem [shape: f32[1,128], index: 8, kind: input, shape index: {}]   ;;  %s1170_s9 = inlined_call_operand.vmem [shape: f32[2,8,128], index: 9, kind: output, shape index: {}]  }
   0x1 LB: > { %s776_s10 = sadd.s32 4294967295, %s930_s30   ;;  %p780_p0 = scmp.ge.s32.totalorder %s930_s30, 1  ;;  %s930_s30 = sphi %s983_s30, %s19_s30  }
   0x2   : > { %p286_p1 = scmp.lt.s32.totalorder %s930_s30, 3 }
   0x4   : > { %p287_p2 = pnand %p780_p0, %p286_p1 }
   0x5   : > { %p320_p3 = scmp.lt.s32.totalorder (!%p287_p2), %s776_s10, 1 }
   0x6   : > { %290 = sbr.rel (%p287_p2) target bundleno = 529 (0x211), region = 56 }
   0xb   : > { %s1172_s10 = smov (!%p320_p3, %s776_s10), 1  ;;  %v841_v2 = vld [vmem:[%s1164_s3 + $0x70] sm:$0xf]  ;;  %v896_v3 = vld [vmem:[%s1164_s3 + $0x74] sm:$0xf0] }
   0xc   : > { %s781_s11 = sshll.u32 %s1172_s10, 3  ;;  %v895_v4 = vld [vmem:[%s1164_s3 + $0x74] sm:$0xf]  ;;  %v842_v5 = vor.u32 %v896_v3, %v841_v2  ;;  %v843_v6 = vld [vmem:[%s1164_s3 + $0x78] sm:$0xf0] }
   0xd   : > { %s323_s14 = scalar_lea.vmem %s1161_s0, %s781_s11  ;;  %v846_v7 = vor.u32 %v895_v4, %v843_v6  ;;  %v833_v8 = vld [vmem:[%s1164_s3 + $0x60] sm:$0xf]  ;;  %v894_v9 = vld [vmem:[%s1164_s3 + $0x64] sm:$0xf0]  ;;  %v893_v10 = vld [vmem:[%s1164_s3 + $0x64] sm:$0xf]  ;;  %s327_s25 = scalar_lea.vmem %s1170_s9, %s781_s11 }
   0xe   : > { %v999_v0 = vld [vmem:[%s323_s14] sm:$0xff]  ;;  %464 = vmatpush.bf16.msra.mxu0 %v842_v5  ;;  %v834_v11 = vor.u32 %v894_v9, %v833_v8  ;;  %v835_v12 = vld [vmem:[%s1164_s3 + $0x68] sm:$0xf0]  ;;  %v825_v14 = vld [vmem:[%s1164_s3 + $0x50] sm:$0xf]  ;;  %v932_v8 = vmov 0.0  }
   0xf   : > { %331 = vadd.xlane.f32.xlu0 %v999_v0  ;;  %v334_v1 = vmul.f32 %v999_v0, %v999_v0  ;;  %477 = vmatpush.bf16.msra.mxu1 %v846_v7  ;;  %v838_v13 = vor.u32 %v893_v10, %v835_v12  ;;  %v892_v15 = vld [vmem:[%s1164_s3 + $0x54] sm:$0xf0]  ;;  %v891_v16 = vld [vmem:[%s1164_s3 + $0x54] sm:$0xf]  ;;  %v827_v18 = vld [vmem:[%s1164_s3 + $0x58] sm:$0xf0] }
  0x10   : > { %v826_v17 = vor.u32 %v892_v15, %v825_v14  ;;  %v830_v19 = vor.u32 %v891_v16, %v827_v18  ;;  %v817_v20 = vld [vmem:[%s1164_s3 + $0x40] sm:$0xf]  ;;  %v890_v21 = vld [vmem:[%s1164_s3 + $0x44] sm:$0xf0]  ;;  %v889_v22 = vld [vmem:[%s1164_s3 + $0x44] sm:$0xf] }
  0x11   : > { %v818_v23 = vor.u32 %v890_v21, %v817_v20  ;;  %v819_v24 = vld [vmem:[%s1164_s3 + $0x48] sm:$0xf0]  ;;  %v809_v26 = vld [vmem:[%s1164_s3 + $0x30] sm:$0xf]  ;;  %v888_v27 = vld [vmem:[%s1164_s3 + $0x34] sm:$0xf0] }
  0x12   : > { %465 = vmatpush.bf16.msra.mxu0 %v834_v11  ;;  %v822_v25 = vor.u32 %v889_v22, %v819_v24  ;;  %v887_v28 = vld [vmem:[%s1164_s3 + $0x34] sm:$0xf]  ;;  %v810_v29 = vor.u32 %v888_v27, %v809_v26  ;;  %v811_v30 = vld [vmem:[%s1164_s3 + $0x38] sm:$0xf0]  ;;  %v801_v32 = vld [vmem:[%s1164_s3 + $0x20] sm:$0xf] }
  0x13   : > { %478 = vmatpush.bf16.msra.mxu1 %v838_v13  ;;  %v814_v31 = vor.u32 %v887_v28, %v811_v30  ;;  %v886_v33 = vld [vmem:[%s1164_s3 + $0x24] sm:$0xf0]  ;;  %v885_v34 = vld [vmem:[%s1164_s3 + $0x24] sm:$0xf]  ;;  %v803_v36 = vld [vmem:[%s1164_s3 + $0x28] sm:$0xf0] }
  0x14   : > { %v802_v35 = vor.u32 %v886_v33, %v801_v32  ;;  %v793_v37 = vld [vmem:[%s1164_s3 + $0x10] sm:$0xf]  ;;  %v884_v38 = vld [vmem:[%s1164_s3 + $0x14] sm:$0xf0]  ;;  %v806_v39 = vor.u32 %v885_v34, %v803_v36  ;;  %v883_v40 = vld [vmem:[%s1164_s3 + $0x14] sm:$0xf] }
  0x15   : > { %v795_v41 = vld [vmem:[%s1164_s3 + $0x18] sm:$0xf0]  ;;  %v794_v42 = vor.u32 %v884_v38, %v793_v37  ;;  %v785_v44 = vld [vmem:[%s1164_s3] sm:$0xf]  ;;  %v882_v45 = vld [vmem:[%s1164_s3 + $0x4] sm:$0xf0] }
  0x16   : > { %466 = vmatpush.bf16.msra.mxu0 %v826_v17  ;;  %v798_v43 = vor.u32 %v883_v40, %v795_v41  ;;  %v881_v47 = vld [vmem:[%s1164_s3 + $0x4] sm:$0xf]  ;;  %v787_v48 = vld [vmem:[%s1164_s3 + $0x8] sm:$0xf0]  ;;  %v786_v49 = vor.u32 %v882_v45, %v785_v44  ;;  %v915_v4 = vld [vmem:[%s1163_s2] ss:$0 sm:$0xff] }
  0x17   : > { %335 = vadd.xlane.f32.xlu0 %v334_v1  ;;  %479 = vmatpush.bf16.msra.mxu1 %v830_v19  ;;  %v790_v50 = vor.u32 %v881_v47, %v787_v48  ;;  %v914_v1 = vld [vmem:[%s1162_s1] ss:$0 sm:$0xff]  ;;  %495 = vst [vmem:[#allocation2] sm:$0xff] %v932_v8  ;;  %v904_v24 = vld [vmem:[%s1168_s7 + $0x38] sm:$0xff]  ;;  %v903_v27 = vld [vmem:[%s1168_s7 + $0x30] sm:$0xff] }
  0x18   : > { %496 = vst [vmem:[#allocation2 + $0x8] sm:$0xff] %v932_v8  ;;  %v501_v9 = vld [vmem:[%s1166_s5] sm:$0xff]  ;;  %708 = vmatpush.bf16.msra.mxu2 %v904_v24  ;;  %v902_v33 = vld [vmem:[%s1168_s7 + $0x28] sm:$0xff] }
  0x19   : > { %497 = vst [vmem:[#allocation2 + $0x10] sm:$0xff] %v932_v8  ;;  %v506_v10 = vperm.slane %v501_v9, 0  ;;  %v510_v11 = vperm.slane %v501_v9, 1  ;;  %v378_v13 = vld [vmem:[%s1165_s4] sm:$0x3]  ;;  %v514_v16 = vperm.slane %v501_v9, 2 }
  0x1a   : > { %467 = vmatpush.bf16.msra.mxu0 %v818_v23  ;;  %498 = vst [vmem:[#allocation2 + $0x18] sm:$0xff] %v932_v8  ;;  %v381_v17 = vperm.slane %v378_v13, 1  ;;  %v518_v23 = vperm.slane %v501_v9, 3  ;;  %v526_v36 = vperm.slane %v501_v9, 5  ;;  %v380_v40 = vperm.slane %v378_v13, 0  ;;  %v901_v41 = vld [vmem:[%s1168_s7 + $0x20] sm:$0xff] }
  0x1b   : > { %480 = vmatpush.bf16.msra.mxu1 %v822_v25  ;;  %499 = vst [vmem:[#allocation2 + $0x20] sm:$0x3f] %v932_v8  ;;  %v507_v14 = vmul.f32 0.0, %v506_v10 }
  0x1c   : > { %709 = vmatpush.bf16.msra.mxu2 %v903_v27 }
  0x1e   : > { %468 = vmatpush.bf16.msra.mxu0 %v810_v29 }
  0x1f   : > { %481 = vmatpush.bf16.msra.mxu1 %v814_v31  ;;  %v509_v12 = vld [vmem:[#allocation2 + $0x1] sm:$0xff]  ;;  %v522_v31 = vperm.slane %v501_v9, 4 }
  0x20   : > { %v511_v15 = vmul.f32 %v510_v11, %v509_v12  ;;  %v513_v18 = vld [vmem:[#allocation2 + $0x2] sm:$0xff]  ;;  %710 = vmatpush.bf16.msra.mxu2 %v902_v33 }
  0x21   : > { %v515_v22 = vmul.f32 %v514_v16, %v513_v18  ;;  %v517_v26 = vld [vmem:[#allocation2 + $0x3] sm:$0xff] }
  0x22   : > { %469 = vmatpush.bf16.msra.mxu0 %v802_v35  ;;  %v512_v21 = vadd.f32 %v511_v15, %v507_v14  ;;  %v519_v30 = vmul.f32 %v518_v23, %v517_v26  ;;  %v521_v32 = vld [vmem:[#allocation2 + $0x4] sm:$0xff] }
  0x23   : > { %482 = vmatpush.bf16.msra.mxu1 %v806_v39  ;;  %v523_v35 = vmul.f32 %v522_v31, %v521_v32  ;;  %v525_v39 = vld [vmem:[#allocation2 + $0x5] sm:$0xff] }
  0x24   : > { %v516_v29 = vadd.f32 %v515_v22, %v512_v21  ;;  %v527_v45 = vmul.f32 %v526_v36, %v525_v39  ;;  %v529_v47 = vld [vmem:[#allocation2 + $0x6] sm:$0xff]  ;;  %711 = vmatpush.bf16.msra.mxu2 %v901_v41  ;;  %v503_v22 = vld [vmem:[%s1166_s5 + $0x10] sm:$0xff] }
  0x25   : > { %v574_v33 = vperm.slane %v503_v22, 1  ;;  %v582_v41 = vperm.slane %v503_v22, 3 }
  0x26   : > { %470 = vmatpush.bf16.msra.mxu0 %v794_v42  ;;  %v520_v34 = vadd.f32 %v519_v30, %v516_v29  ;;  %v570_v29 = vperm.slane %v503_v22, 0 }
  0x27   : > { %483 = vmatpush.bf16.msra.mxu1 %v798_v43 }
  0x28   : > { %v524_v44 = vadd.f32 %v523_v35, %v520_v34 }
  0x2a   : > { %471 = vmatpush.bf16.msra.mxu0 %v786_v49 }
  0x2b   : > { %484 = vmatpush.bf16.msra.mxu1 %v790_v50  ;;  %v900_v50 = vld [vmem:[%s1168_s7 + $0x18] sm:$0xff] }
  0x2c   : > { %712 = vmatpush.bf16.msra.mxu2 %v900_v50  ;;  %v504_v50 = vld [vmem:[%s1166_s5 + $0x18] sm:$0x7f] }
  0x82   : > { %v332_v46 = vpop.xlane.xlu0 %331 }
  0x83   : > { %v333_v51 = vmul.f32 0.03125, %v332_v46  ;;  %v530_v46 = vperm.slane %v501_v9, 6 }
  0x85   : > { %v338_v53 = vmul.f32 %v333_v51, %v333_v51  ;;  %v340_v63 = vsub.f32 %v999_v0, %v333_v51 }
  0x8a   : > { %v336_v52 = vpop.xlane.xlu0 %335 }
  0x8b   : > { %v337_v54 = vmul.f32 0.03125, %v336_v52  ;;  %v528_v52 = vadd.f32 %v527_v45, %v524_v44  ;;  %v586_v45 = vperm.slane %v503_v22, 4 }
  0x8d   : > { %v339_v55 = vsub.f32 %v337_v54, %v338_v53  ;;  %v531_v53 = vmul.f32 %v530_v46, %v529_v47  ;;  %v534_v54 = vperm.slane %v501_v9, 7 }
  0x8f   : > { %v341_v56 = vadd.f32 1e-05, %v339_v55  ;;  %v533_v55 = vld [vmem:[#allocation2 + $0x7] sm:$0xff] }
  0x91   : > { %918 = vrsqrt.f32 %v341_v56  ;;  %vm348_vm1 = vweird.f32 %v341_v56 }
  0x97   : > { %v919_v57 = vpop.eup %918 }
  0x98   : > { %v343_v58 = vmul.f32 %v919_v57, %v341_v56  ;;  %vm349_vm0 = vweird.f32 %v919_v57  ;;  %v899_v56 = vld [vmem:[%s1168_s7 + $0x10] sm:$0xff] }
  0x99   : > { %vm350_vm2 = vmor %vm348_vm1, %vm349_vm0  ;;  %713 = vmatpush.bf16.msra.mxu2 %v899_v56 }
  0x9a   : > { %v344_v59 = vmul.f32 %v919_v57, %v343_v58  ;;  %v535_v58 = vmul.f32 %v534_v54, %v533_v55  ;;  %v594_v54 = vperm.slane %v503_v22, 6  ;;  %v598_v55 = vperm.slane %v503_v22, 7 }
  0x9c   : > { %v345_v60 = vmul.f32 0.5, %v344_v59  ;;  %v502_v59 = vld [vmem:[%s1166_s5 + $0x8] sm:$0xff] }
  0x9d   : > { %v550_v9 = vperm.slane %v502_v59, 3  ;;  %v554_v13 = vperm.slane %v502_v59, 4  ;;  %v562_v21 = vperm.slane %v502_v59, 6  ;;  %v566_v26 = vperm.slane %v502_v59, 7 }
  0x9e   : > { %v346_v61 = vsub.f32 1.5, %v345_v60  ;;  %v538_v60 = vperm.slane %v502_v59, 0 }
  0xa0   : > { %v347_v62 = vmul.f32 %v919_v57, %v346_v61  ;;  %v898_v61 = vld [vmem:[%s1168_s7 + $0x8] sm:$0xff] }
  0xa1   : > { %714 = vmatpush.bf16.msra.mxu2 %v898_v61 }
  0xa2   : > { %v351_v2 = vsel %vm350_vm2, %v919_v57, %v347_v62  ;;  %v532_v57 = vadd.f32 %v531_v53, %v528_v52 }
  0xa3   : > { %v352_v3 = vmul.f32 %v351_v2, %v340_v63  ;;  %v542_v63 = vperm.slane %v502_v59, 1 }
  0xa4   : > { %v536_v62 = vadd.f32 %v535_v58, %v532_v57  ;;  %v597_v57 = vld [vmem:[#allocation2 + $0x17] sm:$0xff] }
  0xa5   : > { %v356_v5 = vmul.f32 %v914_v1, %v352_v3 }
  0xa7   : > { %v360_v6 = vadd.f32 %v915_v4, %v356_v5  ;;  %v546_v4 = vperm.slane %v502_v59, 2  ;;  %v897_v5 = vld [vmem:[%s1168_s7] sm:$0xff] }
  0xa8   : > { %715 = vmatpush.bf16.msra.mxu2 %v897_v5  ;;  %v610_v5 = vperm.slane %v504_v50, 2 }
  0xa9   : > { %v361_v7 = vpack.c.bf16 %v360_v6, %v360_v6 }
  0xab   : > { %472 = vmatmul.bf16.vlgmr.msra.gmra.mxu0 %v361_v7  ;;  %485 = vmatmul.bf16.vlgmr.msra.gmra.mxu1 %v361_v7 }
 0x128   : > { %v473_v19 = vpop.f32.mrf.mxu0  ;;  %v486_v20 = vpop.f32.mrf.mxu1 }
 0x129   : > { %v487_v25 = vadd.f32 %v486_v20, %v381_v17  ;;  %v474_v48 = vadd.f32 %v473_v19, %v380_v40  ;;  %v558_v17 = vperm.slane %v502_v59, 5 }
 0x12b   : > { %v490_v28 = vmul.f32 0.5, %v487_v25 }
 0x12d   : > { %920 = vtanh.f32 %v490_v28 }
 0x130   : > { %v475_v37 = vpop.f32.mrf.mxu0  ;;  %v488_v38 = vpop.f32.mrf.mxu1 }
 0x131   : > { %v578_v37 = vperm.slane %v503_v22, 2 }
 0x133   : > { %v921_v42 = vpop.eup %920 }
 0x134   : > { %v492_v43 = vadd.f32 1.0, %v921_v42 }
 0x136   : > { %v493_v49 = vmul.f32 0.5, %v492_v43 }
 0x138   : > { %v494_v51 = vmul.f32 %v493_v49, %v474_v48  ;;  %v590_v49 = vperm.slane %v503_v22, 5  ;;  %v625_v22 = vld [vmem:[#allocation2 + $0x1e] sm:$0xff] }
 0x13a   : > { %500 = vst [vmem:[#allocation2 + $0xf] sm:$0xff] %v494_v51  ;;  %v567_v32 = vmul.f32 %v566_v26, %v494_v51 }
 0x141   : > { %v537_v1 = vld [vmem:[#allocation2 + $0x8] sm:$0xff]  ;;  %v569_v30 = vld [vmem:[#allocation2 + $0x10] sm:$0xff] }
 0x142   : > { %v541_v2 = vld [vmem:[#allocation2 + $0x9] sm:$0xff]  ;;  %v539_v3 = vmul.f32 %v538_v60, %v537_v1  ;;  %v573_v34 = vld [vmem:[#allocation2 + $0x11] sm:$0xff]  ;;  %v571_v36 = vmul.f32 %v570_v29, %v569_v30  ;;  %v602_v60 = vperm.slane %v504_v50, 0  ;;  %v606_v1 = vperm.slane %v504_v50, 1 }
 0x143   : > { %v545_v6 = vld [vmem:[#allocation2 + $0xa] sm:$0xff]  ;;  %v543_v8 = vmul.f32 %v542_v63, %v541_v2  ;;  %v577_v38 = vld [vmem:[#allocation2 + $0x12] sm:$0xff]  ;;  %v575_v40 = vmul.f32 %v574_v33, %v573_v34  ;;  %v599_v63 = vmul.f32 %v598_v55, %v597_v57 }
 0x144   : > { %v540_v7 = vadd.f32 %v539_v3, %v536_v62  ;;  %v549_v10 = vld [vmem:[#allocation2 + $0xb] sm:$0xff]  ;;  %v547_v12 = vmul.f32 %v546_v4, %v545_v6  ;;  %v581_v42 = vld [vmem:[#allocation2 + $0x13] sm:$0xff]  ;;  %v579_v44 = vmul.f32 %v578_v37, %v577_v38  ;;  %v603_v4 = vmul.f32 0.0, %v602_v60  ;;  %v917_v37 = vld [vmem:[%s1169_s8] ss:$0 sm:$0xff] }
 0x145   : > { %v553_v14 = vld [vmem:[#allocation2 + $0xc] sm:$0xff]  ;;  %v551_v16 = vmul.f32 %v550_v9, %v549_v10  ;;  %v585_v46 = vld [vmem:[#allocation2 + $0x14] sm:$0xff]  ;;  %v583_v48 = vmul.f32 %v582_v41, %v581_v42  ;;  %v614_v9 = vperm.slane %v504_v50, 3 }
 0x146   : > { %v544_v11 = vadd.f32 %v543_v8, %v540_v7  ;;  %v557_v18 = vld [vmem:[#allocation2 + $0xd] sm:$0xff]  ;;  %v555_v19 = vmul.f32 %v554_v13, %v553_v14  ;;  %v589_v51 = vld [vmem:[#allocation2 + $0x15] sm:$0xff]  ;;  %v587_v53 = vmul.f32 %v586_v45, %v585_v46  ;;  %v618_v13 = vperm.slane %v504_v50, 4 }
 0x147   : > { %v561_v23 = vld [vmem:[#allocation2 + $0xe] sm:$0xff]  ;;  %v559_v25 = vmul.f32 %v558_v17, %v557_v18  ;;  %v593_v56 = vld [vmem:[#allocation2 + $0x16] sm:$0xff]  ;;  %v591_v59 = vmul.f32 %v590_v49, %v589_v51  ;;  %v622_v17 = vperm.slane %v504_v50, 5 }
 0x148   : > { %v548_v15 = vadd.f32 %v547_v12, %v544_v11  ;;  %v563_v28 = vmul.f32 %v562_v21, %v561_v23  ;;  %v595_v62 = vmul.f32 %v594_v54, %v593_v56  ;;  %v605_v2 = vld [vmem:[#allocation2 + $0x19] sm:$0xff]  ;;  %v626_v21 = vperm.slane %v504_v50, 6 }
 0x149   : > { %v609_v6 = vld [vmem:[#allocation2 + $0x1a] sm:$0xff]  ;;  %v607_v8 = vmul.f32 %v606_v1, %v605_v2 }
 0x14a   : > { %v552_v20 = vadd.f32 %v551_v16, %v548_v15  ;;  %v613_v10 = vld [vmem:[#allocation2 + $0x1b] sm:$0xff]  ;;  %v611_v12 = vmul.f32 %v610_v5, %v609_v6  ;;  %v627_v26 = vmul.f32 %v626_v21, %v625_v22 }
 0x14b   : > { %v617_v14 = vld [vmem:[#allocation2 + $0x1c] sm:$0xff]  ;;  %v615_v16 = vmul.f32 %v614_v9, %v613_v10 }
 0x14c   : > { %v556_v24 = vadd.f32 %v555_v19, %v552_v20  ;;  %v621_v18 = vld [vmem:[#allocation2 + $0x1d] sm:$0xff]  ;;  %v619_v20 = vmul.f32 %v618_v13, %v617_v14 }
 0x14e   : > { %v560_v27 = vadd.f32 %v559_v25, %v556_v24  ;;  %v623_v24 = vmul.f32 %v622_v17, %v621_v18 }
 0x150   : > { %v564_v31 = vadd.f32 %v563_v28, %v560_v27  ;;  %v916_v28 = vld [vmem:[%s1167_s6] ss:$0 sm:$0xff] }
 0x152   : > { %v568_v35 = vadd.f32 %v567_v32, %v564_v31 }
 0x154   : > { %v572_v39 = vadd.f32 %v571_v36, %v568_v35 }
 0x156   : > { %v576_v43 = vadd.f32 %v575_v40, %v572_v39 }
 0x158   : > { %v580_v47 = vadd.f32 %v579_v44, %v576_v43 }
 0x15a   : > { %v584_v52 = vadd.f32 %v583_v48, %v580_v47 }
 0x15c   : > { %v588_v58 = vadd.f32 %v587_v53, %v584_v52 }
 0x15e   : > { %v592_v61 = vadd.f32 %v591_v59, %v588_v58 }
 0x160   : > { %v596_v3 = vadd.f32 %v595_v62, %v592_v61 }
 0x162   : > { %v600_v7 = vadd.f32 %v599_v63, %v596_v3 }
 0x164   : > { %v604_v11 = vadd.f32 %v603_v4, %v600_v7 }
 0x166   : > { %v608_v15 = vadd.f32 %v607_v8, %v604_v11 }
 0x168   : > { %v612_v19 = vadd.f32 %v611_v12, %v608_v15 }
 0x16a   : > { %v616_v23 = vadd.f32 %v615_v16, %v612_v19 }
 0x16c   : > { %v620_v25 = vadd.f32 %v619_v20, %v616_v23 }
 0x16e   : > { %v624_v27 = vadd.f32 %v623_v24, %v620_v25 }
 0x170   : > { %v628_v29 = vadd.f32 %v627_v26, %v624_v27 }
 0x172   : > { %v633_v30 = vadd.f32 %v916_v28, %v628_v29 }
 0x174   : > { %v634_v31 = vmul.f32 0.5, %v633_v30 }
 0x176   : > { %922 = vtanh.f32 %v634_v31 }
 0x17c   : > { %v923_v32 = vpop.eup %922 }
 0x17d   : > { %v636_v33 = vadd.f32 1.0, %v923_v32 }
 0x17f   : > { %v637_v34 = vmul.f32 0.5, %v636_v33 }
 0x181   : > { %v638_v35 = vmul.f32 %v637_v34, %v633_v30 }
 0x183   : > { %v639_v36 = vpack.c.bf16 %v638_v35, %v638_v35 }
 0x185   : > { %716 = vmatmul.bf16.vlgmr.msra.gmra.mxu2 %v639_v36 }
 0x208   : > { %v717_v38 = vpop.f32.mrf.mxu2 }
 0x209   : > { %v718_v39 = vadd.f32 %v917_v37, %v717_v38 }
 0x20b   : > { %v721_v40 = vadd.f32 %v718_v39, %v999_v0 }
 0x20d   : > { %722 = vst [vmem:[%s327_s25] sm:$0xff] %v721_v40 }
 0x210   : > { %v719_v41 = vpop.f32.mrf.mxu2 }
 0x211 PF: > { %s19_s30 = sadd.s32 1, %s930_s30  }
 0x212   : > { %p16_p4 = scmp.ge.s32.totalorder %s19_s30, 4  }
 0x214   :  { %18 = sbr.rel (!%p16_p4) target bundleno = 1 (0x1), region = 86 }

// kernel: _lambda_.14
= control target key start
LH: loop header
LB: loop body
LE: loop exit
PB: predicated region body
PF: predicated region fallthrough
CT: control target
= control target key end

     0   :  { %s572_s0 = inlined_call_operand.vmem [shape: f32[16,128], index: 0, kind: input, shape index: {}]   ;;  %s573_s1 = inlined_call_operand.vmem [shape: f32[1,128], index: 1, kind: input, shape index: {}]   ;;  %s574_s2 = inlined_call_operand.vmem [shape: f32[1,128], index: 2, kind: input, shape index: {}]   ;;  %s575_s4 = inlined_call_operand.vmem [shape: f32[1,128], index: 4, kind: input, shape index: {}]   ;;  %s576_s3 = inlined_call_operand.vmem [shape: bf16[128,128], index: 3, kind: input, shape index: {}]   ;;  %s577_s5 = inlined_call_operand.vmem [shape: bf16[128,128], index: 5, kind: input, shape index: {}]   ;;  %s578_s6 = inlined_call_operand.vmem [shape: f32[1,128], index: 6, kind: input, shape index: {}]   ;;  %s579_s7 = inlined_call_operand.vmem [shape: f32[1,128], index: 7, kind: input, shape index: {}]   ;;  %s580_s8 = inlined_call_operand.vmem [shape: f32[1,128], index: 8, kind: input, shape index: {}]   ;;  %s581_s9 = inlined_call_operand.vmem [shape: f32[16,128], index: 9, kind: output, shape index: {}]  }
   0x1   :  { %v483_v0 = vld [vmem:[%s572_s0] sm:$0xff]  ;;  %v491_v2 = vld [vmem:[%s572_s0 + $0x8] sm:$0xff]  ;;  %v403_v4 = vld [vmem:[%s576_s3 + $0x38] sm:$0xff] }
   0x2   :  { %36 = vadd.xlane.f32.xlu0 %v483_v0  ;;  %v42_v1 = vmul.f32 %v483_v0, %v483_v0  ;;  %v43_v3 = vmul.f32 %v491_v2, %v491_v2  ;;  %159 = vmatpush.bf16.msra.mxu0 %v403_v4  ;;  %v402_v5 = vld [vmem:[%s576_s3 + $0x30] sm:$0xff]  ;;  %v401_v6 = vld [vmem:[%s576_s3 + $0x28] sm:$0xff]  ;;  %v400_v7 = vld [vmem:[%s576_s3 + $0x20] sm:$0xff] }
   0x3   :  { %v399_v8 = vld [vmem:[%s576_s3 + $0x18] sm:$0xff]  ;;  %v398_v9 = vld [vmem:[%s576_s3 + $0x10] sm:$0xff]  ;;  %v397_v11 = vld [vmem:[%s576_s3 + $0x8] sm:$0xff] }
   0x4   :  { %44 = vadd.xlane.f32.xlu1 %v42_v1  ;;  %v396_v16 = vld [vmem:[%s576_s3] sm:$0xff]  ;;  %v411_v24 = vld [vmem:[%s577_s5 + $0x38] sm:$0xff]  ;;  %v410_v52 = vld [vmem:[%s577_s5 + $0x30] sm:$0xff] }
   0x5   :  { %252 = vmatpush.bf16.msra.mxu1 %v411_v24  ;;  %v412_v41 = vld [vmem:[%s573_s1] ss:$0 sm:$0xff]  ;;  %v409_v53 = vld [vmem:[%s577_s5 + $0x28] sm:$0xff]  ;;  %v407_v55 = vld [vmem:[%s577_s5 + $0x18] sm:$0xff] }
   0x6   :  { %160 = vmatpush.bf16.msra.mxu0 %v402_v5  ;;  %v413_v47 = vld [vmem:[%s574_s2] ss:$0 sm:$0xff]  ;;  %v406_v56 = vld [vmem:[%s577_s5 + $0x10] sm:$0xff]  ;;  %v405_v57 = vld [vmem:[%s577_s5 + $0x8] sm:$0xff] }
   0x7   :  { %v408_v54 = vld [vmem:[%s577_s5 + $0x20] sm:$0xff] }
   0x8   :  { %v404_v58 = vld [vmem:[%s577_s5] sm:$0xff] }
   0x9   :  { %253 = vmatpush.bf16.msra.mxu1 %v410_v52  ;;  %v414_v59 = vld [vmem:[%s575_s4] ss:$0 sm:$0xff] }
   0xa   :  { %38 = vadd.xlane.f32.xlu0 %v491_v2  ;;  %161 = vmatpush.bf16.msra.mxu0 %v401_v6 }
   0xc   :  { %46 = vadd.xlane.f32.xlu1 %v43_v3 }
   0xd   :  { %254 = vmatpush.bf16.msra.mxu1 %v409_v53 }
   0xe   :  { %162 = vmatpush.bf16.msra.mxu0 %v400_v7 }
  0x11   :  { %255 = vmatpush.bf16.msra.mxu1 %v408_v54 }
  0x12   :  { %163 = vmatpush.bf16.msra.mxu0 %v399_v8 }
  0x15   :  { %256 = vmatpush.bf16.msra.mxu1 %v407_v55 }
  0x16   :  { %164 = vmatpush.bf16.msra.mxu0 %v398_v9 }
  0x19   :  { %257 = vmatpush.bf16.msra.mxu1 %v406_v56 }
  0x1a   :  { %165 = vmatpush.bf16.msra.mxu0 %v397_v11 }
  0x1d   :  { %258 = vmatpush.bf16.msra.mxu1 %v405_v57 }
  0x1e   :  { %166 = vmatpush.bf16.msra.mxu0 %v396_v16 }
  0x21   :  { %259 = vmatpush.bf16.msra.mxu1 %v404_v58 }
  0x75   :  { %v37_v10 = vpop.xlane.xlu0 %36 }
  0x76   :  { %v40_v12 = vmul.f32 0.03125, %v37_v10 }
  0x77   :  { %v45_v13 = vpop.xlane.xlu1 %44 }
  0x78   :  { %v50_v14 = vmul.f32 %v40_v12, %v40_v12  ;;  %v48_v15 = vmul.f32 0.03125, %v45_v13  ;;  %v54_v38 = vsub.f32 %v483_v0, %v40_v12  ;;  %v415_v13 = vld [vmem:[%s578_s6] ss:$0 sm:$0xff] }
  0x7a   :  { %v52_v17 = vsub.f32 %v48_v15, %v50_v14 }
  0x7c   :  { %v56_v18 = vadd.f32 1e-05, %v52_v17 }
  0x7d   :  { %v39_v19 = vpop.xlane.xlu0 %38 }
  0x7e   :  { %418 = vrsqrt.f32 %v56_v18  ;;  %v41_v20 = vmul.f32 0.03125, %v39_v19  ;;  %vm64_vm1 = vweird.f32 %v56_v18 }
  0x7f   :  { %v47_v21 = vpop.xlane.xlu1 %46 }
  0x80   :  { %v51_v22 = vmul.f32 %v41_v20, %v41_v20  ;;  %v49_v23 = vmul.f32 0.03125, %v47_v21  ;;  %v55_v43 = vsub.f32 %v491_v2, %v41_v20 }
  0x82   :  { %v53_v25 = vsub.f32 %v49_v23, %v51_v22 }
  0x84   :  { %v419_v26 = vpop.eup %418  ;;  %v57_v27 = vadd.f32 1e-05, %v53_v25 }
  0x85   :  { %v59_v28 = vmul.f32 %v419_v26, %v56_v18  ;;  %vm65_vm0 = vweird.f32 %v419_v26 }
  0x86   :  { %420 = vrsqrt.f32 %v57_v27  ;;  %vm66_vm2 = vmor %vm64_vm1, %vm65_vm0  ;;  %vm74_vm4 = vweird.f32 %v57_v27 }
  0x87   :  { %v60_v29 = vmul.f32 %v419_v26, %v59_v28 }
  0x89   :  { %v61_v30 = vmul.f32 0.5, %v60_v29 }
  0x8b   :  { %v62_v31 = vsub.f32 1.5, %v61_v30 }
  0x8c   :  { %v421_v32 = vpop.eup %420 }
  0x8d   :  { %v63_v33 = vmul.f32 %v419_v26, %v62_v31  ;;  %v69_v34 = vmul.f32 %v421_v32, %v57_v27  ;;  %vm75_vm3 = vweird.f32 %v421_v32 }
  0x8e   :  { %vm76_vm5 = vmor %vm74_vm4, %vm75_vm3 }
  0x8f   :  { %v70_v35 = vmul.f32 %v421_v32, %v69_v34  ;;  %v67_v37 = vsel %vm66_vm2, %v419_v26, %v63_v33 }
  0x90   :  { %v78_v40 = vmul.f32 %v67_v37, %v54_v38 }
  0x91   :  { %v71_v36 = vmul.f32 0.5, %v70_v35 }
  0x92   :  { %v83_v46 = vmul.f32 %v412_v41, %v78_v40 }
  0x93   :  { %v72_v39 = vsub.f32 1.5, %v71_v36 }
  0x94   :  { %v88_v49 = vadd.f32 %v413_v47, %v83_v46 }
  0x95   :  { %v73_v42 = vmul.f32 %v421_v32, %v72_v39 }
  0x97   :  { %v77_v44 = vsel %vm76_vm5, %v421_v32, %v73_v42 }
  0x98   :  { %v79_v45 = vmul.f32 %v77_v44, %v55_v43 }
  0x9a   :  { %v84_v48 = vmul.f32 %v412_v41, %v79_v45  ;;  %v416_v45 = vld [vmem:[%s579_s7] ss:$0 sm:$0xff] }
  0x9c   :  { %v89_v50 = vadd.f32 %v413_v47, %v84_v48  ;;  %v417_v48 = vld [vmem:[%s580_s8] ss:$0 sm:$0xff] }
  0x9e   :  { %v90_v51 = vpack.c.bf16 %v89_v50, %v88_v49 }
  0xa0   :  { %167 = vmatmul.bf16.vlgmr.msra.gmra.mxu0 %v90_v51 }
 0x11d   :  { %v168_v60 = vpop.f32.mrf.mxu0 }
 0x11e   :  { %v169_v61 = vadd.f32 %v414_v59, %v168_v60 }
 0x120   :  { %v173_v62 = vmul.f32 0.5, %v169_v61 }
 0x122   :  { %422 = vtanh.f32 %v173_v62 }
 0x125   :  { %v170_v63 = vpop.f32.mrf.mxu0 }
 0x126   :  { %v171_v1 = vadd.f32 %v414_v59, %v170_v63 }
 0x128   :  { %v174_v3 = vmul.f32 0.5, %v171_v1  ;;  %v423_v4 = vpop.eup %422 }
 0x129   :  { %v177_v5 = vadd.f32 1.0, %v423_v4 }
 0x12a   :  { %424 = vtanh.f32 %v174_v3 }
 0x12b   :  { %v179_v7 = vmul.f32 0.5, %v177_v5 }
 0x12d   :  { %v181_v10 = vmul.f32 %v179_v7, %v169_v61 }
 0x130   :  { %v425_v6 = vpop.eup %424 }
 0x131   :  { %v178_v8 = vadd.f32 1.0, %v425_v6 }
 0x133   :  { %v180_v9 = vmul.f32 0.5, %v178_v8 }
 0x135   :  { %v182_v11 = vmul.f32 %v180_v9, %v171_v1 }
 0x137   :  { %v183_v12 = vpack.c.bf16 %v182_v11, %v181_v10 }
 0x139   :  { %260 = vmatmul.bf16.vlgmr.msra.gmra.mxu1 %v183_v12 }
 0x1b6   :  { %v261_v14 = vpop.f32.mrf.mxu1 }
 0x1b7   :  { %v262_v15 = vadd.f32 %v415_v13, %v261_v14 }
 0x1b9   :  { %v266_v16 = vmul.f32 0.5, %v262_v15 }
 0x1bb   :  { %v268_v17 = vadd.f32 %v266_v16, %v483_v0 }
 0x1bd   :  { %272 = vadd.xlane.f32.xlu2 %v268_v17  ;;  %v278_v18 = vmul.f32 %v268_v17, %v268_v17 }
 0x1be   :  { %v263_v19 = vpop.f32.mrf.mxu1 }
 0x1bf   :  { %v264_v20 = vadd.f32 %v415_v13, %v263_v19  ;;  %280 = vadd.xlane.f32.xlu0 %v278_v18 }
 0x1c1   :  { %v267_v21 = vmul.f32 0.5, %v264_v20 }
 0x1c3   :  { %v269_v22 = vadd.f32 %v267_v21, %v491_v2 }
 0x1c5   :  { %274 = vadd.xlane.f32.xlu2 %v269_v22  ;;  %v279_v23 = vmul.f32 %v269_v22, %v269_v22 }
 0x1c7   :  { %282 = vadd.xlane.f32.xlu1 %v279_v23 }
 0x230   :  { %v273_v24 = vpop.xlane.xlu2 %272 }
 0x231   :  { %v276_v25 = vmul.f32 0.03125, %v273_v24 }
 0x232   :  { %v281_v26 = vpop.xlane.xlu0 %280 }
 0x233   :  { %v286_v27 = vmul.f32 %v276_v25, %v276_v25  ;;  %v284_v28 = vmul.f32 0.03125, %v281_v26  ;;  %v290_v44 = vsub.f32 %v268_v17, %v276_v25 }
 0x235   :  { %v288_v29 = vsub.f32 %v284_v28, %v286_v27 }
 0x237   :  { %v292_v30 = vadd.f32 1e-05, %v288_v29 }
 0x238   :  { %v275_v31 = vpop.xlane.xlu2 %274 }
 0x239   :  { %426 = vrsqrt.f32 %v292_v30  ;;  %v277_v0 = vmul.f32 0.03125, %v275_v31  ;;  %vm300_vm7 = vweird.f32 %v292_v30 }
 0x23a   :  { %v283_v32 = vpop.xlane.xlu1 %282 }
 0x23b   :  { %v287_v33 = vmul.f32 %v277_v0, %v277_v0  ;;  %v285_v34 = vmul.f32 0.03125, %v283_v32  ;;  %v291_v55 = vsub.f32 %v269_v22, %v277_v0 }
 0x23d   :  { %v289_v35 = vsub.f32 %v285_v34, %v287_v33 }
 0x23f   :  { %v427_v36 = vpop.eup %426  ;;  %v293_v37 = vadd.f32 1e-05, %v289_v35 }
 0x240   :  { %v295_v2 = vmul.f32 %v427_v36, %v292_v30  ;;  %vm301_vm6 = vweird.f32 %v427_v36 }
 0x241   :  { %428 = vrsqrt.f32 %v293_v37  ;;  %vm302_vm8 = vmor %vm300_vm7, %vm301_vm6  ;;  %vm310_vm10 = vweird.f32 %v293_v37 }
 0x242   :  { %v296_v38 = vmul.f32 %v427_v36, %v295_v2 }
 0x244   :  { %v297_v39 = vmul.f32 0.5, %v296_v38 }
 0x246   :  { %v298_v40 = vsub.f32 1.5, %v297_v39 }
 0x247   :  { %v429_v41 = vpop.eup %428 }
 0x248   :  { %v299_v42 = vmul.f32 %v427_v36, %v298_v40  ;;  %v305_v43 = vmul.f32 %v429_v41, %v293_v37  ;;  %vm311_vm9 = vweird.f32 %v429_v41 }
 0x249   :  { %vm312_vm11 = vmor %vm310_vm10, %vm311_vm9 }
 0x24a   :  { %v303_v46 = vsel %vm302_vm8, %v427_v36, %v299_v42  ;;  %v306_v47 = vmul.f32 %v429_v41, %v305_v43 }
 0x24b   :  { %v314_v49 = vmul.f32 %v303_v46, %v290_v44 }
 0x24c   :  { %v307_v50 = vmul.f32 0.5, %v306_v47 }
 0x24d   :  { %v319_v51 = vmul.f32 %v416_v45, %v314_v49 }
 0x24e   :  { %v308_v52 = vsub.f32 1.5, %v307_v50 }
 0x24f   :  { %v324_v53 = vadd.f32 %v417_v48, %v319_v51 }
 0x250   :  { %v309_v54 = vmul.f32 %v429_v41, %v308_v52 }
 0x251   :  { %326 = vst [vmem:[%s581_s9] sm:$0xff] %v324_v53 }
 0x252   :  { %v313_v56 = vsel %vm312_vm11, %v429_v41, %v309_v54 }
 0x253   :  { %v315_v57 = vmul.f32 %v313_v56, %v291_v55 }
 0x255   :  { %v320_v58 = vmul.f32 %v416_v45, %v315_v57 }
 0x257   :  { %v325_v59 = vadd.f32 %v417_v48, %v320_v58 }
 0x259   :  { %327 = vst [vmem:[%s581_s9 + $0x8] sm:$0xff] %v325_v59 }

// kernel: _lambda_.15
= control target key start
LH: loop header
LB: loop body
LE: loop exit
PB: predicated region body
PF: predicated region fallthrough
CT: control target
= control target key end

     0   :  { %12 = vsyncpa [#allocation3], 0  ;;  %s404_s27 = smov [#allocation2]   ;;  %s531_s0 = inlined_call_operand.vmem [shape: f32[16,128], index: 0, kind: input, shape index: {}]   ;;  %s532_s1 = inlined_call_operand.vmem [shape: f32[1,128], index: 1, kind: input, shape index: {}]   ;;  %s533_s2 = inlined_call_operand.vmem [shape: f32[1,128], index: 2, kind: input, shape index: {}]   ;;  %s534_s3 = inlined_call_operand.vmem [shape: bf16[128,128], index: 3, kind: input, shape index: {}]   ;;  %s535_s4 = inlined_call_operand.vmem [shape: f32[1,128], index: 4, kind: input, shape index: {}]   ;;  %s536_s5 = inlined_call_operand.vmem [shape: bf16[128,128], index: 5, kind: input, shape index: {}]   ;;  %s537_s6 = inlined_call_operand.hbm [shape: f32[1,128], index: 6, kind: input, shape index: {}]   ;;  %s538_s7 = inlined_call_operand.vmem [shape: f32[16,128], index: 7, kind: output, shape index: {}]  }
   0x1   :  { %s30_s26 = sshll.u32 %s537_s6, 4  ;;  %s32_s28 = sshll.u32 %s404_s27, 4  ;;  %s31_s26 = int_to_ptr.hbm [resolvable:$true] %s30_s26  ;;  %s33_s28 = int_to_ptr.vmem [resolvable:$true] %s32_s28 }
   0x2   :  { %35 = dma.hbm_to_vmem [thread:$0]  %s31_s26, 16, %s33_s28, [#allocation3]  }
   0x3   :  { %402 = dma.done.wait [#allocation3], 16  }
   0x4   :  { %403 = vsyncadd [#allocation3], 4294967280  ;;  %v451_v0 = vld [vmem:[%s531_s0] sm:$0xff]  ;;  %v459_v2 = vld [vmem:[%s531_s0 + $0x8] sm:$0xff] }
   0x5   :  { %44 = vadd.xlane.f32.xlu0 %v451_v0  ;;  %v50_v1 = vmul.f32 %v451_v0, %v451_v0  ;;  %v51_v3 = vmul.f32 %v459_v2, %v459_v2  ;;  %v356_v4 = vld [vmem:[%s534_s3 + $0x38] sm:$0xff]  ;;  %v355_v5 = vld [vmem:[%s534_s3 + $0x30] sm:$0xff]  ;;  %v354_v6 = vld [vmem:[%s534_s3 + $0x28] sm:$0xff] }
   0x6   :  { %167 = vmatpush.bf16.msra.mxu0 %v356_v4  ;;  %v353_v7 = vld [vmem:[%s534_s3 + $0x20] sm:$0xff]  ;;  %v352_v8 = vld [vmem:[%s534_s3 + $0x18] sm:$0xff]  ;;  %v351_v9 = vld [vmem:[%s534_s3 + $0x10] sm:$0xff] }
   0x7   :  { %52 = vadd.xlane.f32.xlu1 %v50_v1  ;;  %v350_v11 = vld [vmem:[%s534_s3 + $0x8] sm:$0xff]  ;;  %v349_v16 = vld [vmem:[%s534_s3] sm:$0xff]  ;;  %v364_v24 = vld [vmem:[%s536_s5 + $0x38] sm:$0xff] }
   0x8   :  { %260 = vmatpush.bf16.msra.mxu1 %v364_v24  ;;  %v366_v41 = vld [vmem:[%s532_s1] ss:$0 sm:$0xff]  ;;  %v363_v52 = vld [vmem:[%s536_s5 + $0x30] sm:$0xff]  ;;  %v362_v53 = vld [vmem:[%s536_s5 + $0x28] sm:$0xff] }
   0x9   :  { %v367_v47 = vld [vmem:[%s533_s2] ss:$0 sm:$0xff]  ;;  %v360_v55 = vld [vmem:[%s536_s5 + $0x18] sm:$0xff]  ;;  %v359_v56 = vld [vmem:[%s536_s5 + $0x10] sm:$0xff] }
   0xa   :  { %168 = vmatpush.bf16.msra.mxu0 %v355_v5  ;;  %v361_v54 = vld [vmem:[%s536_s5 + $0x20] sm:$0xff]  ;;  %v358_v57 = vld [vmem:[%s536_s5 + $0x8] sm:$0xff] }
   0xb   :  { %v357_v58 = vld [vmem:[%s536_s5] sm:$0xff] }
   0xc   :  { %261 = vmatpush.bf16.msra.mxu1 %v363_v52  ;;  %v368_v59 = vld [vmem:[%s535_s4] ss:$0 sm:$0xff] }
   0xd   :  { %46 = vadd.xlane.f32.xlu0 %v459_v2 }
   0xe   :  { %169 = vmatpush.bf16.msra.mxu0 %v354_v6 }
   0xf   :  { %54 = vadd.xlane.f32.xlu1 %v51_v3 }
  0x10   :  { %262 = vmatpush.bf16.msra.mxu1 %v362_v53 }
  0x12   :  { %170 = vmatpush.bf16.msra.mxu0 %v353_v7 }
  0x14   :  { %263 = vmatpush.bf16.msra.mxu1 %v361_v54 }
  0x16   :  { %171 = vmatpush.bf16.msra.mxu0 %v352_v8 }
  0x18   :  { %264 = vmatpush.bf16.msra.mxu1 %v360_v55 }
  0x1a   :  { %172 = vmatpush.bf16.msra.mxu0 %v351_v9 }
  0x1c   :  { %265 = vmatpush.bf16.msra.mxu1 %v359_v56 }
  0x1e   :  { %173 = vmatpush.bf16.msra.mxu0 %v350_v11 }
  0x20   :  { %266 = vmatpush.bf16.msra.mxu1 %v358_v57 }
  0x22   :  { %174 = vmatpush.bf16.msra.mxu0 %v349_v16 }
  0x24   :  { %267 = vmatpush.bf16.msra.mxu1 %v357_v58 }
  0x78   :  { %v45_v10 = vpop.xlane.xlu0 %44 }
  0x79   :  { %v48_v12 = vmul.f32 0.03125, %v45_v10 }
  0x7a   :  { %v53_v13 = vpop.xlane.xlu1 %52 }
  0x7b   :  { %v58_v14 = vmul.f32 %v48_v12, %v48_v12  ;;  %v56_v15 = vmul.f32 0.03125, %v53_v13  ;;  %v62_v38 = vsub.f32 %v451_v0, %v48_v12  ;;  %v369_v13 = vld [vmem:[#allocation2] ss:$0 sm:$0xff] }
  0x7d   :  { %v60_v17 = vsub.f32 %v56_v15, %v58_v14 }
  0x7f   :  { %v64_v18 = vadd.f32 1e-05, %v60_v17 }
  0x80   :  { %v47_v19 = vpop.xlane.xlu0 %46 }
  0x81   :  { %370 = vrsqrt.f32 %v64_v18  ;;  %v49_v20 = vmul.f32 0.03125, %v47_v19  ;;  %vm72_vm1 = vweird.f32 %v64_v18 }
  0x82   :  { %v55_v21 = vpop.xlane.xlu1 %54 }
  0x83   :  { %v59_v22 = vmul.f32 %v49_v20, %v49_v20  ;;  %v57_v23 = vmul.f32 0.03125, %v55_v21  ;;  %v63_v43 = vsub.f32 %v459_v2, %v49_v20 }
  0x85   :  { %v61_v25 = vsub.f32 %v57_v23, %v59_v22 }
  0x87   :  { %v371_v26 = vpop.eup %370  ;;  %v65_v27 = vadd.f32 1e-05, %v61_v25 }
  0x88   :  { %v67_v28 = vmul.f32 %v371_v26, %v64_v18  ;;  %vm73_vm0 = vweird.f32 %v371_v26 }
  0x89   :  { %372 = vrsqrt.f32 %v65_v27  ;;  %vm74_vm2 = vmor %vm72_vm1, %vm73_vm0  ;;  %vm82_vm4 = vweird.f32 %v65_v27 }
  0x8a   :  { %v68_v29 = vmul.f32 %v371_v26, %v67_v28 }
  0x8c   :  { %v69_v30 = vmul.f32 0.5, %v68_v29 }
  0x8e   :  { %v70_v31 = vsub.f32 1.5, %v69_v30 }
  0x8f   :  { %v373_v32 = vpop.eup %372 }
  0x90   :  { %v71_v33 = vmul.f32 %v371_v26, %v70_v31  ;;  %v77_v34 = vmul.f32 %v373_v32, %v65_v27  ;;  %vm83_vm3 = vweird.f32 %v373_v32 }
  0x91   :  { %vm84_vm5 = vmor %vm82_vm4, %vm83_vm3 }
  0x92   :  { %v78_v35 = vmul.f32 %v373_v32, %v77_v34  ;;  %v75_v37 = vsel %vm74_vm2, %v371_v26, %v71_v33 }
  0x93   :  { %v86_v40 = vmul.f32 %v75_v37, %v62_v38 }
  0x94   :  { %v79_v36 = vmul.f32 0.5, %v78_v35 }
  0x95   :  { %v91_v46 = vmul.f32 %v366_v41, %v86_v40 }
  0x96   :  { %v80_v39 = vsub.f32 1.5, %v79_v36 }
  0x97   :  { %v96_v49 = vadd.f32 %v367_v47, %v91_v46 }
  0x98   :  { %v81_v42 = vmul.f32 %v373_v32, %v80_v39 }
  0x9a   :  { %v85_v44 = vsel %vm84_vm5, %v373_v32, %v81_v42 }
  0x9b   :  { %v87_v45 = vmul.f32 %v85_v44, %v63_v43 }
  0x9d   :  { %v92_v48 = vmul.f32 %v366_v41, %v87_v45 }
  0x9f   :  { %v97_v50 = vadd.f32 %v367_v47, %v92_v48 }
  0xa1   :  { %v98_v51 = vpack.c.bf16 %v97_v50, %v96_v49 }
  0xa3   :  { %175 = vmatmul.bf16.vlgmr.msra.gmra.mxu0 %v98_v51 }
 0x120   :  { %v176_v60 = vpop.f32.mrf.mxu0 }
 0x121   :  { %v177_v61 = vadd.f32 %v368_v59, %v176_v60 }
 0x123   :  { %v181_v62 = vmul.f32 0.5, %v177_v61 }
 0x125   :  { %374 = vtanh.f32 %v181_v62 }
 0x128   :  { %v178_v63 = vpop.f32.mrf.mxu0 }
 0x129   :  { %v179_v1 = vadd.f32 %v368_v59, %v178_v63 }
 0x12b   :  { %v182_v3 = vmul.f32 0.5, %v179_v1  ;;  %v375_v4 = vpop.eup %374 }
 0x12c   :  { %v185_v5 = vadd.f32 1.0, %v375_v4 }
 0x12d   :  { %376 = vtanh.f32 %v182_v3 }
 0x12e   :  { %v187_v7 = vmul.f32 0.5, %v185_v5 }
 0x130   :  { %v189_v10 = vmul.f32 %v187_v7, %v177_v61 }
 0x133   :  { %v377_v6 = vpop.eup %376 }
 0x134   :  { %v186_v8 = vadd.f32 1.0, %v377_v6 }
 0x136   :  { %v188_v9 = vmul.f32 0.5, %v186_v8 }
 0x138   :  { %v190_v11 = vmul.f32 %v188_v9, %v179_v1 }
 0x13a   :  { %v191_v12 = vpack.c.bf16 %v190_v11, %v189_v10 }
 0x13c   :  { %268 = vmatmul.bf16.vlgmr.msra.gmra.mxu1 %v191_v12 }
 0x1b9   :  { %v269_v14 = vpop.f32.mrf.mxu1 }
 0x1ba   :  { %v270_v15 = vadd.f32 %v369_v13, %v269_v14 }
 0x1bc   :  { %v274_v16 = vmul.f32 0.5, %v270_v15 }
 0x1be   :  { %v276_v17 = vadd.f32 %v274_v16, %v451_v0 }
 0x1c0   :  { %278 = vst [vmem:[%s538_s7] sm:$0xff] %v276_v17 }
 0x1c1   :  { %v271_v18 = vpop.f32.mrf.mxu1 }
 0x1c2   :  { %v272_v19 = vadd.f32 %v369_v13, %v271_v18 }
 0x1c4   :  { %v275_v20 = vmul.f32 0.5, %v272_v19 }
 0x1c6   :  { %v277_v21 = vadd.f32 %v275_v20, %v459_v2 }
 0x1c8   :  { %279 = vst [vmem:[%s538_s7 + $0x8] sm:$0xff] %v277_v21 }
 0x1c9   :  { %284 = vsyncpa [#allocation3], 1 }

// kernel: _lambda_.12
= control target key start
LH: loop header
LB: loop body
LE: loop exit
PB: predicated region body
PF: predicated region fallthrough
CT: control target
= control target key end

     0   :  { %s1652_s30 = smov 0   ;;  %s1892_s0 = inlined_call_operand.vmem [shape: f32[2,8,128], index: 0, kind: input, shape index: {}]   ;;  %s1893_s1 = inlined_call_operand.vmem [shape: f32[1,128], index: 1, kind: input, shape index: {}]   ;;  %s1894_s2 = inlined_call_operand.vmem [shape: f32[1,128], index: 2, kind: input, shape index: {}]   ;;  %s1895_s3 = inlined_call_operand.vmem [shape: bf16[2,128,64], index: 3, kind: input, shape index: {}]   ;;  %s1896_s4 = inlined_call_operand.vmem [shape: bf16[2,128,64], index: 4, kind: input, shape index: {}]   ;;  %s1897_s5 = inlined_call_operand.vmem [shape: bf16[2,128,64], index: 5, kind: input, shape index: {}]   ;;  %s1898_s6 = inlined_call_operand.vmem [shape: bf16[2,64,128], index: 6, kind: input, shape index: {}]   ;;  %s1899_s7 = inlined_call_operand.vmem [shape: f32[1,128], index: 7, kind: input, shape index: {}]   ;;  %s1900_s8 = inlined_call_operand.vmem [shape: bf16[64,128], index: 8, kind: input, shape index: {}]   ;;  %s1901_s9 = inlined_call_operand.vmem [shape: f32[2,8,128], index: 9, kind: output, shape index: {}]  }
   0x1 LB: > { %s1242_s10 = sadd.s32 4294967295, %s1593_s30   ;;  %p1246_p0 = scmp.ge.s32.totalorder %s1593_s30, 1  ;;  %s1593_s30 = sphi %s1652_s30, %s19_s30  }
   0x2   : > { %p286_p1 = scmp.lt.s32.totalorder %s1593_s30, 3 }
   0x4   : > { %p287_p2 = pnand %p1246_p0, %p286_p1 }
   0x5   : > { %p320_p3 = scmp.lt.s32.totalorder (!%p287_p2), %s1242_s10, 1  ;;  %s1595_s14 = smov (!%p287_p2), 1  }
   0x6   : > { %290 = sbr.rel (%p287_p2) target bundleno = 1762 (0x6e2), region = 56  ;;  %s1596_s16 = smov (!%p287_p2), 2  }
   0x7   : > { %s1597_s17 = smov (!%p287_p2), 4   ;;  %s1599_s19 = smov (!%p287_p2), 16  }
   0x8   : > { %s1600_s20 = smov (!%p287_p2), 32   ;;  %s1601_s21 = smov (!%p287_p2), 64  }
   0xb   : > { %v1506_v0 = vld [vmem:[%s1895_s3 + $0x38] sm:$0xff]  ;;  %s1903_s10 = smov (!%p320_p3, %s1242_s10), 1  ;;  %v1505_v4 = vld [vmem:[%s1895_s3 + $0x30] sm:$0xff]  ;;  %v1504_v6 = vld [vmem:[%s1895_s3 + $0x28] sm:$0xff]  ;;  %vm831_vm3 = vcmask 523264   ;;  %vm1047_vm4 = vcmask 1043456  }
   0xc   : > { %v1514_v1 = vld [vmem:[%s1895_s3 + $0x78] sm:$0xff]  ;;  %443 = vmatpush.bf16.msra.mxu0 %v1506_v0  ;;  %s1247_s15 = sshll.u32 %s1903_s10, 3  ;;  %v1513_v5 = vld [vmem:[%s1895_s3 + $0x70] sm:$0xff]  ;;  %v1512_v7 = vld [vmem:[%s1895_s3 + $0x68] sm:$0xff]  ;;  %vm1019_vm12 = vcmask 64512  }
   0xd   : > { %504 = vmatpush.bf16.msra.mxu1 %v1514_v1  ;;  %s323_s18 = scalar_lea.vmem %s1892_s0, %s1247_s15  ;;  %v1503_v8 = vld [vmem:[%s1895_s3 + $0x20] sm:$0xff]  ;;  %v1522_v10 = vld [vmem:[%s1896_s4 + $0x38] sm:$0xff]  ;;  %v1521_v14 = vld [vmem:[%s1896_s4 + $0x30] sm:$0xff]  ;;  %s327_s24 = scalar_lea.vmem %s1901_s9, %s1247_s15 }
   0xe   : > { %v1674_v2 = vld [vmem:[%s323_s18] sm:$0xff]  ;;  %v1530_v11 = vld [vmem:[%s1896_s4 + $0x78] sm:$0xff]  ;;  %597 = vmatpush.bf16.msra.mxu2 %v1522_v10  ;;  %v1529_v15 = vld [vmem:[%s1896_s4 + $0x70] sm:$0xff]  ;;  %s1598_s18 = smov 8  }
   0xf   : > { %332 = vadd.xlane.f32.xlu0 %v1674_v2  ;;  %v335_v3 = vmul.f32 %v1674_v2, %v1674_v2  ;;  %v1511_v9 = vld [vmem:[%s1895_s3 + $0x60] sm:$0xff]  ;;  %658 = vmatpush.bf16.msra.mxu3 %v1530_v11  ;;  %v1502_v12 = vld [vmem:[%s1895_s3 + $0x18] sm:$0xff]  ;;  %v1501_v16 = vld [vmem:[%s1895_s3 + $0x10] sm:$0xff] }
  0x10   : > { %444 = vmatpush.bf16.msra.mxu0 %v1505_v4  ;;  %v1510_v13 = vld [vmem:[%s1895_s3 + $0x58] sm:$0xff]  ;;  %v1509_v17 = vld [vmem:[%s1895_s3 + $0x50] sm:$0xff]  ;;  %v1520_v18 = vld [vmem:[%s1896_s4 + $0x28] sm:$0xff] }
  0x11   : > { %505 = vmatpush.bf16.msra.mxu1 %v1513_v5  ;;  %v1528_v19 = vld [vmem:[%s1896_s4 + $0x68] sm:$0xff]  ;;  %v1519_v22 = vld [vmem:[%s1896_s4 + $0x20] sm:$0xff]  ;;  %v1518_v26 = vld [vmem:[%s1896_s4 + $0x18] sm:$0xff] }
  0x12   : > { %598 = vmatpush.bf16.msra.mxu2 %v1521_v14  ;;  %v1500_v20 = vld [vmem:[%s1895_s3 + $0x8] sm:$0xff]  ;;  %v1527_v23 = vld [vmem:[%s1896_s4 + $0x60] sm:$0xff]  ;;  %v1526_v27 = vld [vmem:[%s1896_s4 + $0x58] sm:$0xff] }
  0x13   : > { %659 = vmatpush.bf16.msra.mxu3 %v1529_v15  ;;  %v1508_v21 = vld [vmem:[%s1895_s3 + $0x48] sm:$0xff]  ;;  %v1499_v24 = vld [vmem:[%s1895_s3] sm:$0xff]  ;;  %v1538_v28 = vld [vmem:[%s1897_s5 + $0x38] sm:$0xff] }
  0x14   : > { %445 = vmatpush.bf16.msra.mxu0 %v1504_v6  ;;  %v1507_v25 = vld [vmem:[%s1895_s3 + $0x40] sm:$0xff]  ;;  %v1546_v29 = vld [vmem:[%s1897_s5 + $0x78] sm:$0xff]  ;;  %v1517_v30 = vld [vmem:[%s1896_s4 + $0x10] sm:$0xff] }
  0x15   : > { %506 = vmatpush.bf16.msra.mxu1 %v1512_v7  ;;  %v1525_v31 = vld [vmem:[%s1896_s4 + $0x50] sm:$0xff]  ;;  %v1516_v35 = vld [vmem:[%s1896_s4 + $0x8] sm:$0xff]  ;;  %v1515_v39 = vld [vmem:[%s1896_s4] sm:$0xff] }
  0x16   : > { %599 = vmatpush.bf16.msra.mxu2 %v1520_v18  ;;  %v1537_v32 = vld [vmem:[%s1897_s5 + $0x30] sm:$0xff]  ;;  %v1524_v36 = vld [vmem:[%s1896_s4 + $0x48] sm:$0xff]  ;;  %v1523_v40 = vld [vmem:[%s1896_s4 + $0x40] sm:$0xff] }
  0x17   : > { %336 = vadd.xlane.f32.xlu0 %v335_v3  ;;  %660 = vmatpush.bf16.msra.mxu3 %v1528_v19  ;;  %v1545_v33 = vld [vmem:[%s1897_s5 + $0x70] sm:$0xff]  ;;  %v1536_v37 = vld [vmem:[%s1897_s5 + $0x28] sm:$0xff]  ;;  %v1535_v41 = vld [vmem:[%s1897_s5 + $0x20] sm:$0xff] }
  0x18   : > { %446 = vmatpush.bf16.msra.mxu0 %v1503_v8  ;;  %v1544_v38 = vld [vmem:[%s1897_s5 + $0x68] sm:$0xff]  ;;  %v1543_v43 = vld [vmem:[%s1897_s5 + $0x60] sm:$0xff]  ;;  %v1534_v47 = vld [vmem:[%s1897_s5 + $0x18] sm:$0xff] }
  0x19   : > { %507 = vmatpush.bf16.msra.mxu1 %v1511_v9  ;;  %v1542_v48 = vld [vmem:[%s1897_s5 + $0x58] sm:$0xff]  ;;  %v1533_v50 = vld [vmem:[%s1897_s5 + $0x10] sm:$0xff]  ;;  %v1532_v53 = vld [vmem:[%s1897_s5 + $0x8] sm:$0xff] }
  0x1a   : > { %600 = vmatpush.bf16.msra.mxu2 %v1519_v22  ;;  %v1541_v51 = vld [vmem:[%s1897_s5 + $0x50] sm:$0xff]  ;;  %v1540_v54 = vld [vmem:[%s1897_s5 + $0x48] sm:$0xff]  ;;  %v1531_v55 = vld [vmem:[%s1897_s5] sm:$0xff] }
  0x1b   : > { %661 = vmatpush.bf16.msra.mxu3 %v1527_v23  ;;  %v1539_v56 = vld [vmem:[%s1897_s5 + $0x40] sm:$0xff]  ;;  %v1549_v19 = vld [vmem:[%s1900_s8 + $0x10] sm:$0xff] }
  0x1c   : > { %447 = vmatpush.bf16.msra.mxu0 %v1502_v12  ;;  %v1574_v0 = vld [vmem:[%s1893_s1] ss:$0 sm:$0xff] }
  0x1d   : > { %508 = vmatpush.bf16.msra.mxu1 %v1510_v13  ;;  %v1575_v3 = vld [vmem:[%s1894_s2] ss:$0 sm:$0xff] }
  0x1e   : > { %601 = vmatpush.bf16.msra.mxu2 %v1518_v26 }
  0x1f   : > { %662 = vmatpush.bf16.msra.mxu3 %v1526_v27 }
  0x20   : > { %448 = vmatpush.bf16.msra.mxu0 %v1501_v16  ;;  %v1550_v16 = vld [vmem:[%s1900_s8 + $0x18] sm:$0xff] }
  0x21   : > { %509 = vmatpush.bf16.msra.mxu1 %v1509_v17 }
  0x22   : > { %602 = vmatpush.bf16.msra.mxu2 %v1517_v30 }
  0x23   : > { %663 = vmatpush.bf16.msra.mxu3 %v1525_v31  ;;  %v1547_v31 = vld [vmem:[%s1900_s8] sm:$0xff] }
  0x24   : > { %449 = vmatpush.bf16.msra.mxu0 %v1500_v20 }
  0x25   : > { %510 = vmatpush.bf16.msra.mxu1 %v1508_v21 }
  0x26   : > { %603 = vmatpush.bf16.msra.mxu2 %v1516_v35 }
  0x27   : > { %664 = vmatpush.bf16.msra.mxu3 %v1524_v36 }
  0x28   : > { %450 = vmatpush.bf16.msra.mxu0 %v1499_v24 }
  0x29   : > { %511 = vmatpush.bf16.msra.mxu1 %v1507_v25 }
  0x2a   : > { %604 = vmatpush.bf16.msra.mxu2 %v1515_v39 }
  0x2b   : > { %665 = vmatpush.bf16.msra.mxu3 %v1523_v40 }
  0x2c   : > { %751 = vmatpush.bf16.msrb.mxu0 %v1538_v28  ;;  %v1548_v28 = vld [vmem:[%s1900_s8 + $0x8] sm:$0xff] }
  0x2d   : > { %812 = vmatpush.bf16.msrb.mxu1 %v1546_v29 }
  0x30   : > { %752 = vmatpush.bf16.msrb.mxu0 %v1537_v32 }
  0x31   : > { %813 = vmatpush.bf16.msrb.mxu1 %v1545_v33 }
  0x34   : > { %753 = vmatpush.bf16.msrb.mxu0 %v1536_v37 }
  0x35   : > { %814 = vmatpush.bf16.msrb.mxu1 %v1544_v38 }
  0x38   : > { %754 = vmatpush.bf16.msrb.mxu0 %v1535_v41 }
  0x39   : > { %815 = vmatpush.bf16.msrb.mxu1 %v1543_v43 }
  0x3c   : > { %755 = vmatpush.bf16.msrb.mxu0 %v1534_v47 }
  0x3d   : > { %816 = vmatpush.bf16.msrb.mxu1 %v1542_v48 }
  0x40   : > { %756 = vmatpush.bf16.msrb.mxu0 %v1533_v50 }
  0x41   : > { %817 = vmatpush.bf16.msrb.mxu1 %v1541_v51 }
  0x44   : > { %757 = vmatpush.bf16.msrb.mxu0 %v1532_v53 }
  0x45   : > { %818 = vmatpush.bf16.msrb.mxu1 %v1540_v54 }
  0x48   : > { %758 = vmatpush.bf16.msrb.mxu0 %v1531_v55 }
  0x49   : > { %819 = vmatpush.bf16.msrb.mxu1 %v1539_v56 }
  0x82   : > { %v333_v34 = vpop.xlane.xlu0 %332 }
  0x83   : > { %v334_v42 = vmul.f32 0.03125, %v333_v34 }
  0x85   : > { %v339_v45 = vmul.f32 %v334_v42, %v334_v42  ;;  %v341_v63 = vsub.f32 %v1674_v2, %v334_v42 }
  0x8a   : > { %v337_v44 = vpop.xlane.xlu0 %336 }
  0x8b   : > { %v338_v46 = vmul.f32 0.03125, %v337_v44  ;;  %v932_v44 = vlaneseq }
  0x8d   : > { %v340_v49 = vsub.f32 %v338_v46, %v339_v45  ;;  %v933_v45 = vshrl.u32 %v932_v44, 7 }
  0x8f   : > { %v342_v52 = vadd.f32 1e-05, %v340_v49  ;;  %v934_v46 = vadd.s32 121, %v933_v45 }
  0x91   : > { %1577 = vrsqrt.f32 %v342_v52  ;;  %vm349_vm1 = vweird.f32 %v342_v52  ;;  %v939_v47 = vand.u32 127, %v934_v46 }
  0x93   : > { %v951_v48 = vand.u32 1, %v939_v47  ;;  %v961_v53 = vand.u32 2, %v939_v47 }
  0x95   : > { %vm952_vm5 = vcmp.ne.s32.totalorder %v951_v48, 0  ;;  %vm962_vm6 = vcmp.ne.s32.totalorder %v961_v53, 0  ;;  %v1558_v48 = vld [vmem:[%s1898_s6 + $0x38] sm:$0xff] }
  0x97   : > { %v1578_v57 = vpop.eup %1577 }
  0x98   : > { %v344_v58 = vmul.f32 %v1578_v57, %v342_v52  ;;  %vm350_vm0 = vweird.f32 %v1578_v57 }
  0x99   : > { %vm351_vm2 = vmor %vm349_vm1, %vm350_vm0 }
  0x9a   : > { %v345_v59 = vmul.f32 %v1578_v57, %v344_v58  ;;  %v971_v58 = vand.u32 4, %v939_v47 }
  0x9c   : > { %v346_v60 = vmul.f32 0.5, %v345_v59  ;;  %vm972_vm7 = vcmp.ne.s32.totalorder %v971_v58, 0 }
  0x9e   : > { %v347_v61 = vsub.f32 1.5, %v346_v60 }
  0xa0   : > { %v348_v62 = vmul.f32 %v1578_v57, %v347_v61 }
  0xa2   : > { %v352_v1 = vsel %vm351_vm2, %v1578_v57, %v348_v62 }
  0xa3   : > { %v353_v4 = vmul.f32 %v352_v1, %v341_v63  ;;  %v981_v63 = vand.u32 8, %v939_v47 }
  0xa5   : > { %v357_v5 = vmul.f32 %v1574_v0, %v353_v4  ;;  %vm982_vm8 = vcmp.ne.s32.totalorder %v981_v63, 0 }
  0xa7   : > { %v361_v6 = vadd.f32 %v1575_v3, %v357_v5  ;;  %v991_v5 = vand.u32 16, %v939_v47 }
  0xa9   : > { %v362_v7 = vpack.c.bf16 %v361_v6, %v361_v6  ;;  %vm992_vm9 = vcmp.ne.s32.totalorder %v991_v5, 0 }
  0xab   : > { %451 = vmatmul.bf16.vlgmr.msra.gmra.mxu0 %v362_v7  ;;  %512 = vmatmul.bf16.vlgmr.msra.gmra.mxu1 %v362_v7 }
  0xac   : > { %605 = vmatmul.bf16.vlgmr.msra.gmra.mxu2 %v362_v7  ;;  %666 = vmatmul.bf16.vlgmr.msra.gmra.mxu3 %v362_v7 }
  0xbb   : > { %759 = vmatmul.bf16.vlgmr.msrb.gmra.mxu0 %v362_v7  ;;  %820 = vmatmul.bf16.vlgmr.msrb.gmra.mxu1 %v362_v7 }
 0x128   : > { %v452_v8 = vpop.f32.mrf.mxu0  ;;  %v513_v9 = vpop.f32.mrf.mxu1 }
 0x129   : > { %v825_v22 = vpack.c.bf16 %v452_v8, %v452_v8  ;;  %v826_v23 = vpack.c.bf16 %v513_v9, %v513_v9 }
 0x12f   : > { %v606_v10 = vpop.f32.mrf.mxu2  ;;  %v667_v11 = vpop.f32.mrf.mxu3 }
 0x130   : > { %v827_v12 = vpack.c.bf16 %v606_v10, %v606_v10  ;;  %v828_v13 = vpack.c.bf16 %v667_v11, %v667_v11  ;;  %v454_v14 = vpop.f32.mrf.mxu0  ;;  %v515_v15 = vpop.f32.mrf.mxu1  ;;  %v1001_v10 = vand.u32 32, %v939_v47 }
 0x131   : > { %v1011_v15 = vand.u32 64, %v939_v47  ;;  %v1551_v47 = vld [vmem:[%s1898_s6] sm:$0xff] }
 0x132   : > { %v836_v17 = vsel %vm831_vm3, %v827_v12, 0  ;;  %v855_v18 = vsel %vm831_vm3, %v828_v13, 0  ;;  %vm1002_vm10 = vcmp.ne.s32.totalorder %v1001_v10, 0 }
 0x133   : > { %845 = vmatpush.bf16.xpose.msrb.mxu2 %v836_v17  ;;  %864 = vmatpush.bf16.xpose.msrb.mxu3 %v855_v18  ;;  %vm1012_vm11 = vcmp.ne.s32.totalorder %v1011_v15, 0 }
 0x137   : > { %v608_v20 = vpop.f32.mrf.mxu2  ;;  %v669_v21 = vpop.f32.mrf.mxu3 }
 0x138   : > { %v760_v24 = vpop.f32.mrf.mxu0  ;;  %v821_v25 = vpop.f32.mrf.mxu1 }
 0x139   : > { %v829_v26 = vpack.c.bf16 %v760_v24, %v760_v24  ;;  %v830_v27 = vpack.c.bf16 %v821_v25, %v821_v25 }
 0x13a   : > { %1441 = vmatmul.msk.bf16.vlgmr.msrb.gmra.mxu2 %vm831_vm3, %v825_v22  ;;  %1442 = vmatmul.msk.bf16.vlgmr.msrb.gmra.mxu3 %vm831_vm3, %v826_v23 }
 0x13b   : > { %908 = vmatpush.bf16.msra.mxu2 %v1550_v16  ;;  %921 = vmatpush.bf16.msra.mxu3 %v1550_v16  ;;  %v1049_v29 = vsel %vm1047_vm4, %v829_v26, 0  ;;  %v1068_v30 = vsel %vm1047_vm4, %v830_v27, 0 }
 0x13c   : > { %1058 = vmatpush.bf16.msra.mxu0 %v1049_v29  ;;  %1077 = vmatpush.bf16.msra.mxu1 %v1068_v30 }
 0x13f   : > { %909 = vmatpush.bf16.msra.mxu2 %v1549_v19  ;;  %922 = vmatpush.bf16.msra.mxu3 %v1549_v19 }
 0x140   : > { %v762_v32 = vpop.f32.mrf.mxu0  ;;  %v823_v33 = vpop.f32.mrf.mxu1 }
 0x143   : > { %910 = vmatpush.bf16.msra.mxu2 %v1548_v28  ;;  %923 = vmatpush.bf16.msra.mxu3 %v1548_v28 }
 0x147   : > { %911 = vmatpush.bf16.msra.mxu2 %v1547_v31  ;;  %924 = vmatpush.bf16.msra.mxu3 %v1547_v31 }
 0x14a   : > { %1459 = vmatmul.msk.bf16.vlgmr.msra.gmra.mxu2 %vm831_vm3, %v825_v22  ;;  %1460 = vmatmul.msk.bf16.vlgmr.msra.gmra.mxu3 %vm831_vm3, %v826_v23 }
 0x14b   : > { %1172 = vmatpush.bf16.msrb.mxu3 %v1558_v48 }
 0x1bd   : > { %v1842_v34 = vpop.f32.mrf.mxu2  ;;  %v1844_v35 = vpop.f32.mrf.mxu3 }
 0x1be   : > { %v870_v16 = vmul.f32 0.125, %v1842_v34  ;;  %v871_v21 = vmul.f32 0.125, %v1844_v35 }
 0x1c5   : > { %v849_v36 = vpop.f32.mrf.mxu2  ;;  %v868_v37 = vpop.f32.mrf.mxu3 }
 0x1cd   : > { %v913_v38 = vpop.f32.mrf.mxu2  ;;  %v926_v39 = vpop.f32.mrf.mxu3 }
 0x1ce   : > { %v930_v40 = vmul.f32 0.125, %v913_v38  ;;  %v931_v43 = vmul.f32 0.125, %v926_v39 }
 0x1d0   : > { %947 = vrot.lane.b32.xlu1 %v930_v40, %s1595_s14 }
 0x1d5   : > { %v915_v41 = vpop.f32.mrf.mxu2  ;;  %v928_v42 = vpop.f32.mrf.mxu3 }
 0x1d6   : > { %v1553_v41 = vld [vmem:[%s1898_s6 + $0x10] sm:$0xff]  ;;  %v1552_v42 = vld [vmem:[%s1898_s6 + $0x8] sm:$0xff] }
 0x1d8   : > { %949 = vrot.lane.b32.xlu1 %v931_v43, %s1595_s14 }
 0x242   : > { %v948_v49 = vpop.permute.xlu1 %947 }
 0x243   : > { %v955_v50 = vsel %vm952_vm5, %v948_v49, %v930_v40  ;;  %v1554_v40 = vld [vmem:[%s1898_s6 + $0x18] sm:$0xff]  ;;  %v1557_v49 = vld [vmem:[%s1898_s6 + $0x30] sm:$0xff] }
 0x244   : > { %957 = vrot.lane.b32.xlu2 %v955_v50, %s1596_s16  ;;  %1132 = vmatpush.bf16.msrb.mxu2 %v1554_v40 }
 0x245   : > { %1173 = vmatpush.bf16.msrb.mxu3 %v1557_v49 }
 0x248   : > { %1133 = vmatpush.bf16.msrb.mxu2 %v1553_v41 }
 0x24a   : > { %v950_v51 = vpop.permute.xlu1 %949 }
 0x24b   : > { %v956_v52 = vsel %vm952_vm5, %v950_v51, %v931_v43 }
 0x24c   : > { %959 = vrot.lane.b32.xlu2 %v956_v52, %s1596_s16  ;;  %1134 = vmatpush.bf16.msrb.mxu2 %v1552_v42 }
 0x250   : > { %1135 = vmatpush.bf16.msrb.mxu2 %v1551_v47 }
 0x29e   : > { %v958_v54 = vpop.permute.xlu2 %957 }
 0x29f   : > { %v965_v55 = vsel %vm962_vm6, %v958_v54, %v955_v50  ;;  %v1556_v50 = vld [vmem:[%s1898_s6 + $0x28] sm:$0xff]  ;;  %v1555_v54 = vld [vmem:[%s1898_s6 + $0x20] sm:$0xff] }
 0x2a0   : > { %967 = vrot.lane.b32.xlu0 %v965_v55, %s1597_s17  ;;  %1174 = vmatpush.bf16.msrb.mxu3 %v1556_v50 }
 0x2a4   : > { %1175 = vmatpush.bf16.msrb.mxu3 %v1555_v54 }
 0x2a6   : > { %v960_v56 = vpop.permute.xlu2 %959 }
 0x2a7   : > { %v966_v57 = vsel %vm962_vm6, %v960_v56, %v956_v52 }
 0x2a8   : > { %969 = vrot.lane.b32.xlu1 %v966_v57, %s1597_s17 }
 0x312   : > { %v968_v59 = vpop.permute.xlu0 %967 }
 0x313   : > { %v975_v60 = vsel %vm972_vm7, %v968_v59, %v965_v55 }
 0x314   : > { %977 = vrot.lane.b32.xlu2 %v975_v60, %s1598_s18 }
 0x31a   : > { %v970_v61 = vpop.permute.xlu1 %969 }
 0x31b   : > { %v976_v62 = vsel %vm972_vm7, %v970_v61, %v966_v57 }
 0x31c   : > { %979 = vrot.lane.b32.xlu1 %v976_v62, %s1598_s18 }
 0x36e   : > { %v978_v0 = vpop.permute.xlu2 %977 }
 0x36f   : > { %v985_v1 = vsel %vm982_vm8, %v978_v0, %v975_v60  ;;  %v1576_v60 = vld [vmem:[%s1899_s7] ss:$0 sm:$0xff] }
 0x370   : > { %987 = vrot.lane.b32.xlu2 %v985_v1, %s1599_s19 }
 0x38e   : > { %v980_v3 = vpop.permute.xlu1 %979 }
 0x38f   : > { %v986_v4 = vsel %vm982_vm8, %v980_v3, %v976_v62 }
 0x390   : > { %989 = vrot.lane.b32.xlu1 %v986_v4, %s1599_s19 }
 0x3ca   : > { %v988_v6 = vpop.permute.xlu2 %987 }
 0x3cb   : > { %v995_v7 = vsel %vm992_vm9, %v988_v6, %v985_v1 }
 0x3cc   : > { %997 = vrot.lane.b32.xlu2 %v995_v7, %s1600_s20 }
 0x402   : > { %v990_v8 = vpop.permute.xlu1 %989 }
 0x403   : > { %v996_v9 = vsel %vm992_vm9, %v990_v8, %v986_v4 }
 0x404   : > { %999 = vrot.lane.b32.xlu0 %v996_v9, %s1600_s20 }
 0x426   : > { %v998_v11 = vpop.permute.xlu2 %997 }
 0x427   : > { %v1005_v12 = vsel %vm1002_vm10, %v998_v11, %v995_v7 }
 0x428   : > { %1007 = vrot.lane.b32.xlu1 %v1005_v12, %s1601_s21 }
 0x476   : > { %v1000_v13 = vpop.permute.xlu0 %999 }
 0x477   : > { %v1006_v14 = vsel %vm1002_vm10, %v1000_v13, %v996_v9 }
 0x478   : > { %1009 = vrot.lane.b32.xlu2 %v1006_v14, %s1601_s21 }
 0x49a   : > { %v1008_v17 = vpop.permute.xlu1 %1007 }
 0x49b   : > { %v1015_v18 = vsel %vm1012_vm11, %v1008_v17, %v1005_v12 }
 0x49c   : > { %v1017_v19 = vadd.f32 %v1015_v18, %v870_v16 }
 0x49e   : > { %v1020_v20 = vsel %vm1019_vm12, %v1017_v19, -inf }
 0x49f   : > { %1021 = vmax.xlane.f32.xlu0 %v1020_v20 }
 0x4d2   : > { %v1010_v22 = vpop.permute.xlu2 %1009 }
 0x4d3   : > { %v1016_v23 = vsel %vm1012_vm11, %v1010_v22, %v1006_v14 }
 0x4d4   : > { %v1018_v24 = vadd.f32 %v1016_v23, %v871_v21 }
 0x4d6   : > { %v1023_v25 = vsel %vm1019_vm12, %v1018_v24, -inf }
 0x4d7   : > { %1024 = vmax.xlane.f32.xlu1 %v1023_v25 }
 0x512   : > { %v1022_v26 = vpop.xlane.xlu0 %1021 }
 0x513   : > { %v1026_v27 = vsub.f32 %v1017_v19, %v1022_v26 }
 0x515   : > { %v1028_v28 = vmul.f32 1.442695, %v1026_v27 }
 0x517   : > { %1579 = vpow2.f32 %v1028_v28 }
 0x51d   : > { %v1580_v29 = vpop.eup %1579 }
 0x51e   : > { %v1032_v30 = vsel %vm1019_vm12, %v1580_v29, 0.0 }
 0x51f   : > { %1033 = vadd.xlane.f32.xlu2 %v1032_v30 }
 0x54a   : > { %v1025_v31 = vpop.xlane.xlu1 %1024 }
 0x54b   : > { %v1027_v32 = vsub.f32 %v1018_v24, %v1025_v31 }
 0x54d   : > { %v1030_v33 = vmul.f32 1.442695, %v1027_v32 }
 0x54f   : > { %1581 = vpow2.f32 %v1030_v33 }
 0x555   : > { %v1582_v34 = vpop.eup %1581 }
 0x556   : > { %v1035_v35 = vsel %vm1019_vm12, %v1582_v34, 0.0 }
 0x557   : > { %1036 = vadd.xlane.f32.xlu0 %v1035_v35 }
 0x592   : > { %v1034_v36 = vpop.xlane.xlu2 %1033 }
 0x593   : > { %1583 = vrcp.f32 %v1034_v36 }
 0x599   : > { %v1584_v37 = vpop.eup %1583 }
 0x59a   : > { %v1040_v38 = vmul.f32 %v1584_v37, %v1580_v29 }
 0x59c   : > { %v1042_v39 = vpack.c.bf16 %v1040_v38, %v1040_v38 }
 0x59e   : > { %1461 = vmatmul.msk.bf16.vlgmr.msra.gmra.mxu0 %vm1019_vm12, %v1042_v39 }
 0x5ca   : > { %v1037_v43 = vpop.xlane.xlu0 %1036 }
 0x5cb   : > { %1585 = vrcp.f32 %v1037_v43 }
 0x5d1   : > { %v1586_v44 = vpop.eup %1585 }
 0x5d2   : > { %v1041_v45 = vmul.f32 %v1586_v44, %v1582_v34 }
 0x5d4   : > { %v1043_v46 = vpack.c.bf16 %v1041_v45, %v1041_v45 }
 0x5d6   : > { %1462 = vmatmul.msk.bf16.vlgmr.msra.gmra.mxu1 %vm1019_vm12, %v1043_v46 }
 0x61b   : > { %v1060_v51 = vpop.f32.mrf.mxu0 }
 0x61c   : > { %v1083_v52 = vpack.c.bf16 %v1060_v51, %v1060_v51 }
 0x61e   : > { %1479 = vmatmul.msk.bf16.vlgmr.msrb.gmra.mxu2 %vm831_vm3, %v1083_v52 }
 0x623   : > { %v1062_v53 = vpop.f32.mrf.mxu0 }
 0x653   : > { %v1079_v55 = vpop.f32.mrf.mxu1 }
 0x654   : > { %v1084_v56 = vpack.c.bf16 %v1079_v55, %v1079_v55 }
 0x656   : > { %1496 = vmatmul.msk.bf16.vlgmr.msrb.gmra.mxu3 %vm831_vm3, %v1084_v56 }
 0x65b   : > { %v1081_v57 = vpop.f32.mrf.mxu1 }
 0x6a1   : > { %v1137_v58 = vpop.f32.mrf.mxu2 }
 0x6a9   : > { %v1139_v59 = vpop.f32.mrf.mxu2 }
 0x6d9   : > { %v1177_v61 = vpop.f32.mrf.mxu3 }
 0x6da   : > { %v1181_v62 = vadd.f32 %v1177_v61, %v1137_v58 }
 0x6dc   : > { %v1186_v63 = vadd.f32 %v1576_v60, %v1181_v62 }
 0x6de   : > { %v1187_v0 = vadd.f32 %v1186_v63, %v1674_v2 }
 0x6e0   : > { %1188 = vst [vmem:[%s327_s24] sm:$0xff] %v1187_v0 }
 0x6e1   : > { %v1179_v1 = vpop.f32.mrf.mxu3 }
 0x6e2 PF: > { %s19_s30 = sadd.s32 1, %s1593_s30  }
 0x6e3   : > { %p16_p4 = scmp.ge.s32.totalorder %s19_s30, 4  }
 0x6e5   :  { %18 = sbr.rel (!%p16_p4) target bundleno = 1 (0x1), region = 86 }

// kernel: _lambda_.17
= control target key start
LH: loop header
LB: loop body
LE: loop exit
PB: predicated region body
PF: predicated region fallthrough
CT: control target
= control target key end

     0   :  { %14 = vsyncpa [#allocation4], 0  ;;  %s1485_s0 = inlined_call_operand.vmem [shape: f32[2,8,128], index: 0, kind: input, shape index: {}]   ;;  %s1486_s1 = inlined_call_operand.hbm [shape: f32[1,128], index: 1, kind: input, shape index: {}]   ;;  %s1487_s2 = inlined_call_operand.hbm [shape: f32[1,128], index: 2, kind: input, shape index: {}]   ;;  %s1488_s3 = inlined_call_operand.vmem [shape: bf16[128,256], index: 3, kind: input, shape index: {}]   ;;  %s1489_s4 = inlined_call_operand.vmem [shape: f32[1,256], index: 4, kind: input, shape index: {}]   ;;  %s1490_s5 = inlined_call_operand.vmem [shape: f32[31,128], index: 5, kind: input, shape index: {}]   ;;  %s1491_s6 = inlined_call_operand.hbm [shape: f32[1,128], index: 6, kind: input, shape index: {}]   ;;  %s1492_s7 = inlined_call_operand.vmem [shape: bf16[128,128], index: 7, kind: input, shape index: {}]   ;;  %s1493_s8 = inlined_call_operand.hbm [shape: f32[1,128], index: 8, kind: input, shape index: {}]   ;;  %s1494_s9 = inlined_call_operand.vmem [shape: f32[2,8,128], index: 9, kind: output, shape index: {}]  }
   0x1   :  { %15 = vsyncpa [#allocation6], 0 }
   0x2   :  { %16 = vsyncpa [#allocation9], 0  ;;  %s1268_s30 = smov 0  }
   0x3 LB: > { %s271_s12 = sshll.u32 %s1487_s2, 4  ;;  %s1277_s13 = sadd.s32 4294967295, %s1211_s30   ;;  %s1211_s30 = sphi %s1268_s30, %s22_s30   ;;  %s272_s12 = int_to_ptr.hbm [resolvable:$true] %s271_s12 }
   0x4   : > { %p878_p0 = scmp.ge.s32.totalorder %s1211_s30, 1  ;;  %p247_p1 = scmp.lt.s32.totalorder %s1211_s30, 3 }
   0x5   : > { %p1042_p2 = scmp.eq.s32.totalorder %s1277_s13, 0  ;;  %s1213_s15 = smov [#allocation5]  }
   0x6   : > { %p1282_p3 = pnand %p878_p0, %p247_p1  ;;  %s273_s16 = sshll.u32 %s1213_s15, 4  ;;  %s274_s16 = int_to_ptr.vmem [resolvable:$true] %s273_s16 }
   0x7   : > { %s259_s19 = sshll.u32 %s1486_s1, 4  ;;  %s292_s22 = sshll.u32 %s1491_s6, 4  ;;  %s260_s19 = int_to_ptr.hbm [resolvable:$true] %s259_s19  ;;  %s293_s22 = int_to_ptr.hbm [resolvable:$true] %s292_s22 }
   0x8   : > { %p1029_p4 = pneg %p1282_p3  ;;  %s1214_s24 = smov [#allocation3]  }
   0x9   : > { %s261_s25 = sshll.u32 %s1214_s24, 4  ;;  %s1215_s26 = smov [#allocation7]   ;;  %s262_s25 = int_to_ptr.vmem [resolvable:$true] %s261_s25 }
   0xa   : > { %p1296_p5 = pnand %p1042_p2, %p1029_p4  ;;  %s294_s27 = sshll.u32 %s1215_s26, 4  ;;  %s295_s27 = int_to_ptr.vmem [resolvable:$true] %s294_s27 }
   0xb   : > { %s307_s10 = sshll.u32 %s1493_s8, 4  ;;  %s1216_s11 = smov [#allocation8]   ;;  %s308_s10 = int_to_ptr.hbm [resolvable:$true] %s307_s10 }
   0xc   : > { %1035 = dma.hbm_to_vmem [thread:$0]  (!%p1296_p5), %s272_s12, 16, %s274_s16, [#allocation6]  }
   0xd   : > { %1032 = dma.hbm_to_vmem [thread:$0]  (!%p1296_p5), %s260_s19, 16, %s262_s25, [#allocation4]  }
   0xe   : > { %1038 = dma.hbm_to_vmem [thread:$0]  (!%p1296_p5), %s293_s22, 16, %s295_s27, [#allocation6]  }
   0xf   : > { %s309_s15 = sshll.u32 %s1216_s11, 4  ;;  %329 = sbr.rel (%p1282_p3) target bundleno = 545 (0x221), region = 56  ;;  %s310_s15 = int_to_ptr.vmem [resolvable:$true] %s309_s15 }
  0x10   : > { %1041 = dma.hbm_to_vmem [thread:$0]  (!%p1296_p5), %s308_s10, 16, %s310_s15, [#allocation9]  }
  0x14   : > { %1198 = dma.done.wait (%p1042_p2), [#allocation4], 16  }
  0x15   : > { %1200 = vsyncadd (%p1042_p2), [#allocation4], 4294967280 }
  0x16   : > { %1202 = dma.done.wait (%p1042_p2), [#allocation6], 32  }
  0x17   : > { %1204 = vsyncadd (%p1042_p2), [#allocation6], 4294967264 }
  0x18   : > { %1206 = dma.done.wait (%p1042_p2), [#allocation9], 16  }
  0x19   : > { %1208 = vsyncadd (%p1042_p2), [#allocation9], 4294967280  ;;  %p379_p6 = scmp.lt.s32.totalorder %s1277_s13, 1  ;;  %v949_v2 = vld [vmem:[%s1488_s3 + $0x70] sm:$0xf] }
  0x1a   : > { %v1004_v3 = vld [vmem:[%s1488_s3 + $0x74] sm:$0xf0]  ;;  %v1003_v4 = vld [vmem:[%s1488_s3 + $0x74] sm:$0xf]  ;;  %v951_v6 = vld [vmem:[%s1488_s3 + $0x78] sm:$0xf0] }
  0x1b   : > { %s1498_s13 = smov (!%p379_p6, %s1277_s13), 1  ;;  %v950_v5 = vor.u32 %v1004_v3, %v949_v2  ;;  %v954_v7 = vor.u32 %v1003_v4, %v951_v6  ;;  %v941_v8 = vld [vmem:[%s1488_s3 + $0x60] sm:$0xf]  ;;  %v1002_v9 = vld [vmem:[%s1488_s3 + $0x64] sm:$0xf0] }
  0x1c   : > { %s889_s12 = sshll.u32 %s1498_s13, 3  ;;  %v1001_v10 = vld [vmem:[%s1488_s3 + $0x64] sm:$0xf]  ;;  %v942_v11 = vor.u32 %v1002_v9, %v941_v8  ;;  %v943_v12 = vld [vmem:[%s1488_s3 + $0x68] sm:$0xf0]  ;;  %v1217_v8 = vmov 0.0  }
  0x1d   : > { %s382_s17 = scalar_lea.vmem %s1485_s0, %s889_s12  ;;  %523 = vmatpush.bf16.msra.mxu0 %v950_v5  ;;  %536 = vmatpush.bf16.msra.mxu1 %v954_v7  ;;  %v946_v13 = vor.u32 %v1001_v10, %v943_v12  ;;  %v933_v14 = vld [vmem:[%s1488_s3 + $0x50] sm:$0xf]  ;;  %v1000_v15 = vld [vmem:[%s1488_s3 + $0x54] sm:$0xf0]  ;;  %v999_v16 = vld [vmem:[%s1488_s3 + $0x54] sm:$0xf]  ;;  %s386_s20 = scalar_lea.vmem %s1494_s9, %s889_s12 }
  0x1e   : > { %v1335_v0 = vld [vmem:[%s382_s17] sm:$0xff]  ;;  %v934_v17 = vor.u32 %v1000_v15, %v933_v14  ;;  %v935_v18 = vld [vmem:[%s1488_s3 + $0x58] sm:$0xf0]  ;;  %v998_v21 = vld [vmem:[%s1488_s3 + $0x44] sm:$0xf0]  ;;  %554 = vst [vmem:[#allocation2] sm:$0xff] %v1217_v8 }
  0x1f   : > { %390 = vadd.xlane.f32.xlu0 %v1335_v0  ;;  %v393_v1 = vmul.f32 %v1335_v0, %v1335_v0  ;;  %v938_v19 = vor.u32 %v999_v16, %v935_v18  ;;  %v925_v20 = vld [vmem:[%s1488_s3 + $0x40] sm:$0xf]  ;;  %v997_v22 = vld [vmem:[%s1488_s3 + $0x44] sm:$0xf]  ;;  %v927_v24 = vld [vmem:[%s1488_s3 + $0x48] sm:$0xf0] }
  0x20   : > { %v926_v23 = vor.u32 %v998_v21, %v925_v20  ;;  %v930_v25 = vor.u32 %v997_v22, %v927_v24  ;;  %v917_v26 = vld [vmem:[%s1488_s3 + $0x30] sm:$0xf]  ;;  %v996_v27 = vld [vmem:[%s1488_s3 + $0x34] sm:$0xf0]  ;;  %v995_v28 = vld [vmem:[%s1488_s3 + $0x34] sm:$0xf] }
  0x21   : > { %524 = vmatpush.bf16.msra.mxu0 %v942_v11  ;;  %537 = vmatpush.bf16.msra.mxu1 %v946_v13  ;;  %v918_v29 = vor.u32 %v996_v27, %v917_v26  ;;  %v919_v30 = vld [vmem:[%s1488_s3 + $0x38] sm:$0xf0]  ;;  %v909_v32 = vld [vmem:[%s1488_s3 + $0x20] sm:$0xf]  ;;  %v994_v33 = vld [vmem:[%s1488_s3 + $0x24] sm:$0xf0] }
  0x22   : > { %v922_v31 = vor.u32 %v995_v28, %v919_v30  ;;  %v993_v34 = vld [vmem:[%s1488_s3 + $0x24] sm:$0xf]  ;;  %v910_v35 = vor.u32 %v994_v33, %v909_v32  ;;  %v911_v36 = vld [vmem:[%s1488_s3 + $0x28] sm:$0xf0]  ;;  %v901_v37 = vld [vmem:[%s1488_s3 + $0x10] sm:$0xf] }
  0x23   : > { %v992_v38 = vld [vmem:[%s1488_s3 + $0x14] sm:$0xf0]  ;;  %v914_v39 = vor.u32 %v993_v34, %v911_v36  ;;  %v991_v40 = vld [vmem:[%s1488_s3 + $0x14] sm:$0xf]  ;;  %v903_v41 = vld [vmem:[%s1488_s3 + $0x18] sm:$0xf0] }
  0x24   : > { %v902_v42 = vor.u32 %v992_v38, %v901_v37  ;;  %v906_v43 = vor.u32 %v991_v40, %v903_v41  ;;  %v893_v44 = vld [vmem:[%s1488_s3] sm:$0xf]  ;;  %v990_v45 = vld [vmem:[%s1488_s3 + $0x4] sm:$0xf0]  ;;  %v989_v47 = vld [vmem:[%s1488_s3 + $0x4] sm:$0xf] }
  0x25   : > { %525 = vmatpush.bf16.msra.mxu0 %v934_v17  ;;  %538 = vmatpush.bf16.msra.mxu1 %v938_v19  ;;  %v895_v48 = vld [vmem:[%s1488_s3 + $0x8] sm:$0xf0]  ;;  %v894_v49 = vor.u32 %v990_v45, %v893_v44  ;;  %v1064_v4 = vld [vmem:[#allocation5] ss:$0 sm:$0xff]  ;;  %555 = vst [vmem:[#allocation2 + $0x8] sm:$0xff] %v1217_v8  ;;  %v560_v9 = vld [vmem:[%s1490_s5] sm:$0xff] }
  0x26   : > { %v898_v50 = vor.u32 %v989_v47, %v895_v48  ;;  %556 = vst [vmem:[#allocation2 + $0x10] sm:$0xff] %v1217_v8  ;;  %v565_v10 = vperm.slane %v560_v9, 0  ;;  %v569_v11 = vperm.slane %v560_v9, 1  ;;  %v437_v13 = vld [vmem:[%s1489_s4] sm:$0x3]  ;;  %v573_v16 = vperm.slane %v560_v9, 2 }
  0x27   : > { %394 = vadd.xlane.f32.xlu0 %v393_v1  ;;  %v1063_v1 = vld [vmem:[#allocation3] ss:$0 sm:$0xff]  ;;  %557 = vst [vmem:[#allocation2 + $0x18] sm:$0xff] %v1217_v8  ;;  %v1012_v17 = vld [vmem:[%s1492_s7 + $0x38] sm:$0xff]  ;;  %v440_v18 = vperm.slane %v437_v13, 1  ;;  %v1011_v20 = vld [vmem:[%s1492_s7 + $0x30] sm:$0xff] }
  0x28   : > { %558 = vst [vmem:[#allocation2 + $0x20] sm:$0x3f] %v1217_v8  ;;  %v566_v14 = vmul.f32 0.0, %v565_v10  ;;  %767 = vmatpush.bf16.msra.mxu2 %v1012_v17  ;;  %v1010_v28 = vld [vmem:[%s1492_s7 + $0x28] sm:$0xff]  ;;  %v581_v32 = vperm.slane %v560_v9, 4  ;;  %v1009_v34 = vld [vmem:[%s1492_s7 + $0x20] sm:$0xff] }
  0x29   : > { %526 = vmatpush.bf16.msra.mxu0 %v926_v23  ;;  %539 = vmatpush.bf16.msra.mxu1 %v930_v25  ;;  %v577_v25 = vperm.slane %v560_v9, 3  ;;  %v585_v37 = vperm.slane %v560_v9, 5  ;;  %v439_v41 = vperm.slane %v437_v13, 0  ;;  %v589_v47 = vperm.slane %v560_v9, 6 }
  0x2c   : > { %v568_v12 = vld [vmem:[#allocation2 + $0x1] sm:$0xff]  ;;  %768 = vmatpush.bf16.msra.mxu2 %v1011_v20 }
  0x2d   : > { %527 = vmatpush.bf16.msra.mxu0 %v918_v29  ;;  %540 = vmatpush.bf16.msra.mxu1 %v922_v31  ;;  %v570_v15 = vmul.f32 %v569_v11, %v568_v12  ;;  %v572_v19 = vld [vmem:[#allocation2 + $0x2] sm:$0xff] }
  0x2e   : > { %v574_v24 = vmul.f32 %v573_v16, %v572_v19  ;;  %v576_v27 = vld [vmem:[#allocation2 + $0x3] sm:$0xff] }
  0x2f   : > { %v571_v23 = vadd.f32 %v570_v15, %v566_v14  ;;  %v578_v31 = vmul.f32 %v577_v25, %v576_v27  ;;  %v580_v33 = vld [vmem:[#allocation2 + $0x4] sm:$0xff] }
  0x30   : > { %769 = vmatpush.bf16.msra.mxu2 %v1010_v28  ;;  %v582_v36 = vmul.f32 %v581_v32, %v580_v33  ;;  %v584_v40 = vld [vmem:[#allocation2 + $0x5] sm:$0xff] }
  0x31   : > { %528 = vmatpush.bf16.msra.mxu0 %v910_v35  ;;  %541 = vmatpush.bf16.msra.mxu1 %v914_v39  ;;  %v575_v30 = vadd.f32 %v574_v24, %v571_v23  ;;  %v588_v48 = vld [vmem:[#allocation2 + $0x6] sm:$0xff] }
  0x33   : > { %v579_v35 = vadd.f32 %v578_v31, %v575_v30 }
  0x34   : > { %770 = vmatpush.bf16.msra.mxu2 %v1009_v34 }
  0x35   : > { %529 = vmatpush.bf16.msra.mxu0 %v902_v42  ;;  %542 = vmatpush.bf16.msra.mxu1 %v906_v43  ;;  %v1008_v42 = vld [vmem:[%s1492_s7 + $0x18] sm:$0xff]  ;;  %v583_v45 = vadd.f32 %v582_v36, %v579_v35 }
  0x38   : > { %771 = vmatpush.bf16.msra.mxu2 %v1008_v42 }
  0x39   : > { %530 = vmatpush.bf16.msra.mxu0 %v894_v49  ;;  %543 = vmatpush.bf16.msra.mxu1 %v898_v50 }
  0x92   : > { %v391_v46 = vpop.xlane.xlu0 %390 }
  0x93   : > { %v392_v51 = vmul.f32 0.03125, %v391_v46  ;;  %v586_v46 = vmul.f32 %v585_v37, %v584_v40 }
  0x95   : > { %v397_v53 = vmul.f32 %v392_v51, %v392_v51  ;;  %v399_v63 = vsub.f32 %v1335_v0, %v392_v51  ;;  %v1007_v51 = vld [vmem:[%s1492_s7 + $0x10] sm:$0xff] }
  0x96   : > { %772 = vmatpush.bf16.msra.mxu2 %v1007_v51 }
  0x9a   : > { %v395_v52 = vpop.xlane.xlu0 %394 }
  0x9b   : > { %v396_v54 = vmul.f32 0.03125, %v395_v52 }
  0x9d   : > { %v398_v55 = vsub.f32 %v396_v54, %v397_v53  ;;  %v587_v53 = vadd.f32 %v586_v46, %v583_v45  ;;  %v590_v54 = vmul.f32 %v589_v47, %v588_v48 }
  0x9f   : > { %v400_v56 = vadd.f32 1e-05, %v398_v55  ;;  %v593_v55 = vperm.slane %v560_v9, 7 }
  0xa1   : > { %1067 = vrsqrt.f32 %v400_v56  ;;  %vm407_vm1 = vweird.f32 %v400_v56 }
  0xa7   : > { %v1068_v57 = vpop.eup %1067 }
  0xa8   : > { %v402_v58 = vmul.f32 %v1068_v57, %v400_v56  ;;  %vm408_vm0 = vweird.f32 %v1068_v57  ;;  %v592_v56 = vld [vmem:[#allocation2 + $0x7] sm:$0xff] }
  0xa9   : > { %vm409_vm2 = vmor %vm407_vm1, %vm408_vm0 }
  0xaa   : > { %v403_v59 = vmul.f32 %v1068_v57, %v402_v58  ;;  %v591_v58 = vadd.f32 %v590_v54, %v587_v53 }
  0xac   : > { %v404_v60 = vmul.f32 0.5, %v403_v59  ;;  %v594_v59 = vmul.f32 %v593_v55, %v592_v56 }
  0xae   : > { %v405_v61 = vsub.f32 1.5, %v404_v60  ;;  %v561_v60 = vld [vmem:[%s1490_s5 + $0x8] sm:$0xff] }
  0xaf   : > { %v609_v9 = vperm.slane %v561_v60, 3  ;;  %v613_v13 = vperm.slane %v561_v60, 4  ;;  %v617_v17 = vperm.slane %v561_v60, 5 }
  0xb0   : > { %v406_v62 = vmul.f32 %v1068_v57, %v405_v61  ;;  %v597_v61 = vperm.slane %v561_v60, 0 }
  0xb2   : > { %v410_v2 = vsel %vm409_vm2, %v1068_v57, %v406_v62  ;;  %v1006_v57 = vld [vmem:[%s1492_s7 + $0x8] sm:$0xff]  ;;  %v1005_v62 = vld [vmem:[%s1492_s7] sm:$0xff] }
  0xb3   : > { %v411_v3 = vmul.f32 %v410_v2, %v399_v63  ;;  %773 = vmatpush.bf16.msra.mxu2 %v1006_v57  ;;  %v595_v63 = vadd.f32 %v594_v59, %v591_v58  ;;  %v656_v57 = vld [vmem:[#allocation2 + $0x17] sm:$0xff] }
  0xb5   : > { %v415_v5 = vmul.f32 %v1063_v1, %v411_v3  ;;  %v601_v1 = vperm.slane %v561_v60, 1 }
  0xb7   : > { %v419_v6 = vadd.f32 %v1064_v4, %v415_v5  ;;  %v605_v5 = vperm.slane %v561_v60, 2  ;;  %774 = vmatpush.bf16.msra.mxu2 %v1005_v62 }
  0xb9   : > { %v420_v7 = vpack.c.bf16 %v419_v6, %v419_v6 }
  0xbb   : > { %531 = vmatmul.bf16.vlgmr.msra.gmra.mxu0 %v420_v7  ;;  %544 = vmatmul.bf16.vlgmr.msra.gmra.mxu1 %v420_v7 }
 0x138   : > { %v532_v21 = vpop.f32.mrf.mxu0  ;;  %v545_v22 = vpop.f32.mrf.mxu1 }
 0x139   : > { %v546_v26 = vadd.f32 %v545_v22, %v440_v18  ;;  %v533_v49 = vadd.f32 %v532_v21, %v439_v41  ;;  %v621_v21 = vperm.slane %v561_v60, 6  ;;  %v562_v22 = vld [vmem:[%s1490_s5 + $0x10] sm:$0xff] }
 0x13a   : > { %v633_v33 = vperm.slane %v562_v22, 1  ;;  %v637_v37 = vperm.slane %v562_v22, 2  ;;  %v641_v41 = vperm.slane %v562_v22, 3  ;;  %v645_v45 = vperm.slane %v562_v22, 4 }
 0x13b   : > { %v549_v29 = vmul.f32 0.5, %v546_v26  ;;  %v625_v26 = vperm.slane %v561_v60, 7  ;;  %v653_v54 = vperm.slane %v562_v22, 6  ;;  %v657_v55 = vperm.slane %v562_v22, 7 }
 0x13d   : > { %1069 = vtanh.f32 %v549_v29  ;;  %v629_v29 = vperm.slane %v562_v22, 0 }
 0x140   : > { %v534_v38 = vpop.f32.mrf.mxu0  ;;  %v547_v39 = vpop.f32.mrf.mxu1 }
 0x143   : > { %v1070_v43 = vpop.eup %1069 }
 0x144   : > { %v551_v44 = vadd.f32 1.0, %v1070_v43 }
 0x146   : > { %v552_v50 = vmul.f32 0.5, %v551_v44 }
 0x148   : > { %v553_v52 = vmul.f32 %v552_v50, %v533_v49  ;;  %v649_v49 = vperm.slane %v562_v22, 5  ;;  %v563_v50 = vld [vmem:[%s1490_s5 + $0x18] sm:$0x7f] }
 0x149   : > { %v661_v60 = vperm.slane %v563_v50, 0  ;;  %v684_v22 = vld [vmem:[#allocation2 + $0x1e] sm:$0xff] }
 0x14a   : > { %559 = vst [vmem:[#allocation2 + $0xf] sm:$0xff] %v553_v52  ;;  %v626_v32 = vmul.f32 %v625_v26, %v553_v52 }
 0x151   : > { %v596_v2 = vld [vmem:[#allocation2 + $0x8] sm:$0xff]  ;;  %v628_v30 = vld [vmem:[#allocation2 + $0x10] sm:$0xff] }
 0x152   : > { %v600_v3 = vld [vmem:[#allocation2 + $0x9] sm:$0xff]  ;;  %v598_v4 = vmul.f32 %v597_v61, %v596_v2  ;;  %v632_v34 = vld [vmem:[#allocation2 + $0x11] sm:$0xff]  ;;  %v630_v36 = vmul.f32 %v629_v29, %v628_v30  ;;  %v664_v2 = vld [vmem:[#allocation2 + $0x19] sm:$0xff] }
 0x153   : > { %v604_v6 = vld [vmem:[#allocation2 + $0xa] sm:$0xff]  ;;  %v602_v8 = vmul.f32 %v601_v1, %v600_v3  ;;  %v636_v38 = vld [vmem:[#allocation2 + $0x12] sm:$0xff]  ;;  %v634_v40 = vmul.f32 %v633_v33, %v632_v34  ;;  %v665_v1 = vperm.slane %v563_v50, 1 }
 0x154   : > { %v599_v7 = vadd.f32 %v598_v4, %v595_v63  ;;  %v608_v10 = vld [vmem:[#allocation2 + $0xb] sm:$0xff]  ;;  %v606_v11 = vmul.f32 %v605_v5, %v604_v6  ;;  %v640_v42 = vld [vmem:[#allocation2 + $0x13] sm:$0xff]  ;;  %v638_v44 = vmul.f32 %v637_v37, %v636_v38  ;;  %v658_v63 = vmul.f32 %v657_v55, %v656_v57 }
 0x155   : > { %v612_v14 = vld [vmem:[#allocation2 + $0xc] sm:$0xff]  ;;  %v610_v16 = vmul.f32 %v609_v9, %v608_v10  ;;  %v644_v46 = vld [vmem:[#allocation2 + $0x14] sm:$0xff]  ;;  %v642_v48 = vmul.f32 %v641_v41, %v640_v42  ;;  %v662_v4 = vmul.f32 0.0, %v661_v60  ;;  %v669_v5 = vperm.slane %v563_v50, 2 }
 0x156   : > { %v603_v12 = vadd.f32 %v602_v8, %v599_v7  ;;  %v616_v18 = vld [vmem:[#allocation2 + $0xd] sm:$0xff]  ;;  %v614_v20 = vmul.f32 %v613_v13, %v612_v14  ;;  %v648_v51 = vld [vmem:[#allocation2 + $0x15] sm:$0xff]  ;;  %v646_v53 = vmul.f32 %v645_v45, %v644_v46  ;;  %v666_v8 = vmul.f32 %v665_v1, %v664_v2 }
 0x157   : > { %v620_v23 = vld [vmem:[#allocation2 + $0xe] sm:$0xff]  ;;  %v618_v25 = vmul.f32 %v617_v17, %v616_v18  ;;  %v652_v56 = vld [vmem:[#allocation2 + $0x16] sm:$0xff]  ;;  %v650_v59 = vmul.f32 %v649_v49, %v648_v51  ;;  %v673_v9 = vperm.slane %v563_v50, 3  ;;  %v677_v13 = vperm.slane %v563_v50, 4 }
 0x158   : > { %v607_v15 = vadd.f32 %v606_v11, %v603_v12  ;;  %v622_v28 = vmul.f32 %v621_v21, %v620_v23  ;;  %v654_v62 = vmul.f32 %v653_v54, %v652_v56  ;;  %v668_v6 = vld [vmem:[#allocation2 + $0x1a] sm:$0xff]  ;;  %v681_v17 = vperm.slane %v563_v50, 5  ;;  %v1066_v37 = vld [vmem:[#allocation8] ss:$0 sm:$0xff] }
 0x159   : > { %v672_v10 = vld [vmem:[#allocation2 + $0x1b] sm:$0xff]  ;;  %v670_v12 = vmul.f32 %v669_v5, %v668_v6  ;;  %v685_v21 = vperm.slane %v563_v50, 6 }
 0x15a   : > { %v611_v19 = vadd.f32 %v610_v16, %v607_v15  ;;  %v676_v14 = vld [vmem:[#allocation2 + $0x1c] sm:$0xff]  ;;  %v674_v16 = vmul.f32 %v673_v9, %v672_v10 }
 0x15b   : > { %v680_v18 = vld [vmem:[#allocation2 + $0x1d] sm:$0xff]  ;;  %v686_v26 = vmul.f32 %v685_v21, %v684_v22 }
 0x15c   : > { %v615_v24 = vadd.f32 %v614_v20, %v611_v19  ;;  %v678_v20 = vmul.f32 %v677_v13, %v676_v14 }
 0x15e   : > { %v619_v27 = vadd.f32 %v618_v25, %v615_v24  ;;  %v682_v24 = vmul.f32 %v681_v17, %v680_v18 }
 0x160   : > { %v623_v31 = vadd.f32 %v622_v28, %v619_v27  ;;  %v1065_v28 = vld [vmem:[#allocation7] ss:$0 sm:$0xff] }
 0x162   : > { %v627_v35 = vadd.f32 %v626_v32, %v623_v31 }
 0x164   : > { %v631_v39 = vadd.f32 %v630_v36, %v627_v35 }
 0x166   : > { %v635_v43 = vadd.f32 %v634_v40, %v631_v39 }
 0x168   : > { %v639_v47 = vadd.f32 %v638_v44, %v635_v43 }
 0x16a   : > { %v643_v52 = vadd.f32 %v642_v48, %v639_v47 }
 0x16c   : > { %v647_v58 = vadd.f32 %v646_v53, %v643_v52 }
 0x16e   : > { %v651_v61 = vadd.f32 %v650_v59, %v647_v58 }
 0x170   : > { %v655_v3 = vadd.f32 %v654_v62, %v651_v61 }
 0x172   : > { %v659_v7 = vadd.f32 %v658_v63, %v655_v3 }
 0x174   : > { %v663_v11 = vadd.f32 %v662_v4, %v659_v7 }
 0x176   : > { %v667_v15 = vadd.f32 %v666_v8, %v663_v11 }
 0x178   : > { %v671_v19 = vadd.f32 %v670_v12, %v667_v15 }
 0x17a   : > { %v675_v23 = vadd.f32 %v674_v16, %v671_v19 }
 0x17c   : > { %v679_v25 = vadd.f32 %v678_v20, %v675_v23 }
 0x17e   : > { %v683_v27 = vadd.f32 %v682_v24, %v679_v25 }
 0x180   : > { %v687_v29 = vadd.f32 %v686_v26, %v683_v27 }
 0x182   : > { %v692_v30 = vadd.f32 %v1065_v28, %v687_v29 }
 0x184   : > { %v693_v31 = vmul.f32 0.5, %v692_v30 }
 0x186   : > { %1071 = vtanh.f32 %v693_v31 }
 0x18c   : > { %v1072_v32 = vpop.eup %1071 }
 0x18d   : > { %v695_v33 = vadd.f32 1.0, %v1072_v32 }
 0x18f   : > { %v696_v34 = vmul.f32 0.5, %v695_v33 }
 0x191   : > { %v697_v35 = vmul.f32 %v696_v34, %v692_v30 }
 0x193   : > { %v698_v36 = vpack.c.bf16 %v697_v35, %v697_v35 }
 0x195   : > { %775 = vmatmul.bf16.vlgmr.msra.gmra.mxu2 %v698_v36 }
 0x218   : > { %v776_v38 = vpop.f32.mrf.mxu2 }
 0x219   : > { %v777_v39 = vadd.f32 %v1066_v37, %v776_v38 }
 0x21b   : > { %v780_v40 = vadd.f32 %v777_v39, %v1335_v0 }
 0x21d   : > { %781 = vst [vmem:[%s386_s20] sm:$0xff] %v780_v40 }
 0x220   : > { %v778_v41 = vpop.f32.mrf.mxu2 }
 0x221 PF: > { %s22_s30 = sadd.s32 1, %s1211_s30  }
 0x222   : > { %p19_p7 = scmp.ge.s32.totalorder %s22_s30, 4  }
 0x224   :  { %21 = sbr.rel (!%p19_p7) target bundleno = 3 (0x3), region = 103 }
 0x229   :  { %801 = vsyncpa [#allocation4], 1 }
 0x22a   :  { %803 = vsyncpa [#allocation4 + $0x1], 1 }
 0x22b   :  { %804 = vsyncpa [#allocation6], 1 }
 0x22c   :  { %805 = vsyncpa [#allocation9], 1 }

// kernel: _lambda_.18
= control target key start
LH: loop header
LB: loop body
LE: loop exit
PB: predicated region body
PF: predicated region fallthrough
CT: control target
= control target key end

     0   :  { %14 = vsyncpa [#allocation3], 0  ;;  %s740_s0 = inlined_call_operand.vmem [shape: f32[16,128], index: 0, kind: input, shape index: {}]   ;;  %s741_s1 = inlined_call_operand.vmem [shape: f32[1,128], index: 1, kind: input, shape index: {}]   ;;  %s742_s2 = inlined_call_operand.vmem [shape: f32[1,128], index: 2, kind: input, shape index: {}]   ;;  %s743_s3 = inlined_call_operand.vmem [shape: bf16[128,128], index: 3, kind: input, shape index: {}]   ;;  %s744_s4 = inlined_call_operand.hbm [shape: f32[1,128], index: 4, kind: input, shape index: {}]   ;;  %s745_s5 = inlined_call_operand.vmem [shape: bf16[128,128], index: 5, kind: input, shape index: {}]   ;;  %s746_s6 = inlined_call_operand.hbm [shape: f32[1,128], index: 6, kind: input, shape index: {}]   ;;  %s747_s7 = inlined_call_operand.hbm [shape: f32[1,128], index: 7, kind: input, shape index: {}]   ;;  %s748_s8 = inlined_call_operand.hbm [shape: f32[1,128], index: 8, kind: input, shape index: {}]   ;;  %s749_s9 = inlined_call_operand.vmem [shape: f32[16,128], index: 9, kind: output, shape index: {}]  }
   0x1   :  { %15 = vsyncpa [#allocation5], 0  ;;  %s43_s11 = sshll.u32 %s746_s6, 4  ;;  %s44_s11 = int_to_ptr.hbm [resolvable:$true] %s43_s11 }
   0x2   :  { %16 = vsyncpa [#allocation8], 0  ;;  %s594_s12 = smov [#allocation4]   ;;  %s30_s16 = sshll.u32 %s744_s4, 4  ;;  %s31_s16 = int_to_ptr.hbm [resolvable:$true] %s30_s16 }
   0x3   :  { %s45_s13 = sshll.u32 %s594_s12, 4  ;;  %s595_s17 = smov [#allocation2]   ;;  %s46_s13 = int_to_ptr.vmem [resolvable:$true] %s45_s13 }
   0x4   :  { %48 = dma.hbm_to_vmem [thread:$0]  %s44_s11, 16, %s46_s13, [#allocation5]  }
   0x5   :  { %s32_s18 = sshll.u32 %s595_s17, 4  ;;  %s54_s21 = sshll.u32 %s747_s7, 4  ;;  %s33_s18 = int_to_ptr.vmem [resolvable:$true] %s32_s18  ;;  %s55_s21 = int_to_ptr.hbm [resolvable:$true] %s54_s21 }
   0x6   :  { %35 = dma.hbm_to_vmem [thread:$0]  %s31_s16, 16, %s33_s18, [#allocation3]  }
   0x7   :  { %s65_s23 = sshll.u32 %s748_s8, 4  ;;  %s596_s24 = smov [#allocation6]   ;;  %s66_s23 = int_to_ptr.hbm [resolvable:$true] %s65_s23 }
   0x8   :  { %s56_s25 = sshll.u32 %s596_s24, 4  ;;  %s597_s4 = smov [#allocation7]   ;;  %s57_s25 = int_to_ptr.vmem [resolvable:$true] %s56_s25 }
   0x9   :  { %59 = dma.hbm_to_vmem [thread:$0]  %s55_s21, 16, %s57_s25, [#allocation5]  }
   0xa   :  { %s67_s26 = sshll.u32 %s597_s4, 4  ;;  %s68_s26 = int_to_ptr.vmem [resolvable:$true] %s67_s26 }
   0xb   :  { %70 = dma.hbm_to_vmem [thread:$0]  %s66_s23, 16, %s68_s26, [#allocation8]  }
   0xc   :  { %588 = dma.done.wait [#allocation3], 16  }
   0xd   :  { %589 = vsyncadd [#allocation3], 4294967280 }
   0xe   :  { %590 = dma.done.wait [#allocation5], 32  }
   0xf   :  { %591 = vsyncadd [#allocation5], 4294967264 }
  0x10   :  { %592 = dma.done.wait [#allocation8], 16  }
  0x11   :  { %593 = vsyncadd [#allocation8], 4294967280  ;;  %v663_v0 = vld [vmem:[%s740_s0] sm:$0xff]  ;;  %v671_v2 = vld [vmem:[%s740_s0 + $0x8] sm:$0xff] }
  0x12   :  { %91 = vadd.xlane.f32.xlu0 %v663_v0  ;;  %v97_v1 = vmul.f32 %v663_v0, %v663_v0  ;;  %v98_v3 = vmul.f32 %v671_v2, %v671_v2  ;;  %v461_v4 = vld [vmem:[%s743_s3 + $0x38] sm:$0xff]  ;;  %v460_v5 = vld [vmem:[%s743_s3 + $0x30] sm:$0xff]  ;;  %v459_v6 = vld [vmem:[%s743_s3 + $0x28] sm:$0xff] }
  0x13   :  { %214 = vmatpush.bf16.msra.mxu0 %v461_v4  ;;  %v458_v7 = vld [vmem:[%s743_s3 + $0x20] sm:$0xff]  ;;  %v457_v8 = vld [vmem:[%s743_s3 + $0x18] sm:$0xff]  ;;  %v456_v9 = vld [vmem:[%s743_s3 + $0x10] sm:$0xff] }
  0x14   :  { %99 = vadd.xlane.f32.xlu1 %v97_v1  ;;  %v455_v11 = vld [vmem:[%s743_s3 + $0x8] sm:$0xff]  ;;  %v454_v16 = vld [vmem:[%s743_s3] sm:$0xff]  ;;  %v469_v24 = vld [vmem:[%s745_s5 + $0x38] sm:$0xff] }
  0x15   :  { %307 = vmatpush.bf16.msra.mxu1 %v469_v24  ;;  %v474_v41 = vld [vmem:[%s741_s1] ss:$0 sm:$0xff]  ;;  %v468_v52 = vld [vmem:[%s745_s5 + $0x30] sm:$0xff]  ;;  %v467_v53 = vld [vmem:[%s745_s5 + $0x28] sm:$0xff] }
  0x16   :  { %v475_v47 = vld [vmem:[%s742_s2] ss:$0 sm:$0xff]  ;;  %v465_v55 = vld [vmem:[%s745_s5 + $0x18] sm:$0xff]  ;;  %v464_v56 = vld [vmem:[%s745_s5 + $0x10] sm:$0xff] }
  0x17   :  { %215 = vmatpush.bf16.msra.mxu0 %v460_v5  ;;  %v466_v54 = vld [vmem:[%s745_s5 + $0x20] sm:$0xff]  ;;  %v463_v57 = vld [vmem:[%s745_s5 + $0x8] sm:$0xff] }
  0x18   :  { %v462_v58 = vld [vmem:[%s745_s5] sm:$0xff] }
  0x19   :  { %308 = vmatpush.bf16.msra.mxu1 %v468_v52  ;;  %v476_v59 = vld [vmem:[#allocation2] ss:$0 sm:$0xff] }
  0x1a   :  { %93 = vadd.xlane.f32.xlu0 %v671_v2 }
  0x1b   :  { %216 = vmatpush.bf16.msra.mxu0 %v459_v6 }
  0x1c   :  { %101 = vadd.xlane.f32.xlu1 %v98_v3 }
  0x1d   :  { %309 = vmatpush.bf16.msra.mxu1 %v467_v53 }
  0x1f   :  { %217 = vmatpush.bf16.msra.mxu0 %v458_v7 }
  0x21   :  { %310 = vmatpush.bf16.msra.mxu1 %v466_v54 }
  0x23   :  { %218 = vmatpush.bf16.msra.mxu0 %v457_v8 }
  0x25   :  { %311 = vmatpush.bf16.msra.mxu1 %v465_v55 }
  0x27   :  { %219 = vmatpush.bf16.msra.mxu0 %v456_v9 }
  0x29   :  { %312 = vmatpush.bf16.msra.mxu1 %v464_v56 }
  0x2b   :  { %220 = vmatpush.bf16.msra.mxu0 %v455_v11 }
  0x2d   :  { %313 = vmatpush.bf16.msra.mxu1 %v463_v57 }
  0x2f   :  { %221 = vmatpush.bf16.msra.mxu0 %v454_v16 }
  0x31   :  { %314 = vmatpush.bf16.msra.mxu1 %v462_v58 }
  0x85   :  { %v92_v10 = vpop.xlane.xlu0 %91 }
  0x86   :  { %v95_v12 = vmul.f32 0.03125, %v92_v10 }
  0x87   :  { %v100_v13 = vpop.xlane.xlu1 %99 }
  0x88   :  { %v105_v14 = vmul.f32 %v95_v12, %v95_v12  ;;  %v103_v15 = vmul.f32 0.03125, %v100_v13  ;;  %v109_v38 = vsub.f32 %v663_v0, %v95_v12  ;;  %v477_v13 = vld [vmem:[#allocation4] ss:$0 sm:$0xff] }
  0x8a   :  { %v107_v17 = vsub.f32 %v103_v15, %v105_v14 }
  0x8c   :  { %v111_v18 = vadd.f32 1e-05, %v107_v17 }
  0x8d   :  { %v94_v19 = vpop.xlane.xlu0 %93 }
  0x8e   :  { %480 = vrsqrt.f32 %v111_v18  ;;  %v96_v20 = vmul.f32 0.03125, %v94_v19  ;;  %vm119_vm1 = vweird.f32 %v111_v18 }
  0x8f   :  { %v102_v21 = vpop.xlane.xlu1 %101 }
  0x90   :  { %v106_v22 = vmul.f32 %v96_v20, %v96_v20  ;;  %v104_v23 = vmul.f32 0.03125, %v102_v21  ;;  %v110_v43 = vsub.f32 %v671_v2, %v96_v20 }
  0x92   :  { %v108_v25 = vsub.f32 %v104_v23, %v106_v22 }
  0x94   :  { %v481_v26 = vpop.eup %480  ;;  %v112_v27 = vadd.f32 1e-05, %v108_v25 }
  0x95   :  { %v114_v28 = vmul.f32 %v481_v26, %v111_v18  ;;  %vm120_vm0 = vweird.f32 %v481_v26 }
  0x96   :  { %482 = vrsqrt.f32 %v112_v27  ;;  %vm121_vm2 = vmor %vm119_vm1, %vm120_vm0  ;;  %vm129_vm4 = vweird.f32 %v112_v27 }
  0x97   :  { %v115_v29 = vmul.f32 %v481_v26, %v114_v28 }
  0x99   :  { %v116_v30 = vmul.f32 0.5, %v115_v29 }
  0x9b   :  { %v117_v31 = vsub.f32 1.5, %v116_v30 }
  0x9c   :  { %v483_v32 = vpop.eup %482 }
  0x9d   :  { %v118_v33 = vmul.f32 %v481_v26, %v117_v31  ;;  %v124_v34 = vmul.f32 %v483_v32, %v112_v27  ;;  %vm130_vm3 = vweird.f32 %v483_v32 }
  0x9e   :  { %vm131_vm5 = vmor %vm129_vm4, %vm130_vm3 }
  0x9f   :  { %v125_v35 = vmul.f32 %v483_v32, %v124_v34  ;;  %v122_v37 = vsel %vm121_vm2, %v481_v26, %v118_v33 }
  0xa0   :  { %v133_v40 = vmul.f32 %v122_v37, %v109_v38 }
  0xa1   :  { %v126_v36 = vmul.f32 0.5, %v125_v35 }
  0xa2   :  { %v138_v46 = vmul.f32 %v474_v41, %v133_v40 }
  0xa3   :  { %v127_v39 = vsub.f32 1.5, %v126_v36 }
  0xa4   :  { %v143_v49 = vadd.f32 %v475_v47, %v138_v46 }
  0xa5   :  { %v128_v42 = vmul.f32 %v483_v32, %v127_v39 }
  0xa7   :  { %v132_v44 = vsel %vm131_vm5, %v483_v32, %v128_v42 }
  0xa8   :  { %v134_v45 = vmul.f32 %v132_v44, %v110_v43 }
  0xaa   :  { %v139_v48 = vmul.f32 %v474_v41, %v134_v45  ;;  %v478_v45 = vld [vmem:[#allocation6] ss:$0 sm:$0xff] }
  0xac   :  { %v144_v50 = vadd.f32 %v475_v47, %v139_v48  ;;  %v479_v48 = vld [vmem:[#allocation7] ss:$0 sm:$0xff] }
  0xae   :  { %v145_v51 = vpack.c.bf16 %v144_v50, %v143_v49 }
  0xb0   :  { %222 = vmatmul.bf16.vlgmr.msra.gmra.mxu0 %v145_v51 }
 0x12d   :  { %v223_v60 = vpop.f32.mrf.mxu0 }
 0x12e   :  { %v224_v61 = vadd.f32 %v476_v59, %v223_v60 }
 0x130   :  { %v228_v62 = vmul.f32 0.5, %v224_v61 }
 0x132   :  { %484 = vtanh.f32 %v228_v62 }
 0x135   :  { %v225_v63 = vpop.f32.mrf.mxu0 }
 0x136   :  { %v226_v1 = vadd.f32 %v476_v59, %v225_v63 }
 0x138   :  { %v229_v3 = vmul.f32 0.5, %v226_v1  ;;  %v485_v4 = vpop.eup %484 }
 0x139   :  { %v232_v5 = vadd.f32 1.0, %v485_v4 }
 0x13a   :  { %486 = vtanh.f32 %v229_v3 }
 0x13b   :  { %v234_v7 = vmul.f32 0.5, %v232_v5 }
 0x13d   :  { %v236_v10 = vmul.f32 %v234_v7, %v224_v61 }
 0x140   :  { %v487_v6 = vpop.eup %486 }
 0x141   :  { %v233_v8 = vadd.f32 1.0, %v487_v6 }
 0x143   :  { %v235_v9 = vmul.f32 0.5, %v233_v8 }
 0x145   :  { %v237_v11 = vmul.f32 %v235_v9, %v226_v1 }
 0x147   :  { %v238_v12 = vpack.c.bf16 %v237_v11, %v236_v10 }
 0x149   :  { %315 = vmatmul.bf16.vlgmr.msra.gmra.mxu1 %v238_v12 }
 0x1c6   :  { %v316_v14 = vpop.f32.mrf.mxu1 }
 0x1c7   :  { %v317_v15 = vadd.f32 %v477_v13, %v316_v14 }
 0x1c9   :  { %v321_v16 = vmul.f32 0.5, %v317_v15 }
 0x1cb   :  { %v323_v17 = vadd.f32 %v321_v16, %v663_v0 }
 0x1cd   :  { %327 = vadd.xlane.f32.xlu2 %v323_v17  ;;  %v333_v18 = vmul.f32 %v323_v17, %v323_v17 }
 0x1ce   :  { %v318_v19 = vpop.f32.mrf.mxu1 }
 0x1cf   :  { %v319_v20 = vadd.f32 %v477_v13, %v318_v19  ;;  %335 = vadd.xlane.f32.xlu0 %v333_v18 }
 0x1d1   :  { %v322_v21 = vmul.f32 0.5, %v319_v20 }
 0x1d3   :  { %v324_v22 = vadd.f32 %v322_v21, %v671_v2 }
 0x1d5   :  { %329 = vadd.xlane.f32.xlu2 %v324_v22  ;;  %v334_v23 = vmul.f32 %v324_v22, %v324_v22 }
 0x1d7   :  { %337 = vadd.xlane.f32.xlu1 %v334_v23 }
 0x240   :  { %v328_v24 = vpop.xlane.xlu2 %327 }
 0x241   :  { %v331_v25 = vmul.f32 0.03125, %v328_v24 }
 0x242   :  { %v336_v26 = vpop.xlane.xlu0 %335 }
 0x243   :  { %v341_v27 = vmul.f32 %v331_v25, %v331_v25  ;;  %v339_v28 = vmul.f32 0.03125, %v336_v26  ;;  %v345_v44 = vsub.f32 %v323_v17, %v331_v25 }
 0x245   :  { %v343_v29 = vsub.f32 %v339_v28, %v341_v27 }
 0x247   :  { %v347_v30 = vadd.f32 1e-05, %v343_v29 }
 0x248   :  { %v330_v31 = vpop.xlane.xlu2 %329 }
 0x249   :  { %488 = vrsqrt.f32 %v347_v30  ;;  %v332_v0 = vmul.f32 0.03125, %v330_v31  ;;  %vm355_vm7 = vweird.f32 %v347_v30 }
 0x24a   :  { %v338_v32 = vpop.xlane.xlu1 %337 }
 0x24b   :  { %v342_v33 = vmul.f32 %v332_v0, %v332_v0  ;;  %v340_v34 = vmul.f32 0.03125, %v338_v32  ;;  %v346_v55 = vsub.f32 %v324_v22, %v332_v0 }
 0x24d   :  { %v344_v35 = vsub.f32 %v340_v34, %v342_v33 }
 0x24f   :  { %v489_v36 = vpop.eup %488  ;;  %v348_v37 = vadd.f32 1e-05, %v344_v35 }
 0x250   :  { %v350_v2 = vmul.f32 %v489_v36, %v347_v30  ;;  %vm356_vm6 = vweird.f32 %v489_v36 }
 0x251   :  { %490 = vrsqrt.f32 %v348_v37  ;;  %vm357_vm8 = vmor %vm355_vm7, %vm356_vm6  ;;  %vm365_vm10 = vweird.f32 %v348_v37 }
 0x252   :  { %v351_v38 = vmul.f32 %v489_v36, %v350_v2 }
 0x254   :  { %v352_v39 = vmul.f32 0.5, %v351_v38 }
 0x256   :  { %v353_v40 = vsub.f32 1.5, %v352_v39 }
 0x257   :  { %v491_v41 = vpop.eup %490 }
 0x258   :  { %v354_v42 = vmul.f32 %v489_v36, %v353_v40  ;;  %v360_v43 = vmul.f32 %v491_v41, %v348_v37  ;;  %vm366_vm9 = vweird.f32 %v491_v41 }
 0x259   :  { %vm367_vm11 = vmor %vm365_vm10, %vm366_vm9 }
 0x25a   :  { %v358_v46 = vsel %vm357_vm8, %v489_v36, %v354_v42  ;;  %v361_v47 = vmul.f32 %v491_v41, %v360_v43 }
 0x25b   :  { %v369_v49 = vmul.f32 %v358_v46, %v345_v44 }
 0x25c   :  { %v362_v50 = vmul.f32 0.5, %v361_v47 }
 0x25d   :  { %v374_v51 = vmul.f32 %v478_v45, %v369_v49 }
 0x25e   :  { %v363_v52 = vsub.f32 1.5, %v362_v50 }
 0x25f   :  { %v379_v53 = vadd.f32 %v479_v48, %v374_v51 }
 0x260   :  { %v364_v54 = vmul.f32 %v491_v41, %v363_v52 }
 0x261   :  { %381 = vst [vmem:[%s749_s9] sm:$0xff] %v379_v53 }
 0x262   :  { %v368_v56 = vsel %vm367_vm11, %v491_v41, %v364_v54 }
 0x263   :  { %v370_v57 = vmul.f32 %v368_v56, %v346_v55 }
 0x265   :  { %v375_v58 = vmul.f32 %v478_v45, %v370_v57 }
 0x267   :  { %v380_v59 = vadd.f32 %v479_v48, %v375_v58 }
 0x269   :  { %382 = vst [vmem:[%s749_s9 + $0x8] sm:$0xff] %v380_v59 }
 0x26a   :  { %387 = vsyncpa [#allocation3], 1 }
 0x26b   :  { %388 = vsyncpa [#allocation5], 1 }
 0x26c   :  { %389 = vsyncpa [#allocation8], 1 }

// kernel: _lambda_.16
= control target key start
LH: loop header
LB: loop body
LE: loop exit
PB: predicated region body
PF: predicated region fallthrough
CT: control target
= control target key end

     0   :  { %14 = vsyncpa [#allocation3], 0  ;;  %s1727_s30 = smov 0   ;;  %s1967_s0 = inlined_call_operand.vmem [shape: f32[2,8,128], index: 0, kind: input, shape index: {}]   ;;  %s1968_s1 = inlined_call_operand.vmem [shape: f32[1,128], index: 1, kind: input, shape index: {}]   ;;  %s1969_s2 = inlined_call_operand.vmem [shape: f32[1,128], index: 2, kind: input, shape index: {}]   ;;  %s1970_s3 = inlined_call_operand.vmem [shape: bf16[2,128,64], index: 3, kind: input, shape index: {}]   ;;  %s1971_s4 = inlined_call_operand.vmem [shape: bf16[2,128,64], index: 4, kind: input, shape index: {}]   ;;  %s1972_s5 = inlined_call_operand.vmem [shape: bf16[2,128,64], index: 5, kind: input, shape index: {}]   ;;  %s1973_s6 = inlined_call_operand.vmem [shape: bf16[2,64,128], index: 6, kind: input, shape index: {}]   ;;  %s1974_s7 = inlined_call_operand.hbm [shape: f32[1,128], index: 7, kind: input, shape index: {}]   ;;  %s1975_s8 = inlined_call_operand.vmem [shape: bf16[64,128], index: 8, kind: input, shape index: {}]   ;;  %s1976_s9 = inlined_call_operand.vmem [shape: f32[2,8,128], index: 9, kind: output, shape index: {}]  }
   0x1 LB: > { %s1269_s10 = sadd.s32 4294967295, %s1667_s30   ;;  %p1271_p0 = scmp.ge.s32.totalorder %s1667_s30, 1  ;;  %s1667_s30 = sphi %s1727_s30, %s20_s30  }
   0x2   : > { %p245_p1 = scmp.lt.s32.totalorder %s1667_s30, 3  ;;  %s275_s13 = sshll.u32 %s1974_s7, 4  ;;  %s276_s13 = int_to_ptr.hbm [resolvable:$true] %s275_s13 }
   0x3   : > { %p1596_p3 = scmp.eq.s32.totalorder %s1269_s10, 0  ;;  %s1669_s14 = smov [#allocation2]  }
   0x4   : > { %p246_p2 = pnand %p1271_p0, %p245_p1  ;;  %s277_s15 = sshll.u32 %s1669_s14, 4  ;;  %s278_s15 = int_to_ptr.vmem [resolvable:$true] %s277_s15 }
   0x6   : > { %p1592_p4 = pneg %p246_p2  ;;  %300 = sbr.rel (%p246_p2) target bundleno = 1765 (0x6e5), region = 56 }
   0x8   : > { %p1593_p5 = pnand %p1596_p3, %p1592_p4 }
   0xa   : > { %1595 = dma.hbm_to_vmem [thread:$0]  (!%p1593_p5), %s276_s13, 16, %s278_s15, [#allocation3]  }
   0xb   : > { %1662 = dma.done.wait (%p1596_p3), [#allocation3], 16  }
   0xc   : > { %1664 = vsyncadd (%p1596_p3), [#allocation3], 4294967280  ;;  %p335_p6 = scmp.lt.s32.totalorder %s1269_s10, 1  ;;  %v1535_v1 = vld [vmem:[%s1970_s3 + $0x38] sm:$0xff]  ;;  %v1534_v4 = vld [vmem:[%s1970_s3 + $0x30] sm:$0xff]  ;;  %vm846_vm3 = vcmask 523264  }
   0xd   : > { %v1543_v2 = vld [vmem:[%s1970_s3 + $0x78] sm:$0xff]  ;;  %458 = vmatpush.bf16.msra.mxu0 %v1535_v1  ;;  %v1542_v5 = vld [vmem:[%s1970_s3 + $0x70] sm:$0xff]  ;;  %v1533_v6 = vld [vmem:[%s1970_s3 + $0x28] sm:$0xff]  ;;  %vm1062_vm4 = vcmask 1043456   ;;  %s1670_s20 = smov 1   ;;  %s1671_s21 = smov 2  }
   0xe   : > { %s1978_s10 = smov (!%p335_p6, %s1269_s10), 1  ;;  %519 = vmatpush.bf16.msra.mxu1 %v1543_v2  ;;  %v1541_v7 = vld [vmem:[%s1970_s3 + $0x68] sm:$0xff]  ;;  %v1532_v8 = vld [vmem:[%s1970_s3 + $0x20] sm:$0xff]  ;;  %v1551_v10 = vld [vmem:[%s1971_s4 + $0x38] sm:$0xff]  ;;  %s1672_s22 = smov 4   ;;  %vm1034_vm12 = vcmask 64512  }
   0xf   : > { %s1276_s16 = sshll.u32 %s1978_s10, 3  ;;  %v1540_v9 = vld [vmem:[%s1970_s3 + $0x60] sm:$0xff]  ;;  %v1559_v11 = vld [vmem:[%s1971_s4 + $0x78] sm:$0xff]  ;;  %612 = vmatpush.bf16.msra.mxu2 %v1551_v10  ;;  %v1550_v14 = vld [vmem:[%s1971_s4 + $0x30] sm:$0xff]  ;;  %s1673_s23 = smov 8  }
  0x10   : > { %s338_s19 = scalar_lea.vmem %s1967_s0, %s1276_s16  ;;  %673 = vmatpush.bf16.msra.mxu3 %v1559_v11  ;;  %v1531_v12 = vld [vmem:[%s1970_s3 + $0x18] sm:$0xff]  ;;  %v1558_v15 = vld [vmem:[%s1971_s4 + $0x70] sm:$0xff]  ;;  %v1549_v18 = vld [vmem:[%s1971_s4 + $0x28] sm:$0xff]  ;;  %s1674_s24 = smov 16  }
  0x11   : > { %v1746_v0 = vld [vmem:[%s338_s19] sm:$0xff]  ;;  %459 = vmatpush.bf16.msra.mxu0 %v1534_v4  ;;  %v1539_v13 = vld [vmem:[%s1970_s3 + $0x58] sm:$0xff]  ;;  %v1530_v16 = vld [vmem:[%s1970_s3 + $0x10] sm:$0xff]  ;;  %s1675_s25 = smov 32   ;;  %s1676_s26 = smov 64  }
  0x12   : > { %347 = vadd.xlane.f32.xlu0 %v1746_v0  ;;  %v350_v3 = vmul.f32 %v1746_v0, %v1746_v0  ;;  %520 = vmatpush.bf16.msra.mxu1 %v1542_v5  ;;  %v1538_v17 = vld [vmem:[%s1970_s3 + $0x50] sm:$0xff]  ;;  %v1557_v19 = vld [vmem:[%s1971_s4 + $0x68] sm:$0xff]  ;;  %v1548_v22 = vld [vmem:[%s1971_s4 + $0x20] sm:$0xff]  ;;  %s342_s27 = scalar_lea.vmem %s1976_s9, %s1276_s16 }
  0x13   : > { %613 = vmatpush.bf16.msra.mxu2 %v1550_v14  ;;  %v1529_v20 = vld [vmem:[%s1970_s3 + $0x8] sm:$0xff]  ;;  %v1556_v23 = vld [vmem:[%s1971_s4 + $0x60] sm:$0xff]  ;;  %v1547_v26 = vld [vmem:[%s1971_s4 + $0x18] sm:$0xff] }
  0x14   : > { %674 = vmatpush.bf16.msra.mxu3 %v1558_v15  ;;  %v1537_v21 = vld [vmem:[%s1970_s3 + $0x48] sm:$0xff]  ;;  %v1528_v24 = vld [vmem:[%s1970_s3] sm:$0xff]  ;;  %v1555_v27 = vld [vmem:[%s1971_s4 + $0x58] sm:$0xff] }
  0x15   : > { %460 = vmatpush.bf16.msra.mxu0 %v1533_v6  ;;  %v1536_v25 = vld [vmem:[%s1970_s3 + $0x40] sm:$0xff]  ;;  %v1567_v28 = vld [vmem:[%s1972_s5 + $0x38] sm:$0xff]  ;;  %v1546_v30 = vld [vmem:[%s1971_s4 + $0x10] sm:$0xff] }
  0x16   : > { %521 = vmatpush.bf16.msra.mxu1 %v1541_v7  ;;  %v1575_v29 = vld [vmem:[%s1972_s5 + $0x78] sm:$0xff]  ;;  %v1554_v31 = vld [vmem:[%s1971_s4 + $0x50] sm:$0xff]  ;;  %v1545_v35 = vld [vmem:[%s1971_s4 + $0x8] sm:$0xff] }
  0x17   : > { %614 = vmatpush.bf16.msra.mxu2 %v1549_v18  ;;  %v1566_v32 = vld [vmem:[%s1972_s5 + $0x30] sm:$0xff]  ;;  %v1553_v36 = vld [vmem:[%s1971_s4 + $0x48] sm:$0xff]  ;;  %v1544_v39 = vld [vmem:[%s1971_s4] sm:$0xff] }
  0x18   : > { %675 = vmatpush.bf16.msra.mxu3 %v1557_v19  ;;  %v1574_v33 = vld [vmem:[%s1972_s5 + $0x70] sm:$0xff]  ;;  %v1565_v37 = vld [vmem:[%s1972_s5 + $0x28] sm:$0xff]  ;;  %v1552_v40 = vld [vmem:[%s1971_s4 + $0x40] sm:$0xff] }
  0x19   : > { %461 = vmatpush.bf16.msra.mxu0 %v1532_v8  ;;  %v1573_v38 = vld [vmem:[%s1972_s5 + $0x68] sm:$0xff]  ;;  %v1564_v41 = vld [vmem:[%s1972_s5 + $0x20] sm:$0xff]  ;;  %v1563_v47 = vld [vmem:[%s1972_s5 + $0x18] sm:$0xff] }
  0x1a   : > { %351 = vadd.xlane.f32.xlu0 %v350_v3  ;;  %522 = vmatpush.bf16.msra.mxu1 %v1540_v9  ;;  %v1572_v43 = vld [vmem:[%s1972_s5 + $0x60] sm:$0xff]  ;;  %v1571_v48 = vld [vmem:[%s1972_s5 + $0x58] sm:$0xff]  ;;  %v1562_v50 = vld [vmem:[%s1972_s5 + $0x10] sm:$0xff] }
  0x1b   : > { %615 = vmatpush.bf16.msra.mxu2 %v1548_v22  ;;  %v1570_v51 = vld [vmem:[%s1972_s5 + $0x50] sm:$0xff]  ;;  %v1561_v53 = vld [vmem:[%s1972_s5 + $0x8] sm:$0xff]  ;;  %v1560_v55 = vld [vmem:[%s1972_s5] sm:$0xff] }
  0x1c   : > { %676 = vmatpush.bf16.msra.mxu3 %v1556_v23  ;;  %v1569_v54 = vld [vmem:[%s1972_s5 + $0x48] sm:$0xff]  ;;  %v1568_v56 = vld [vmem:[%s1972_s5 + $0x40] sm:$0xff]  ;;  %v1578_v19 = vld [vmem:[%s1975_s8 + $0x10] sm:$0xff] }
  0x1d   : > { %462 = vmatpush.bf16.msra.mxu0 %v1531_v12  ;;  %v1614_v1 = vld [vmem:[%s1968_s1] ss:$0 sm:$0xff] }
  0x1e   : > { %523 = vmatpush.bf16.msra.mxu1 %v1539_v13  ;;  %v1615_v3 = vld [vmem:[%s1969_s2] ss:$0 sm:$0xff] }
  0x1f   : > { %616 = vmatpush.bf16.msra.mxu2 %v1547_v26 }
  0x20   : > { %677 = vmatpush.bf16.msra.mxu3 %v1555_v27 }
  0x21   : > { %463 = vmatpush.bf16.msra.mxu0 %v1530_v16  ;;  %v1579_v16 = vld [vmem:[%s1975_s8 + $0x18] sm:$0xff] }
  0x22   : > { %524 = vmatpush.bf16.msra.mxu1 %v1538_v17 }
  0x23   : > { %617 = vmatpush.bf16.msra.mxu2 %v1546_v30 }
  0x24   : > { %678 = vmatpush.bf16.msra.mxu3 %v1554_v31  ;;  %v1576_v31 = vld [vmem:[%s1975_s8] sm:$0xff] }
  0x25   : > { %464 = vmatpush.bf16.msra.mxu0 %v1529_v20 }
  0x26   : > { %525 = vmatpush.bf16.msra.mxu1 %v1537_v21 }
  0x27   : > { %618 = vmatpush.bf16.msra.mxu2 %v1545_v35 }
  0x28   : > { %679 = vmatpush.bf16.msra.mxu3 %v1553_v36 }
  0x29   : > { %465 = vmatpush.bf16.msra.mxu0 %v1528_v24 }
  0x2a   : > { %526 = vmatpush.bf16.msra.mxu1 %v1536_v25 }
  0x2b   : > { %619 = vmatpush.bf16.msra.mxu2 %v1544_v39 }
  0x2c   : > { %680 = vmatpush.bf16.msra.mxu3 %v1552_v40 }
  0x2d   : > { %766 = vmatpush.bf16.msrb.mxu0 %v1567_v28  ;;  %v1577_v28 = vld [vmem:[%s1975_s8 + $0x8] sm:$0xff] }
  0x2e   : > { %827 = vmatpush.bf16.msrb.mxu1 %v1575_v29 }
  0x31   : > { %767 = vmatpush.bf16.msrb.mxu0 %v1566_v32 }
  0x32   : > { %828 = vmatpush.bf16.msrb.mxu1 %v1574_v33 }
  0x35   : > { %768 = vmatpush.bf16.msrb.mxu0 %v1565_v37 }
  0x36   : > { %829 = vmatpush.bf16.msrb.mxu1 %v1573_v38 }
  0x39   : > { %769 = vmatpush.bf16.msrb.mxu0 %v1564_v41 }
  0x3a   : > { %830 = vmatpush.bf16.msrb.mxu1 %v1572_v43 }
  0x3d   : > { %770 = vmatpush.bf16.msrb.mxu0 %v1563_v47 }
  0x3e   : > { %831 = vmatpush.bf16.msrb.mxu1 %v1571_v48 }
  0x41   : > { %771 = vmatpush.bf16.msrb.mxu0 %v1562_v50 }
  0x42   : > { %832 = vmatpush.bf16.msrb.mxu1 %v1570_v51 }
  0x45   : > { %772 = vmatpush.bf16.msrb.mxu0 %v1561_v53 }
  0x46   : > { %833 = vmatpush.bf16.msrb.mxu1 %v1569_v54 }
  0x49   : > { %773 = vmatpush.bf16.msrb.mxu0 %v1560_v55 }
  0x4a   : > { %834 = vmatpush.bf16.msrb.mxu1 %v1568_v56 }
  0x85   : > { %v348_v34 = vpop.xlane.xlu0 %347 }
  0x86   : > { %v349_v42 = vmul.f32 0.03125, %v348_v34 }
  0x88   : > { %v354_v45 = vmul.f32 %v349_v42, %v349_v42  ;;  %v356_v63 = vsub.f32 %v1746_v0, %v349_v42 }
  0x8d   : > { %v352_v44 = vpop.xlane.xlu0 %351 }
  0x8e   : > { %v353_v46 = vmul.f32 0.03125, %v352_v44  ;;  %v947_v44 = vlaneseq }
  0x90   : > { %v355_v49 = vsub.f32 %v353_v46, %v354_v45  ;;  %v948_v45 = vshrl.u32 %v947_v44, 7 }
  0x92   : > { %v357_v52 = vadd.f32 1e-05, %v355_v49  ;;  %v949_v46 = vadd.s32 121, %v948_v45 }
  0x94   : > { %1617 = vrsqrt.f32 %v357_v52  ;;  %vm364_vm1 = vweird.f32 %v357_v52  ;;  %v954_v47 = vand.u32 127, %v949_v46 }
  0x96   : > { %v966_v48 = vand.u32 1, %v954_v47  ;;  %v976_v53 = vand.u32 2, %v954_v47 }
  0x98   : > { %vm967_vm5 = vcmp.ne.s32.totalorder %v966_v48, 0  ;;  %vm977_vm6 = vcmp.ne.s32.totalorder %v976_v53, 0  ;;  %v1587_v48 = vld [vmem:[%s1973_s6 + $0x38] sm:$0xff] }
  0x9a   : > { %v1618_v57 = vpop.eup %1617 }
  0x9b   : > { %v359_v58 = vmul.f32 %v1618_v57, %v357_v52  ;;  %vm365_vm0 = vweird.f32 %v1618_v57 }
  0x9c   : > { %vm366_vm2 = vmor %vm364_vm1, %vm365_vm0 }
  0x9d   : > { %v360_v59 = vmul.f32 %v1618_v57, %v359_v58  ;;  %v986_v58 = vand.u32 4, %v954_v47 }
  0x9f   : > { %v361_v60 = vmul.f32 0.5, %v360_v59  ;;  %vm987_vm7 = vcmp.ne.s32.totalorder %v986_v58, 0 }
  0xa1   : > { %v362_v61 = vsub.f32 1.5, %v361_v60 }
  0xa3   : > { %v363_v62 = vmul.f32 %v1618_v57, %v362_v61 }
  0xa5   : > { %v367_v2 = vsel %vm366_vm2, %v1618_v57, %v363_v62 }
  0xa6   : > { %v368_v4 = vmul.f32 %v367_v2, %v356_v63  ;;  %v996_v63 = vand.u32 8, %v954_v47 }
  0xa8   : > { %v372_v5 = vmul.f32 %v1614_v1, %v368_v4  ;;  %vm997_vm8 = vcmp.ne.s32.totalorder %v996_v63, 0 }
  0xaa   : > { %v376_v6 = vadd.f32 %v1615_v3, %v372_v5  ;;  %v1006_v5 = vand.u32 16, %v954_v47 }
  0xac   : > { %v377_v7 = vpack.c.bf16 %v376_v6, %v376_v6  ;;  %vm1007_vm9 = vcmp.ne.s32.totalorder %v1006_v5, 0 }
  0xae   : > { %466 = vmatmul.bf16.vlgmr.msra.gmra.mxu0 %v377_v7  ;;  %527 = vmatmul.bf16.vlgmr.msra.gmra.mxu1 %v377_v7 }
  0xaf   : > { %620 = vmatmul.bf16.vlgmr.msra.gmra.mxu2 %v377_v7  ;;  %681 = vmatmul.bf16.vlgmr.msra.gmra.mxu3 %v377_v7 }
  0xbe   : > { %774 = vmatmul.bf16.vlgmr.msrb.gmra.mxu0 %v377_v7  ;;  %835 = vmatmul.bf16.vlgmr.msrb.gmra.mxu1 %v377_v7 }
 0x12b   : > { %v467_v8 = vpop.f32.mrf.mxu0  ;;  %v528_v9 = vpop.f32.mrf.mxu1 }
 0x12c   : > { %v840_v22 = vpack.c.bf16 %v467_v8, %v467_v8  ;;  %v841_v23 = vpack.c.bf16 %v528_v9, %v528_v9 }
 0x132   : > { %v621_v10 = vpop.f32.mrf.mxu2  ;;  %v682_v11 = vpop.f32.mrf.mxu3 }
 0x133   : > { %v842_v12 = vpack.c.bf16 %v621_v10, %v621_v10  ;;  %v843_v13 = vpack.c.bf16 %v682_v11, %v682_v11  ;;  %v469_v14 = vpop.f32.mrf.mxu0  ;;  %v530_v15 = vpop.f32.mrf.mxu1  ;;  %v1016_v10 = vand.u32 32, %v954_v47 }
 0x134   : > { %v1026_v15 = vand.u32 64, %v954_v47  ;;  %v1580_v47 = vld [vmem:[%s1973_s6] sm:$0xff] }
 0x135   : > { %v851_v17 = vsel %vm846_vm3, %v842_v12, 0  ;;  %v870_v18 = vsel %vm846_vm3, %v843_v13, 0  ;;  %vm1017_vm10 = vcmp.ne.s32.totalorder %v1016_v10, 0 }
 0x136   : > { %860 = vmatpush.bf16.xpose.msrb.mxu2 %v851_v17  ;;  %879 = vmatpush.bf16.xpose.msrb.mxu3 %v870_v18  ;;  %vm1027_vm11 = vcmp.ne.s32.totalorder %v1026_v15, 0 }
 0x13a   : > { %v623_v20 = vpop.f32.mrf.mxu2  ;;  %v684_v21 = vpop.f32.mrf.mxu3 }
 0x13b   : > { %v775_v24 = vpop.f32.mrf.mxu0  ;;  %v836_v25 = vpop.f32.mrf.mxu1 }
 0x13c   : > { %v844_v26 = vpack.c.bf16 %v775_v24, %v775_v24  ;;  %v845_v27 = vpack.c.bf16 %v836_v25, %v836_v25 }
 0x13d   : > { %1470 = vmatmul.msk.bf16.vlgmr.msrb.gmra.mxu2 %vm846_vm3, %v840_v22  ;;  %1471 = vmatmul.msk.bf16.vlgmr.msrb.gmra.mxu3 %vm846_vm3, %v841_v23 }
 0x13e   : > { %923 = vmatpush.bf16.msra.mxu2 %v1579_v16  ;;  %936 = vmatpush.bf16.msra.mxu3 %v1579_v16  ;;  %v1064_v29 = vsel %vm1062_vm4, %v844_v26, 0  ;;  %v1083_v30 = vsel %vm1062_vm4, %v845_v27, 0 }
 0x13f   : > { %1073 = vmatpush.bf16.msra.mxu0 %v1064_v29  ;;  %1092 = vmatpush.bf16.msra.mxu1 %v1083_v30 }
 0x142   : > { %924 = vmatpush.bf16.msra.mxu2 %v1578_v19  ;;  %937 = vmatpush.bf16.msra.mxu3 %v1578_v19 }
 0x143   : > { %v777_v32 = vpop.f32.mrf.mxu0  ;;  %v838_v33 = vpop.f32.mrf.mxu1 }
 0x146   : > { %925 = vmatpush.bf16.msra.mxu2 %v1577_v28  ;;  %938 = vmatpush.bf16.msra.mxu3 %v1577_v28 }
 0x14a   : > { %926 = vmatpush.bf16.msra.mxu2 %v1576_v31  ;;  %939 = vmatpush.bf16.msra.mxu3 %v1576_v31 }
 0x14d   : > { %1488 = vmatmul.msk.bf16.vlgmr.msra.gmra.mxu2 %vm846_vm3, %v840_v22  ;;  %1489 = vmatmul.msk.bf16.vlgmr.msra.gmra.mxu3 %vm846_vm3, %v841_v23 }
 0x14e   : > { %1187 = vmatpush.bf16.msrb.mxu3 %v1587_v48 }
 0x1c0   : > { %v1920_v34 = vpop.f32.mrf.mxu2  ;;  %v1922_v35 = vpop.f32.mrf.mxu3 }
 0x1c1   : > { %v885_v16 = vmul.f32 0.125, %v1920_v34  ;;  %v886_v21 = vmul.f32 0.125, %v1922_v35 }
 0x1c8   : > { %v864_v36 = vpop.f32.mrf.mxu2  ;;  %v883_v37 = vpop.f32.mrf.mxu3 }
 0x1d0   : > { %v928_v38 = vpop.f32.mrf.mxu2  ;;  %v941_v39 = vpop.f32.mrf.mxu3 }
 0x1d1   : > { %v945_v40 = vmul.f32 0.125, %v928_v38  ;;  %v946_v43 = vmul.f32 0.125, %v941_v39 }
 0x1d3   : > { %962 = vrot.lane.b32.xlu1 %v945_v40, %s1670_s20 }
 0x1d8   : > { %v930_v41 = vpop.f32.mrf.mxu2  ;;  %v943_v42 = vpop.f32.mrf.mxu3 }
 0x1d9   : > { %v1582_v41 = vld [vmem:[%s1973_s6 + $0x10] sm:$0xff]  ;;  %v1581_v42 = vld [vmem:[%s1973_s6 + $0x8] sm:$0xff] }
 0x1db   : > { %964 = vrot.lane.b32.xlu1 %v946_v43, %s1670_s20 }
 0x245   : > { %v963_v49 = vpop.permute.xlu1 %962 }
 0x246   : > { %v970_v50 = vsel %vm967_vm5, %v963_v49, %v945_v40  ;;  %v1583_v40 = vld [vmem:[%s1973_s6 + $0x18] sm:$0xff]  ;;  %v1586_v49 = vld [vmem:[%s1973_s6 + $0x30] sm:$0xff] }
 0x247   : > { %972 = vrot.lane.b32.xlu2 %v970_v50, %s1671_s21  ;;  %1147 = vmatpush.bf16.msrb.mxu2 %v1583_v40 }
 0x248   : > { %1188 = vmatpush.bf16.msrb.mxu3 %v1586_v49 }
 0x24b   : > { %1148 = vmatpush.bf16.msrb.mxu2 %v1582_v41 }
 0x24d   : > { %v965_v51 = vpop.permute.xlu1 %964 }
 0x24e   : > { %v971_v52 = vsel %vm967_vm5, %v965_v51, %v946_v43 }
 0x24f   : > { %974 = vrot.lane.b32.xlu2 %v971_v52, %s1671_s21  ;;  %1149 = vmatpush.bf16.msrb.mxu2 %v1581_v42 }
 0x253   : > { %1150 = vmatpush.bf16.msrb.mxu2 %v1580_v47 }
 0x2a1   : > { %v973_v54 = vpop.permute.xlu2 %972 }
 0x2a2   : > { %v980_v55 = vsel %vm977_vm6, %v973_v54, %v970_v50  ;;  %v1585_v50 = vld [vmem:[%s1973_s6 + $0x28] sm:$0xff]  ;;  %v1584_v54 = vld [vmem:[%s1973_s6 + $0x20] sm:$0xff] }
 0x2a3   : > { %982 = vrot.lane.b32.xlu0 %v980_v55, %s1672_s22  ;;  %1189 = vmatpush.bf16.msrb.mxu3 %v1585_v50 }
 0x2a7   : > { %1190 = vmatpush.bf16.msrb.mxu3 %v1584_v54 }
 0x2a9   : > { %v975_v56 = vpop.permute.xlu2 %974 }
 0x2aa   : > { %v981_v57 = vsel %vm977_vm6, %v975_v56, %v971_v52 }
 0x2ab   : > { %984 = vrot.lane.b32.xlu1 %v981_v57, %s1672_s22 }
 0x315   : > { %v983_v59 = vpop.permute.xlu0 %982 }
 0x316   : > { %v990_v60 = vsel %vm987_vm7, %v983_v59, %v980_v55 }
 0x317   : > { %992 = vrot.lane.b32.xlu2 %v990_v60, %s1673_s23 }
 0x31d   : > { %v985_v61 = vpop.permute.xlu1 %984 }
 0x31e   : > { %v991_v62 = vsel %vm987_vm7, %v985_v61, %v981_v57 }
 0x31f   : > { %994 = vrot.lane.b32.xlu1 %v991_v62, %s1673_s23 }
 0x371   : > { %v993_v1 = vpop.permute.xlu2 %992 }
 0x372   : > { %v1000_v2 = vsel %vm997_vm8, %v993_v1, %v990_v60  ;;  %v1616_v60 = vld [vmem:[#allocation2] ss:$0 sm:$0xff] }
 0x373   : > { %1002 = vrot.lane.b32.xlu2 %v1000_v2, %s1674_s24 }
 0x391   : > { %v995_v3 = vpop.permute.xlu1 %994 }
 0x392   : > { %v1001_v4 = vsel %vm997_vm8, %v995_v3, %v991_v62 }
 0x393   : > { %1004 = vrot.lane.b32.xlu1 %v1001_v4, %s1674_s24 }
 0x3cd   : > { %v1003_v6 = vpop.permute.xlu2 %1002 }
 0x3ce   : > { %v1010_v7 = vsel %vm1007_vm9, %v1003_v6, %v1000_v2 }
 0x3cf   : > { %1012 = vrot.lane.b32.xlu2 %v1010_v7, %s1675_s25 }
 0x405   : > { %v1005_v8 = vpop.permute.xlu1 %1004 }
 0x406   : > { %v1011_v9 = vsel %vm1007_vm9, %v1005_v8, %v1001_v4 }
 0x407   : > { %1014 = vrot.lane.b32.xlu0 %v1011_v9, %s1675_s25 }
 0x429   : > { %v1013_v11 = vpop.permute.xlu2 %1012 }
 0x42a   : > { %v1020_v12 = vsel %vm1017_vm10, %v1013_v11, %v1010_v7 }
 0x42b   : > { %1022 = vrot.lane.b32.xlu1 %v1020_v12, %s1676_s26 }
 0x479   : > { %v1015_v13 = vpop.permute.xlu0 %1014 }
 0x47a   : > { %v1021_v14 = vsel %vm1017_vm10, %v1015_v13, %v1011_v9 }
 0x47b   : > { %1024 = vrot.lane.b32.xlu2 %v1021_v14, %s1676_s26 }
 0x49d   : > { %v1023_v17 = vpop.permute.xlu1 %1022 }
 0x49e   : > { %v1030_v18 = vsel %vm1027_vm11, %v1023_v17, %v1020_v12 }
 0x49f   : > { %v1032_v19 = vadd.f32 %v1030_v18, %v885_v16 }
 0x4a1   : > { %v1035_v20 = vsel %vm1034_vm12, %v1032_v19, -inf }
 0x4a2   : > { %1036 = vmax.xlane.f32.xlu0 %v1035_v20 }
 0x4d5   : > { %v1025_v22 = vpop.permute.xlu2 %1024 }
 0x4d6   : > { %v1031_v23 = vsel %vm1027_vm11, %v1025_v22, %v1021_v14 }
 0x4d7   : > { %v1033_v24 = vadd.f32 %v1031_v23, %v886_v21 }
 0x4d9   : > { %v1038_v25 = vsel %vm1034_vm12, %v1033_v24, -inf }
 0x4da   : > { %1039 = vmax.xlane.f32.xlu1 %v1038_v25 }
 0x515   : > { %v1037_v26 = vpop.xlane.xlu0 %1036 }
 0x516   : > { %v1041_v27 = vsub.f32 %v1032_v19, %v1037_v26 }
 0x518   : > { %v1043_v28 = vmul.f32 1.442695, %v1041_v27 }
 0x51a   : > { %1619 = vpow2.f32 %v1043_v28 }
 0x520   : > { %v1620_v29 = vpop.eup %1619 }
 0x521   : > { %v1047_v30 = vsel %vm1034_vm12, %v1620_v29, 0.0 }
 0x522   : > { %1048 = vadd.xlane.f32.xlu2 %v1047_v30 }
 0x54d   : > { %v1040_v31 = vpop.xlane.xlu1 %1039 }
 0x54e   : > { %v1042_v32 = vsub.f32 %v1033_v24, %v1040_v31 }
 0x550   : > { %v1045_v33 = vmul.f32 1.442695, %v1042_v32 }
 0x552   : > { %1621 = vpow2.f32 %v1045_v33 }
 0x558   : > { %v1622_v34 = vpop.eup %1621 }
 0x559   : > { %v1050_v35 = vsel %vm1034_vm12, %v1622_v34, 0.0 }
 0x55a   : > { %1051 = vadd.xlane.f32.xlu0 %v1050_v35 }
 0x595   : > { %v1049_v36 = vpop.xlane.xlu2 %1048 }
 0x596   : > { %1623 = vrcp.f32 %v1049_v36 }
 0x59c   : > { %v1624_v37 = vpop.eup %1623 }
 0x59d   : > { %v1055_v38 = vmul.f32 %v1624_v37, %v1620_v29 }
 0x59f   : > { %v1057_v39 = vpack.c.bf16 %v1055_v38, %v1055_v38 }
 0x5a1   : > { %1490 = vmatmul.msk.bf16.vlgmr.msra.gmra.mxu0 %vm1034_vm12, %v1057_v39 }
 0x5cd   : > { %v1052_v43 = vpop.xlane.xlu0 %1051 }
 0x5ce   : > { %1625 = vrcp.f32 %v1052_v43 }
 0x5d4   : > { %v1626_v44 = vpop.eup %1625 }
 0x5d5   : > { %v1056_v45 = vmul.f32 %v1626_v44, %v1622_v34 }
 0x5d7   : > { %v1058_v46 = vpack.c.bf16 %v1056_v45, %v1056_v45 }
 0x5d9   : > { %1491 = vmatmul.msk.bf16.vlgmr.msra.gmra.mxu1 %vm1034_vm12, %v1058_v46 }
 0x61e   : > { %v1075_v51 = vpop.f32.mrf.mxu0 }
 0x61f   : > { %v1098_v52 = vpack.c.bf16 %v1075_v51, %v1075_v51 }
 0x621   : > { %1508 = vmatmul.msk.bf16.vlgmr.msrb.gmra.mxu2 %vm846_vm3, %v1098_v52 }
 0x626   : > { %v1077_v53 = vpop.f32.mrf.mxu0 }
 0x656   : > { %v1094_v55 = vpop.f32.mrf.mxu1 }
 0x657   : > { %v1099_v56 = vpack.c.bf16 %v1094_v55, %v1094_v55 }
 0x659   : > { %1525 = vmatmul.msk.bf16.vlgmr.msrb.gmra.mxu3 %vm846_vm3, %v1099_v56 }
 0x65e   : > { %v1096_v57 = vpop.f32.mrf.mxu1 }
 0x6a4   : > { %v1152_v58 = vpop.f32.mrf.mxu2 }
 0x6ac   : > { %v1154_v59 = vpop.f32.mrf.mxu2 }
 0x6dc   : > { %v1192_v61 = vpop.f32.mrf.mxu3 }
 0x6dd   : > { %v1196_v62 = vadd.f32 %v1192_v61, %v1152_v58 }
 0x6df   : > { %v1201_v63 = vadd.f32 %v1616_v60, %v1196_v62 }
 0x6e1   : > { %v1202_v1 = vadd.f32 %v1201_v63, %v1746_v0 }
 0x6e3   : > { %1203 = vst [vmem:[%s342_s27] sm:$0xff] %v1202_v1 }
 0x6e4   : > { %v1194_v2 = vpop.f32.mrf.mxu3 }
 0x6e5 PF: > { %s20_s30 = sadd.s32 1, %s1667_s30  }
 0x6e6   : > { %p17_p7 = scmp.ge.s32.totalorder %s20_s30, 4  }
 0x6e8   :  { %19 = sbr.rel (!%p17_p7) target bundleno = 1 (0x1), region = 91 }
 0x6ed   :  { %1223 = vsyncpa [#allocation3], 1 }
 0x6ee   :  { %1225 = vsyncpa [#allocation3 + $0x1], 1 }

// kernel: _lambda_.19
= control target key start
LH: loop header
LB: loop body
LE: loop exit
PB: predicated region body
PF: predicated region fallthrough
CT: control target
= control target key end

     0   :  { %s249_s0 = inlined_call_operand.vmem [shape: f32[16,128], index: 0, kind: input, shape index: {}]   ;;  %s250_s1 = inlined_call_operand.vmem [shape: bf16[128,128], index: 1, kind: input, shape index: {}]   ;;  %s251_s2 = inlined_call_operand.vmem [shape: f32[1,128], index: 2, kind: input, shape index: {}]   ;;  %s252_s3 = inlined_call_operand.hbm [shape: f32[16,128], index: 3, kind: output, shape index: {}]  }
   0x1   :  { %v159_v0 = vld [vmem:[%s250_s1 + $0x38] sm:$0xff]  ;;  %v158_v1 = vld [vmem:[%s250_s1 + $0x30] sm:$0xff] }
   0x2   :  { %86 = vmatpush.bf16.msra.mxu0 %v159_v0 }
   0x3   :  { %8 = vsyncpa [#allocation3], 0  ;;  %v157_v2 = vld [vmem:[%s250_s1 + $0x28] sm:$0xff]  ;;  %v156_v3 = vld [vmem:[%s250_s1 + $0x20] sm:$0xff]  ;;  %s190_s7 = smov [#allocation2]   ;;  %s108_s10 = sshll.u32 %s252_s3, 4  ;;  %s109_s10 = int_to_ptr.hbm [resolvable:$true] %s108_s10 }
   0x4   :  { %v155_v4 = vld [vmem:[%s250_s1 + $0x18] sm:$0xff]  ;;  %v154_v5 = vld [vmem:[%s250_s1 + $0x10] sm:$0xff]  ;;  %v153_v6 = vld [vmem:[%s250_s1 + $0x8] sm:$0xff]  ;;  %s192_s11 = smov 8  }
   0x5   :  { %v152_v7 = vld [vmem:[%s250_s1] sm:$0xff]  ;;  %v16_v9 = vld [vmem:[%s249_s0 + $0x8] sm:$0xff]  ;;  %s106_s1 = sshll.u32 %s190_s7, 4  ;;  %s107_s1 = int_to_ptr.vmem [resolvable:$true] %s106_s1 }
   0x6   :  { %87 = vmatpush.bf16.msra.mxu0 %v158_v1  ;;  %v15_v8 = vld [vmem:[%s249_s0] sm:$0xff]  ;;  %s191_s0 = smov 128  }
   0x7   :  { %v17_v10 = vpack.c.bf16 %v16_v9, %v15_v8  ;;  %v163_v11 = vld [vmem:[%s251_s2] ss:$0 sm:$0xff] }
   0xa   :  { %88 = vmatpush.bf16.msra.mxu0 %v157_v2 }
   0xe   :  { %89 = vmatpush.bf16.msra.mxu0 %v156_v3 }
  0x12   :  { %90 = vmatpush.bf16.msra.mxu0 %v155_v4 }
  0x16   :  { %91 = vmatpush.bf16.msra.mxu0 %v154_v5 }
  0x1a   :  { %92 = vmatpush.bf16.msra.mxu0 %v153_v6 }
  0x1e   :  { %93 = vmatpush.bf16.msra.mxu0 %v152_v7 }
  0x21   :  { %94 = vmatmul.bf16.vlgmr.msra.gmra.mxu0 %v17_v10 }
  0x9e   :  { %v95_v12 = vpop.f32.mrf.mxu0 }
  0x9f   :  { %v96_v13 = vadd.f32 %v163_v11, %v95_v12 }
  0xa1   :  { %100 = vst [vmem:[#allocation2] sm:$0xff] %v96_v13 }
  0xa6   :  { %v97_v14 = vpop.f32.mrf.mxu0 }
  0xa7   :  { %v98_v15 = vadd.f32 %v163_v11, %v97_v14 }
  0xa9   :  { %101 = vst [vmem:[#allocation2 + $0x8] sm:$0xff] %v98_v15 }
  0xaa   :  { %114 = dma.vmem_to_hbm [thread:$0]  %s107_s1, 256, %s109_s10, [#allocation3], %s191_s0, %s191_s0, %s192_s11  }
  0xab   :  { %188 = dma.done.wait [#allocation3], 256  }
  0xac   :  { %189 = vsyncadd [#allocation3], 4294967040 }
  0xad   :  { %119 = vsyncpa [#allocation3], 1 }

</bundles_post_ra>
